<compile_context>
chip_gen: v5e
topology: v5e:2x2
jax: 0.10.0
libtpu: 0.0.40
codegen_flags: <defaults>
</compile_context>

<pallas_src>
import functools
import math

import jax
import jax.numpy as jnp
from jax.experimental import pallas as pl
from jax.experimental.pallas import tpu as pltpu


def _round_up(x, m):
    return ((x + m - 1) // m) * m


def _leaky_relu(x, slope=0.2):
    return jnp.where(x >= 0, x, slope * x)


def _batchnorm(x, gamma, beta, row_mask, n_valid, eps=1e-5):
    """Training-mode BatchNorm1d: biased batch statistics over valid rows."""
    if row_mask is None:                       # no batch padding
        mean = jnp.mean(x, axis=0, keepdims=True)
        centered = x - mean
        var = jnp.mean(centered * centered, axis=0, keepdims=True)
    else:                                      # exclude zero-padded rows
        inv_n = 1.0 / float(n_valid)
        mean = jnp.sum(x * row_mask, axis=0, keepdims=True) * inv_n
        centered = (x - mean) * row_mask
        var = jnp.sum(centered * centered, axis=0, keepdims=True) * inv_n
    scale = jax.lax.rsqrt(var + eps) * gamma   # fold gamma into inv-std
    return centered * scale + beta


def _dot_bf16(a_f32, w_ref):
    # MXU path: bf16 x bf16 operands, f32 accumulate.
    return jnp.dot(a_f32.astype(jnp.bfloat16), w_ref[...],
                   preferred_element_type=jnp.float32)


def mygenerator_kernel(n_valid,
                       x_ref,
                       w1_ref, b1_ref,
                       w2_ref, b2_ref, g2_ref, be2_ref,
                       w3_ref, b3_ref, g3_ref, be3_ref,
                       w4_ref, b4_ref, g4_ref, be4_ref,
                       w5_ref, b5_ref,
                       o_ref):
    x = x_ref[...]                                       # [TILE_B, K_pad] f32
    tb = x.shape[0]

    if n_valid == tb:
        row_mask = None
    else:  # hoisted once, reused by all three BN layers
        rows = jax.lax.broadcasted_iota(jnp.int32, (tb, 1), 0)
        row_mask = (rows < n_valid).astype(jnp.float32)

    # Linear(D_in, 128) + LeakyReLU(0.2)
    h = _leaky_relu(_dot_bf16(x, w1_ref) + b1_ref[...])

    # Linear(128, 256) + LeakyReLU + BatchNorm1d(256)
    h = _leaky_relu(_dot_bf16(h, w2_ref) + b2_ref[...])
    h = _batchnorm(h, g2_ref[...], be2_ref[...], row_mask, n_valid)

    # Linear(256, 512) + LeakyReLU + BatchNorm1d(512)
    h = _leaky_relu(_dot_bf16(h, w3_ref) + b3_ref[...])
    h = _batchnorm(h, g3_ref[...], be3_ref[...], row_mask, n_valid)

    # Linear(512, 1024) + LeakyReLU + BatchNorm1d(1024)
    h = _leaky_relu(_dot_bf16(h, w4_ref) + b4_ref[...])
    h = _batchnorm(h, g4_ref[...], be4_ref[...], row_mask, n_valid)

    # Linear(1024, D_out) + Sigmoid.  sigmoid(h) == 0.5*(tanh(h/2)+1): exact
    # identity, runs on the EUP tanh slot, no f32 VPU divide, output in [0,1].
    h = _dot_bf16(h, w5_ref) + b5_ref[...]
    o_ref[...] = 0.5 * (jnp.tanh(0.5 * h) + 1.0)


def _linear_init(key, fan_in, fan_out):
    # PyTorch nn.Linear default: U(-1/sqrt(fan_in), 1/sqrt(fan_in)).
    kw, kb = jax.random.split(key)
    bound = 1.0 / math.sqrt(fan_in)
    w = jax.random.uniform(kw, (fan_in, fan_out), jnp.float32, -bound, bound)
    b = jax.random.uniform(kb, (1, fan_out), jnp.float32, -bound, bound)
    return w, b


def init_params(key, gen_in_dim, x_dim):
    d_in = int(math.prod(gen_in_dim))
    d_out = int(math.prod(x_dim))
    dims = [d_in, 128, 256, 512, 1024, d_out]
    keys = jax.random.split(key, 5)

    params = {}
    for i in range(5):
        w, b = _linear_init(keys[i], dims[i], dims[i + 1])
        params[f"w{i + 1}"] = w
        params[f"b{i + 1}"] = b
        # BatchNorm affine params for the 256 / 512 / 1024 layers.
        if i in (1, 2, 3):
            params[f"g{i + 1}"] = jnp.ones((1, dims[i + 1]), jnp.float32)   # gamma
            params[f"be{i + 1}"] = jnp.zeros((1, dims[i + 1]), jnp.float32)  # beta
    return params


def my_generator_forward(params, x, x_dim):
    b = x.shape[0]
    x2d = x.reshape(b, -1).astype(jnp.float32)         # nn.Flatten
    d_in = x2d.shape[1]
    d_out = int(math.prod(x_dim))

    # Lane/sublane-friendly zero padding (results are unchanged).
    k_pad = _round_up(d_in, 128)                        # layer-1 contraction dim
    b_pad = _round_up(b, 8)                             # sublane-aligned batch
    n_pad = _round_up(d_out, 128)                       # lane-dense output

    x_p = jnp.zeros((b_pad, k_pad), jnp.float32).at[:b, :d_in].set(x2d)

    # Weights in bf16 (halves the dominant HBM->VMEM weight traffic); biases
    # and BN affine params stay f32 (applied on the VPU in f32).
    w1 = jnp.zeros((k_pad, 128), jnp.float32).at[:d_in, :].set(params["w1"])
    w5 = jnp.zeros((1024, n_pad), jnp.float32).at[:, :d_out].set(params["w5"])
    b5 = jnp.zeros((1, n_pad), jnp.float32).at[:, :d_out].set(params["b5"])

    operands = [
        w1.astype(jnp.bfloat16), params["b1"],
        params["w2"].astype(jnp.bfloat16), params["b2"], params["g2"], params["be2"],
        params["w3"].astype(jnp.bfloat16), params["b3"], params["g3"], params["be3"],
        params["w4"].astype(jnp.bfloat16), params["b4"], params["g4"], params["be4"],
        w5.astype(jnp.bfloat16), b5,
    ]

    # Batch grid: activation tiles move per grid step, weights/biases/BN params
    # use a constant index_map (DMA'd once, VMEM-resident across steps).
    # TODO(synk): TILE_B must cover the full batch because training-mode
    # BatchNorm1d needs full-batch statistics; finer batch tiling would require
    # a two-pass (stats, then normalize) kernel design.
    tile_b = b_pad
    grid = (b_pad // tile_b,)

    in_specs = [pl.BlockSpec((tile_b, k_pad), lambda i: (i, 0))]
    in_specs += [pl.BlockSpec(p.shape, lambda i: (0, 0)) for p in operands]
    out_specs = pl.BlockSpec((tile_b, n_pad), lambda i: (i, 0))

    out_p = pl.pallas_call(
        functools.partial(mygenerator_kernel, b),
        out_shape=jax.ShapeDtypeStruct((b_pad, n_pad), jnp.float32),
        grid=grid,
        in_specs=in_specs,
        out_specs=out_specs,
        compiler_params=pltpu.CompilerParams(
            dimension_semantics=("parallel",)),
    )(x_p, *operands)

    out2d = out_p[:b, :d_out]
    return out2d.reshape((b,) + tuple(x_dim))           # LayerReshape(x_dim)


if __name__ == "__main__":
    gen_in_dim = (4, 4, 2)     # latent shape, prod = 32
    x_dim = (1, 16, 16)        # output image shape, prod = 256
    batch = 8

    key = jax.random.PRNGKey(0)
    k_params, k_x = jax.random.split(key)

    params = init_params(k_params, gen_in_dim, x_dim)
    x = jax.random.normal(k_x, (batch,) + gen_in_dim, dtype=jnp.float32)

    out = my_generator_forward(params, x, x_dim)
    out = jax.block_until_ready(out)

    assert out.shape == (batch,) + x_dim, out.shape
    assert bool(jnp.all(jnp.isfinite(out)))
    assert bool(jnp.all((out >= 0.0) & (out <= 1.0)))
    print("KERNEL_OK")
</pallas_src>

<mosaic_0001>
module attributes {stable_mosaic.version = 11 : i64} {
  func.func @mygenerator_kernel(%arg0: i32, %arg1: memref<8x128xf32, #tpu.memory_space<vmem>>, %arg2: memref<128x128xbf16, #tpu.memory_space<vmem>>, %arg3: memref<1x128xf32, #tpu.memory_space<vmem>>, %arg4: memref<128x256xbf16, #tpu.memory_space<vmem>>, %arg5: memref<1x256xf32, #tpu.memory_space<vmem>>, %arg6: memref<1x256xf32, #tpu.memory_space<vmem>>, %arg7: memref<1x256xf32, #tpu.memory_space<vmem>>, %arg8: memref<256x512xbf16, #tpu.memory_space<vmem>>, %arg9: memref<1x512xf32, #tpu.memory_space<vmem>>, %arg10: memref<1x512xf32, #tpu.memory_space<vmem>>, %arg11: memref<1x512xf32, #tpu.memory_space<vmem>>, %arg12: memref<512x1024xbf16, #tpu.memory_space<vmem>>, %arg13: memref<1x1024xf32, #tpu.memory_space<vmem>>, %arg14: memref<1x1024xf32, #tpu.memory_space<vmem>>, %arg15: memref<1x1024xf32, #tpu.memory_space<vmem>>, %arg16: memref<1024x256xbf16, #tpu.memory_space<vmem>>, %arg17: memref<1x256xf32, #tpu.memory_space<vmem>>, %arg18: memref<8x256xf32, #tpu.memory_space<vmem>>) attributes {dimension_semantics = [#tpu.dimension_semantics<parallel>], iteration_bounds = array<i64: 1>, scalar_prefetch = 0 : i64, scratch_operands = 0 : i64, tpu.core_type = #tpu.core_type<tc>, window_params = [{transform_indices = @transform_0, window_bounds = array<i64: 8, 128>}, {pipeline_mode = #tpu.pipeline_mode<synchronous>, transform_indices = @transform_1, window_bounds = array<i64: 128, 128>}, {pipeline_mode = #tpu.pipeline_mode<synchronous>, transform_indices = @transform_2, window_bounds = array<i64: 1, 128>}, {pipeline_mode = #tpu.pipeline_mode<synchronous>, transform_indices = @transform_3, window_bounds = array<i64: 128, 256>}, {pipeline_mode = #tpu.pipeline_mode<synchronous>, transform_indices = @transform_4, window_bounds = array<i64: 1, 256>}, {pipeline_mode = #tpu.pipeline_mode<synchronous>, transform_indices = @transform_5, window_bounds = array<i64: 1, 256>}, {pipeline_mode = #tpu.pipeline_mode<synchronous>, transform_indices = @transform_6, window_bounds = array<i64: 1, 256>}, {pipeline_mode = #tpu.pipeline_mode<synchronous>, transform_indices = @transform_7, window_bounds = array<i64: 256, 512>}, {pipeline_mode = #tpu.pipeline_mode<synchronous>, transform_indices = @transform_8, window_bounds = array<i64: 1, 512>}, {pipeline_mode = #tpu.pipeline_mode<synchronous>, transform_indices = @transform_9, window_bounds = array<i64: 1, 512>}, {pipeline_mode = #tpu.pipeline_mode<synchronous>, transform_indices = @transform_10, window_bounds = array<i64: 1, 512>}, {pipeline_mode = #tpu.pipeline_mode<synchronous>, transform_indices = @transform_11, window_bounds = array<i64: 512, 1024>}, {pipeline_mode = #tpu.pipeline_mode<synchronous>, transform_indices = @transform_12, window_bounds = array<i64: 1, 1024>}, {pipeline_mode = #tpu.pipeline_mode<synchronous>, transform_indices = @transform_13, window_bounds = array<i64: 1, 1024>}, {pipeline_mode = #tpu.pipeline_mode<synchronous>, transform_indices = @transform_14, window_bounds = array<i64: 1, 1024>}, {pipeline_mode = #tpu.pipeline_mode<synchronous>, transform_indices = @transform_15, window_bounds = array<i64: 1024, 256>}, {pipeline_mode = #tpu.pipeline_mode<synchronous>, transform_indices = @transform_16, window_bounds = array<i64: 1, 256>}, {transform_indices = @transform_17, window_bounds = array<i64: 8, 256>}]} {
    %c0 = arith.constant 0 : index
    %c0_0 = arith.constant 0 : index
    %0 = vector.load %arg1[%c0, %c0_0] : memref<8x128xf32, #tpu.memory_space<vmem>>, vector<8x128xf32>
    %1 = arith.truncf %0 : vector<8x128xf32> to vector<8x128xbf16>
    %c0_1 = arith.constant 0 : index
    %c0_2 = arith.constant 0 : index
    %2 = vector.load %arg2[%c0_1, %c0_2] : memref<128x128xbf16, #tpu.memory_space<vmem>>, vector<128x128xbf16>
    %cst = arith.constant dense<0.000000e+00> : vector<8x128xf32>
    %3 = tpu.matmul %1, %2, %cst {dimension_numbers = #tpu.dot_dimension_numbers<[1], [0], [0], [1], [0, 0, 1, 1], [], []>} : vector<8x128xbf16>, vector<128x128xbf16>, vector<8x128xf32> -> vector<8x128xf32>
    %c0_3 = arith.constant 0 : index
    %c0_4 = arith.constant 0 : index
    %4 = vector.load %arg3[%c0_3, %c0_4] : memref<1x128xf32, #tpu.memory_space<vmem>>, vector<1x128xf32>
    %5 = vector.broadcast %4 : vector<1x128xf32> to vector<8x128xf32>
    %6 = arith.addf %3, %5 : vector<8x128xf32>
    %cst_5 = arith.constant 0.000000e+00 : f32
    %7 = vector.broadcast %cst_5 : f32 to vector<8x128xf32>
    %8 = arith.cmpf oge, %6, %7 : vector<8x128xf32>
    %cst_6 = arith.constant 2.000000e-01 : f32
    %9 = vector.broadcast %cst_6 : f32 to vector<8x128xf32>
    %10 = arith.mulf %9, %6 : vector<8x128xf32>
    %11 = arith.select %8, %6, %10 : vector<8x128xi1>, vector<8x128xf32>
    %12 = arith.truncf %11 : vector<8x128xf32> to vector<8x128xbf16>
    %c0_7 = arith.constant 0 : index
    %c0_8 = arith.constant 0 : index
    %13 = vector.load %arg4[%c0_7, %c0_8] : memref<128x256xbf16, #tpu.memory_space<vmem>>, vector<128x256xbf16>
    %cst_9 = arith.constant dense<0.000000e+00> : vector<8x256xf32>
    %14 = tpu.matmul %12, %13, %cst_9 {dimension_numbers = #tpu.dot_dimension_numbers<[1], [0], [0], [1], [0, 0, 1, 1], [], []>} : vector<8x128xbf16>, vector<128x256xbf16>, vector<8x256xf32> -> vector<8x256xf32>
    %c0_10 = arith.constant 0 : index
    %c0_11 = arith.constant 0 : index
    %15 = vector.load %arg5[%c0_10, %c0_11] : memref<1x256xf32, #tpu.memory_space<vmem>>, vector<1x256xf32>
    %16 = vector.broadcast %15 : vector<1x256xf32> to vector<8x256xf32>
    %17 = arith.addf %14, %16 : vector<8x256xf32>
    %cst_12 = arith.constant 0.000000e+00 : f32
    %18 = vector.broadcast %cst_12 : f32 to vector<8x256xf32>
    %19 = arith.cmpf oge, %17, %18 : vector<8x256xf32>
    %cst_13 = arith.constant 2.000000e-01 : f32
    %20 = vector.broadcast %cst_13 : f32 to vector<8x256xf32>
    %21 = arith.mulf %20, %17 : vector<8x256xf32>
    %22 = arith.select %19, %17, %21 : vector<8x256xi1>, vector<8x256xf32>
    %c0_14 = arith.constant 0 : index
    %c0_15 = arith.constant 0 : index
    %23 = vector.load %arg6[%c0_14, %c0_15] : memref<1x256xf32, #tpu.memory_space<vmem>>, vector<1x256xf32>
    %c0_16 = arith.constant 0 : index
    %c0_17 = arith.constant 0 : index
    %24 = vector.load %arg7[%c0_16, %c0_17] : memref<1x256xf32, #tpu.memory_space<vmem>>, vector<1x256xf32>
    %cst_18 = arith.constant dense<0.000000e+00> : vector<256xf32>
    %25 = vector.multi_reduction <add>, %22, %cst_18 [0] : vector<8x256xf32> to vector<256xf32>
    %26 = vector.shape_cast %25 : vector<256xf32> to vector<1x256xf32>
    %cst_19 = arith.constant 8.000000e+00 : f32
    %27 = vector.broadcast %cst_19 : f32 to vector<1x256xf32>
    %28 = arith.divf %26, %27 : vector<1x256xf32>
    %29 = vector.broadcast %28 : vector<1x256xf32> to vector<8x256xf32>
    %30 = arith.subf %22, %29 : vector<8x256xf32>
    %31 = arith.mulf %30, %30 : vector<8x256xf32>
    %cst_20 = arith.constant dense<0.000000e+00> : vector<256xf32>
    %32 = vector.multi_reduction <add>, %31, %cst_20 [0] : vector<8x256xf32> to vector<256xf32>
    %33 = vector.shape_cast %32 : vector<256xf32> to vector<1x256xf32>
    %cst_21 = arith.constant 8.000000e+00 : f32
    %34 = vector.broadcast %cst_21 : f32 to vector<1x256xf32>
    %35 = arith.divf %33, %34 : vector<1x256xf32>
    %cst_22 = arith.constant 9.99999974E-6 : f32
    %36 = vector.broadcast %cst_22 : f32 to vector<1x256xf32>
    %37 = arith.addf %35, %36 : vector<1x256xf32>
    %38 = math.rsqrt %37 : vector<1x256xf32>
    %39 = arith.mulf %38, %23 : vector<1x256xf32>
    %40 = vector.broadcast %39 : vector<1x256xf32> to vector<8x256xf32>
    %41 = arith.mulf %30, %40 : vector<8x256xf32>
    %42 = vector.broadcast %24 : vector<1x256xf32> to vector<8x256xf32>
    %43 = arith.addf %41, %42 : vector<8x256xf32>
    %44 = arith.truncf %43 : vector<8x256xf32> to vector<8x256xbf16>
    %c0_23 = arith.constant 0 : index
    %c0_24 = arith.constant 0 : index
    %45 = vector.load %arg8[%c0_23, %c0_24] : memref<256x512xbf16, #tpu.memory_space<vmem>>, vector<256x512xbf16>
    %cst_25 = arith.constant dense<0.000000e+00> : vector<8x512xf32>
    %46 = tpu.matmul %44, %45, %cst_25 {dimension_numbers = #tpu.dot_dimension_numbers<[1], [0], [0], [1], [0, 0, 1, 1], [], []>} : vector<8x256xbf16>, vector<256x512xbf16>, vector<8x512xf32> -> vector<8x512xf32>
    %c0_26 = arith.constant 0 : index
    %c0_27 = arith.constant 0 : index
    %47 = vector.load %arg9[%c0_26, %c0_27] : memref<1x512xf32, #tpu.memory_space<vmem>>, vector<1x512xf32>
    %48 = vector.broadcast %47 : vector<1x512xf32> to vector<8x512xf32>
    %49 = arith.addf %46, %48 : vector<8x512xf32>
    %cst_28 = arith.constant 0.000000e+00 : f32
    %50 = vector.broadcast %cst_28 : f32 to vector<8x512xf32>
    %51 = arith.cmpf oge, %49, %50 : vector<8x512xf32>
    %cst_29 = arith.constant 2.000000e-01 : f32
    %52 = vector.broadcast %cst_29 : f32 to vector<8x512xf32>
    %53 = arith.mulf %52, %49 : vector<8x512xf32>
    %54 = arith.select %51, %49, %53 : vector<8x512xi1>, vector<8x512xf32>
    %c0_30 = arith.constant 0 : index
    %c0_31 = arith.constant 0 : index
    %55 = vector.load %arg10[%c0_30, %c0_31] : memref<1x512xf32, #tpu.memory_space<vmem>>, vector<1x512xf32>
    %c0_32 = arith.constant 0 : index
    %c0_33 = arith.constant 0 : index
    %56 = vector.load %arg11[%c0_32, %c0_33] : memref<1x512xf32, #tpu.memory_space<vmem>>, vector<1x512xf32>
    %cst_34 = arith.constant dense<0.000000e+00> : vector<512xf32>
    %57 = vector.multi_reduction <add>, %54, %cst_34 [0] : vector<8x512xf32> to vector<512xf32>
    %58 = vector.shape_cast %57 : vector<512xf32> to vector<1x512xf32>
    %cst_35 = arith.constant 8.000000e+00 : f32
    %59 = vector.broadcast %cst_35 : f32 to vector<1x512xf32>
    %60 = arith.divf %58, %59 : vector<1x512xf32>
    %61 = vector.broadcast %60 : vector<1x512xf32> to vector<8x512xf32>
    %62 = arith.subf %54, %61 : vector<8x512xf32>
    %63 = arith.mulf %62, %62 : vector<8x512xf32>
    %cst_36 = arith.constant dense<0.000000e+00> : vector<512xf32>
    %64 = vector.multi_reduction <add>, %63, %cst_36 [0] : vector<8x512xf32> to vector<512xf32>
    %65 = vector.shape_cast %64 : vector<512xf32> to vector<1x512xf32>
    %cst_37 = arith.constant 8.000000e+00 : f32
    %66 = vector.broadcast %cst_37 : f32 to vector<1x512xf32>
    %67 = arith.divf %65, %66 : vector<1x512xf32>
    %cst_38 = arith.constant 9.99999974E-6 : f32
    %68 = vector.broadcast %cst_38 : f32 to vector<1x512xf32>
    %69 = arith.addf %67, %68 : vector<1x512xf32>
    %70 = math.rsqrt %69 : vector<1x512xf32>
    %71 = arith.mulf %70, %55 : vector<1x512xf32>
    %72 = vector.broadcast %71 : vector<1x512xf32> to vector<8x512xf32>
    %73 = arith.mulf %62, %72 : vector<8x512xf32>
    %74 = vector.broadcast %56 : vector<1x512xf32> to vector<8x512xf32>
    %75 = arith.addf %73, %74 : vector<8x512xf32>
    %76 = arith.truncf %75 : vector<8x512xf32> to vector<8x512xbf16>
    %c0_39 = arith.constant 0 : index
    %c0_40 = arith.constant 0 : index
    %77 = vector.load %arg12[%c0_39, %c0_40] : memref<512x1024xbf16, #tpu.memory_space<vmem>>, vector<512x1024xbf16>
    %cst_41 = arith.constant dense<0.000000e+00> : vector<8x1024xf32>
    %78 = tpu.matmul %76, %77, %cst_41 {dimension_numbers = #tpu.dot_dimension_numbers<[1], [0], [0], [1], [0, 0, 1, 1], [], []>} : vector<8x512xbf16>, vector<512x1024xbf16>, vector<8x1024xf32> -> vector<8x1024xf32>
    %c0_42 = arith.constant 0 : index
    %c0_43 = arith.constant 0 : index
    %79 = vector.load %arg13[%c0_42, %c0_43] : memref<1x1024xf32, #tpu.memory_space<vmem>>, vector<1x1024xf32>
    %80 = vector.broadcast %79 : vector<1x1024xf32> to vector<8x1024xf32>
    %81 = arith.addf %78, %80 : vector<8x1024xf32>
    %cst_44 = arith.constant 0.000000e+00 : f32
    %82 = vector.broadcast %cst_44 : f32 to vector<8x1024xf32>
    %83 = arith.cmpf oge, %81, %82 : vector<8x1024xf32>
    %cst_45 = arith.constant 2.000000e-01 : f32
    %84 = vector.broadcast %cst_45 : f32 to vector<8x1024xf32>
    %85 = arith.mulf %84, %81 : vector<8x1024xf32>
    %86 = arith.select %83, %81, %85 : vector<8x1024xi1>, vector<8x1024xf32>
    %c0_46 = arith.constant 0 : index
    %c0_47 = arith.constant 0 : index
    %87 = vector.load %arg14[%c0_46, %c0_47] : memref<1x1024xf32, #tpu.memory_space<vmem>>, vector<1x1024xf32>
    %c0_48 = arith.constant 0 : index
    %c0_49 = arith.constant 0 : index
    %88 = vector.load %arg15[%c0_48, %c0_49] : memref<1x1024xf32, #tpu.memory_space<vmem>>, vector<1x1024xf32>
    %cst_50 = arith.constant dense<0.000000e+00> : vector<1024xf32>
    %89 = vector.multi_reduction <add>, %86, %cst_50 [0] : vector<8x1024xf32> to vector<1024xf32>
    %90 = vector.shape_cast %89 : vector<1024xf32> to vector<1x1024xf32>
    %cst_51 = arith.constant 8.000000e+00 : f32
    %91 = vector.broadcast %cst_51 : f32 to vector<1x1024xf32>
    %92 = arith.divf %90, %91 : vector<1x1024xf32>
    %93 = vector.broadcast %92 : vector<1x1024xf32> to vector<8x1024xf32>
    %94 = arith.subf %86, %93 : vector<8x1024xf32>
    %95 = arith.mulf %94, %94 : vector<8x1024xf32>
    %cst_52 = arith.constant dense<0.000000e+00> : vector<1024xf32>
    %96 = vector.multi_reduction <add>, %95, %cst_52 [0] : vector<8x1024xf32> to vector<1024xf32>
    %97 = vector.shape_cast %96 : vector<1024xf32> to vector<1x1024xf32>
    %cst_53 = arith.constant 8.000000e+00 : f32
    %98 = vector.broadcast %cst_53 : f32 to vector<1x1024xf32>
    %99 = arith.divf %97, %98 : vector<1x1024xf32>
    %cst_54 = arith.constant 9.99999974E-6 : f32
    %100 = vector.broadcast %cst_54 : f32 to vector<1x1024xf32>
    %101 = arith.addf %99, %100 : vector<1x1024xf32>
    %102 = math.rsqrt %101 : vector<1x1024xf32>
    %103 = arith.mulf %102, %87 : vector<1x1024xf32>
    %104 = vector.broadcast %103 : vector<1x1024xf32> to vector<8x1024xf32>
    %105 = arith.mulf %94, %104 : vector<8x1024xf32>
    %106 = vector.broadcast %88 : vector<1x1024xf32> to vector<8x1024xf32>
    %107 = arith.addf %105, %106 : vector<8x1024xf32>
    %108 = arith.truncf %107 : vector<8x1024xf32> to vector<8x1024xbf16>
    %c0_55 = arith.constant 0 : index
    %c0_56 = arith.constant 0 : index
    %109 = vector.load %arg16[%c0_55, %c0_56] : memref<1024x256xbf16, #tpu.memory_space<vmem>>, vector<1024x256xbf16>
    %cst_57 = arith.constant dense<0.000000e+00> : vector<8x256xf32>
    %110 = tpu.matmul %108, %109, %cst_57 {dimension_numbers = #tpu.dot_dimension_numbers<[1], [0], [0], [1], [0, 0, 1, 1], [], []>} : vector<8x1024xbf16>, vector<1024x256xbf16>, vector<8x256xf32> -> vector<8x256xf32>
    %c0_58 = arith.constant 0 : index
    %c0_59 = arith.constant 0 : index
    %111 = vector.load %arg17[%c0_58, %c0_59] : memref<1x256xf32, #tpu.memory_space<vmem>>, vector<1x256xf32>
    %112 = vector.broadcast %111 : vector<1x256xf32> to vector<8x256xf32>
    %113 = arith.addf %110, %112 : vector<8x256xf32>
    %cst_60 = arith.constant 5.000000e-01 : f32
    %114 = vector.broadcast %cst_60 : f32 to vector<8x256xf32>
    %115 = arith.mulf %114, %113 : vector<8x256xf32>
    %116 = math.tanh %115 : vector<8x256xf32>
    %cst_61 = arith.constant 1.000000e+00 : f32
    %117 = vector.broadcast %cst_61 : f32 to vector<8x256xf32>
    %118 = arith.addf %116, %117 : vector<8x256xf32>
    %cst_62 = arith.constant 5.000000e-01 : f32
    %119 = vector.broadcast %cst_62 : f32 to vector<8x256xf32>
    %120 = arith.mulf %119, %118 : vector<8x256xf32>
    %c0_63 = arith.constant 0 : index
    %c0_64 = arith.constant 0 : index
    %121 = vector.load %arg18[%c0_63, %c0_64] : memref<8x256xf32, #tpu.memory_space<vmem>>, vector<8x256xf32>
    tpu.vector_store %arg18[%c0_63, %c0_64], %120 {strides = array<i32>} : memref<8x256xf32, #tpu.memory_space<vmem>>, vector<8x256xf32>,
    return
  }
  func.func @transform_0(%arg0: i32) -> (i32, i32) {
    %c0_i32 = arith.constant 0 : i32
    %c0_i32_0 = arith.constant 0 : i32
    return %arg0, %c0_i32 : i32, i32
  }
  func.func @transform_1(%arg0: i32) -> (i32, i32) {
    %c0_i32 = arith.constant 0 : i32
    %c0_i32_0 = arith.constant 0 : i32
    %c0_i32_1 = arith.constant 0 : i32
    return %c0_i32, %c0_i32_0 : i32, i32
  }
  func.func @transform_2(%arg0: i32) -> (i32, i32) {
    %c0_i32 = arith.constant 0 : i32
    %c0_i32_0 = arith.constant 0 : i32
    %c0_i32_1 = arith.constant 0 : i32
    return %c0_i32, %c0_i32_0 : i32, i32
  }
  func.func @transform_3(%arg0: i32) -> (i32, i32) {
    %c0_i32 = arith.constant 0 : i32
    %c0_i32_0 = arith.constant 0 : i32
    %c0_i32_1 = arith.constant 0 : i32
    return %c0_i32, %c0_i32_0 : i32, i32
  }
  func.func @transform_4(%arg0: i32) -> (i32, i32) {
    %c0_i32 = arith.constant 0 : i32
    %c0_i32_0 = arith.constant 0 : i32
    %c0_i32_1 = arith.constant 0 : i32
    return %c0_i32, %c0_i32_0 : i32, i32
  }
  func.func @transform_5(%arg0: i32) -> (i32, i32) {
    %c0_i32 = arith.constant 0 : i32
    %c0_i32_0 = arith.constant 0 : i32
    %c0_i32_1 = arith.constant 0 : i32
    return %c0_i32, %c0_i32_0 : i32, i32
  }
  func.func @transform_6(%arg0: i32) -> (i32, i32) {
    %c0_i32 = arith.constant 0 : i32
    %c0_i32_0 = arith.constant 0 : i32
    %c0_i32_1 = arith.constant 0 : i32
    return %c0_i32, %c0_i32_0 : i32, i32
  }
  func.func @transform_7(%arg0: i32) -> (i32, i32) {
    %c0_i32 = arith.constant 0 : i32
    %c0_i32_0 = arith.constant 0 : i32
    %c0_i32_1 = arith.constant 0 : i32
    return %c0_i32, %c0_i32_0 : i32, i32
  }
  func.func @transform_8(%arg0: i32) -> (i32, i32) {
    %c0_i32 = arith.constant 0 : i32
    %c0_i32_0 = arith.constant 0 : i32
    %c0_i32_1 = arith.constant 0 : i32
    return %c0_i32, %c0_i32_0 : i32, i32
  }
  func.func @transform_9(%arg0: i32) -> (i32, i32) {
    %c0_i32 = arith.constant 0 : i32
    %c0_i32_0 = arith.constant 0 : i32
    %c0_i32_1 = arith.constant 0 : i32
    return %c0_i32, %c0_i32_0 : i32, i32
  }
  func.func @transform_10(%arg0: i32) -> (i32, i32) {
    %c0_i32 = arith.constant 0 : i32
    %c0_i32_0 = arith.constant 0 : i32
    %c0_i32_1 = arith.constant 0 : i32
    return %c0_i32, %c0_i32_0 : i32, i32
  }
  func.func @transform_11(%arg0: i32) -> (i32, i32) {
    %c0_i32 = arith.constant 0 : i32
    %c0_i32_0 = arith.constant 0 : i32
    %c0_i32_1 = arith.constant 0 : i32
    return %c0_i32, %c0_i32_0 : i32, i32
  }
  func.func @transform_12(%arg0: i32) -> (i32, i32) {
    %c0_i32 = arith.constant 0 : i32
    %c0_i32_0 = arith.constant 0 : i32
    %c0_i32_1 = arith.constant 0 : i32
    return %c0_i32, %c0_i32_0 : i32, i32
  }
  func.func @transform_13(%arg0: i32) -> (i32, i32) {
    %c0_i32 = arith.constant 0 : i32
    %c0_i32_0 = arith.constant 0 : i32
    %c0_i32_1 = arith.constant 0 : i32
    return %c0_i32, %c0_i32_0 : i32, i32
  }
  func.func @transform_14(%arg0: i32) -> (i32, i32) {
    %c0_i32 = arith.constant 0 : i32
    %c0_i32_0 = arith.constant 0 : i32
    %c0_i32_1 = arith.constant 0 : i32
    return %c0_i32, %c0_i32_0 : i32, i32
  }
  func.func @transform_15(%arg0: i32) -> (i32, i32) {
    %c0_i32 = arith.constant 0 : i32
    %c0_i32_0 = arith.constant 0 : i32
    %c0_i32_1 = arith.constant 0 : i32
    return %c0_i32, %c0_i32_0 : i32, i32
  }
  func.func @transform_16(%arg0: i32) -> (i32, i32) {
    %c0_i32 = arith.constant 0 : i32
    %c0_i32_0 = arith.constant 0 : i32
    %c0_i32_1 = arith.constant 0 : i32
    return %c0_i32, %c0_i32_0 : i32, i32
  }
  func.func @transform_17(%arg0: i32) -> (i32, i32) {
    %c0_i32 = arith.constant 0 : i32
    %c0_i32_0 = arith.constant 0 : i32
    return %arg0, %c0_i32 : i32, i32
  }
}

</mosaic_0001>

<bundles_post_ra>
// kernel: tpu_custom_call.1
= control target key start
LH: loop header
LB: loop body
LE: loop exit
PB: predicated region body
PF: predicated region fallthrough
CT: control target
= control target key end

     0   :  { %s7918_s0 = inlined_call_operand.hbm [shape: f32[8,128], index: 0, kind: input, shape index: {}]   ;;  %s7919_s1 = inlined_call_operand.hbm [shape: bf16[128,128], index: 1, kind: input, shape index: {}]   ;;  %s7920_s2 = inlined_call_operand.hbm [shape: f32[1,128], index: 2, kind: input, shape index: {}]   ;;  %s7921_s3 = inlined_call_operand.hbm [shape: bf16[128,256], index: 3, kind: input, shape index: {}]   ;;  %s7922_s4 = inlined_call_operand.vmem [shape: f32[1,256], index: 4, kind: input, shape index: {}]   ;;  %s7923_s5 = inlined_call_operand.hbm [shape: f32[1,256], index: 5, kind: input, shape index: {}]   ;;  %s7924_s6 = inlined_call_operand.hbm [shape: f32[1,256], index: 6, kind: input, shape index: {}]   ;;  %s7925_s7 = inlined_call_operand.hbm [shape: bf16[256,512], index: 7, kind: input, shape index: {}]   ;;  %s7926_s8 = inlined_call_operand.hbm [shape: f32[1,512], index: 8, kind: input, shape index: {}]   ;;  %s7927_s9 = inlined_call_operand.hbm [shape: f32[1,512], index: 9, kind: input, shape index: {}]   ;;  %s7928_s10 = inlined_call_operand.hbm [shape: f32[1,512], index: 10, kind: input, shape index: {}]   ;;  %s7929_s11 = inlined_call_operand.hbm [shape: bf16[512,1024], index: 11, kind: input, shape index: {}]   ;;  %s7930_s12 = inlined_call_operand.vmem [shape: f32[1,1024], index: 12, kind: input, shape index: {}]   ;;  %s7931_s13 = inlined_call_operand.hbm [shape: f32[1,1024], index: 13, kind: input, shape index: {}]   ;;  %s7932_s14 = inlined_call_operand.hbm [shape: f32[1,1024], index: 14, kind: input, shape index: {}]   ;;  %s7933_s15 = inlined_call_operand.hbm [shape: bf16[1024,256], index: 15, kind: input, shape index: {}]   ;;  %s7934_s16 = inlined_call_operand.vmem [shape: f32[1,256], index: 16, kind: input, shape index: {}]   ;;  %s7935_s17 = inlined_call_operand.hbm [shape: f32[8,256], index: 17, kind: output, shape index: {}]  }
   0x1   :  { %7936 = sst [smem:[#allocation35_spill]] %s7918_s0 }
   0x2   :  { %7937 = sst [smem:[#allocation36_spill]] %s7919_s1 }
   0x3   :  { %22 = vsyncpa [#allocation3], 0 }
   0x4   :  { %23 = vsyncpa [#allocation6], 0 }
   0x5   :  { %24 = vsyncpa [#allocation9], 0 }
   0x6   :  { %25 = vsyncpa [#allocation12], 0 }
   0x7   :  { %26 = vsyncpa [#allocation15], 0 }
   0x8   :  { %27 = vsyncpa [#allocation18], 0 }
   0x9   :  { %28 = vsyncpa [#allocation21], 0 }
   0xa   :  { %29 = vsyncpa [#allocation24], 0  ;;  %s7938_s26 = sld [smem:[#allocation36_spill]] }
  0x10   :  { %s46_s27 = sshll.u32 %s7938_s26, 4  ;;  %s47_s27 = int_to_ptr.hbm [resolvable:$true] %s46_s27 }
  0x11   :  { %30 = vsyncpa [#allocation4], 0  ;;  %s7321_s28 = smov [#allocation5]   ;;  %s70_s18 = sshll.u32 %s7921_s3, 4  ;;  %s71_s18 = int_to_ptr.hbm [resolvable:$true] %s70_s18 }
  0x12   :  { %s48_s29 = sshll.u32 %s7321_s28, 4  ;;  %s7322_s19 = smov 64   ;;  %s49_s29 = int_to_ptr.vmem [resolvable:$true] %s48_s29 }
  0x13   :  { %s7323_s1 = smov 4   ;;  %s7324_s20 = smov [#allocation8]  }
  0x14   :  { %54 = dma.hbm_to_vmem [thread:$0]  %s47_s27, 1024, %s49_s29, [#allocation6], %s7322_s19, %s7322_s19, %s7323_s1  }
  0x15   :  { %s72_s21 = sshll.u32 %s7324_s20, 4  ;;  %s7325_s22 = smov 128   ;;  %s73_s21 = int_to_ptr.vmem [resolvable:$true] %s72_s21 }
  0x16   :  { %s7326_s23 = smov 8   ;;  %s97_s26 = sshll.u32 %s7924_s6, 4  ;;  %s98_s26 = int_to_ptr.hbm [resolvable:$true] %s97_s26 }
  0x17   :  { %78 = dma.hbm_to_vmem [thread:$0]  %s71_s18, 2048, %s73_s21, [#allocation9], %s7325_s22, %s7325_s22, %s7326_s23  }
  0x18   :  { %s7327_s28 = smov [#allocation11]   ;;  %s121_s29 = sshll.u32 %s7926_s8, 4  ;;  %s122_s29 = int_to_ptr.hbm [resolvable:$true] %s121_s29 }
  0x19   :  { %s99_s3 = sshll.u32 %s7327_s28, 4  ;;  %s7328_s30 = smov [#allocation14]   ;;  %s100_s3 = int_to_ptr.vmem [resolvable:$true] %s99_s3 }
  0x1a   :  { %102 = dma.hbm_to_vmem [thread:$0]  %s98_s26, 32, %s100_s3, [#allocation12]  }
  0x1b   :  { %s123_s19 = sshll.u32 %s7328_s30, 4  ;;  %s143_s18 = sshll.u32 %s7928_s10, 4  ;;  %s124_s19 = int_to_ptr.vmem [resolvable:$true] %s123_s19  ;;  %s144_s18 = int_to_ptr.hbm [resolvable:$true] %s143_s18 }
  0x1c   :  { %126 = dma.hbm_to_vmem [thread:$0]  %s122_s29, 64, %s124_s19, [#allocation15]  }
  0x1d   :  { %s169_s24 = sshll.u32 %s7931_s13, 4  ;;  %s7329_s25 = smov [#allocation17]   ;;  %s170_s24 = int_to_ptr.hbm [resolvable:$true] %s169_s24 }
  0x1e   :  { %s145_s28 = sshll.u32 %s7329_s25, 4  ;;  %s7330_s8 = smov [#allocation20]   ;;  %s146_s28 = int_to_ptr.vmem [resolvable:$true] %s145_s28 }
  0x1f   :  { %148 = dma.hbm_to_vmem [thread:$0]  %s144_s18, 64, %s146_s28, [#allocation18]  }
  0x20   :  { %s171_s26 = sshll.u32 %s7330_s8, 4  ;;  %s7939_s27 = sld [smem:[#allocation35_spill]]  ;;  %s172_s26 = int_to_ptr.vmem [resolvable:$true] %s171_s26 }
  0x21   :  { %174 = dma.hbm_to_vmem [thread:$0]  %s170_s24, 128, %s172_s26, [#allocation21]  }
  0x22   :  { %s60_s19 = sshll.u32 %s7920_s2, 4  ;;  %s7331_s1 = smov [#allocation2]   ;;  %s61_s19 = int_to_ptr.hbm [resolvable:$true] %s60_s19 }
  0x23   :  { %s38_s13 = sshll.u32 %s7331_s1, 4  ;;  %s7332_s20 = smov [#allocation7]   ;;  %s39_s13 = int_to_ptr.vmem [resolvable:$true] %s38_s13 }
  0x24   :  { %s62_s18 = sshll.u32 %s7332_s20, 4  ;;  %s86_s25 = sshll.u32 %s7923_s5, 4  ;;  %s63_s18 = int_to_ptr.vmem [resolvable:$true] %s62_s18  ;;  %s87_s25 = int_to_ptr.hbm [resolvable:$true] %s86_s25 }
  0x25   :  { %65 = dma.hbm_to_vmem [thread:$0]  %s61_s19, 16, %s63_s18, [#allocation6]  }
  0x26   :  { %s36_s30 = sshll.u32 %s7939_s27, 4  ;;  %s107_s8 = sshll.u32 %s7925_s7, 4  ;;  %s37_s30 = int_to_ptr.hbm [resolvable:$true] %s36_s30  ;;  %s108_s8 = int_to_ptr.hbm [resolvable:$true] %s107_s8 }
  0x27   :  { %41 = dma.hbm_to_vmem [thread:$0]  %s37_s30, 128, %s39_s13, [#allocation3]  }
  0x28   :  { %s7333_s26 = smov [#allocation10]   ;;  %s7334_s3 = smov [#allocation13]  }
  0x29   :  { %s88_s2 = sshll.u32 %s7333_s26, 4  ;;  %s109_s0 = sshll.u32 %s7334_s3, 4  ;;  %s89_s2 = int_to_ptr.vmem [resolvable:$true] %s88_s2  ;;  %s110_s0 = int_to_ptr.vmem [resolvable:$true] %s109_s0 }
  0x2a   :  { %91 = dma.hbm_to_vmem [thread:$0]  %s87_s25, 32, %s89_s2, [#allocation9]  }
  0x2b   :  { %s7335_s27 = smov 256   ;;  %s7336_s30 = smov 16  }
  0x2c   :  { %115 = dma.hbm_to_vmem [thread:$0]  %s108_s8, 8192, %s110_s0, [#allocation12], %s7335_s27, %s7335_s27, %s7336_s30  }
  0x2d   :  { %s132_s29 = sshll.u32 %s7927_s9, 4  ;;  %s7337_s19 = smov [#allocation16]   ;;  %s133_s29 = int_to_ptr.hbm [resolvable:$true] %s132_s29 }
  0x2e   :  { %s134_s1 = sshll.u32 %s7337_s19, 4  ;;  %s153_s20 = sshll.u32 %s7929_s11, 4  ;;  %s135_s1 = int_to_ptr.vmem [resolvable:$true] %s134_s1  ;;  %s154_s20 = int_to_ptr.hbm [resolvable:$true] %s153_s20 }
  0x2f   :  { %137 = dma.hbm_to_vmem [thread:$0]  %s133_s29, 64, %s135_s1, [#allocation15]  }
  0x30   :  { %s7338_s18 = smov [#allocation19]   ;;  %s7339_s21 = smov 512  }
  0x31   :  { %s155_s6 = sshll.u32 %s7338_s18, 4  ;;  %s7340_s25 = smov 32   ;;  %s156_s6 = int_to_ptr.vmem [resolvable:$true] %s155_s6 }
  0x32   :  { %161 = dma.hbm_to_vmem [thread:$0]  %s154_s20, 32768, %s156_s6, [#allocation18], %s7339_s21, %s7339_s21, %s7340_s25  }
  0x33   :  { %s180_s9 = sshll.u32 %s7932_s14, 4  ;;  %s7341_s8 = smov [#allocation22]   ;;  %s181_s9 = int_to_ptr.hbm [resolvable:$true] %s180_s9 }
  0x34   :  { %s182_s26 = sshll.u32 %s7341_s8, 4  ;;  %s190_s11 = sshll.u32 %s7933_s15, 4  ;;  %s183_s26 = int_to_ptr.vmem [resolvable:$true] %s182_s26  ;;  %s191_s11 = int_to_ptr.hbm [resolvable:$true] %s190_s11 }
  0x35   :  { %185 = dma.hbm_to_vmem [thread:$0]  %s181_s9, 128, %s183_s26, [#allocation21]  }
  0x36   :  { %s7342_s0 = smov [#allocation23]  }
  0x37   :  { %s192_s27 = sshll.u32 %s7342_s0, 4  ;;  %s193_s27 = int_to_ptr.vmem [resolvable:$true] %s192_s27 }
  0x38   :  { %198 = dma.hbm_to_vmem [thread:$0]  %s191_s11, 16384, %s193_s27, [#allocation24], %s7325_s22, %s7325_s22, %s7326_s23  }
  0x39   :  { %7303 = dma.done.wait [#allocation3], 128  }
  0x3a   :  { %7304 = vsyncadd [#allocation3], 4294967168 }
  0x3b   :  { %7305 = dma.done.wait [#allocation6], 1040  }
  0x3c   :  { %7306 = vsyncadd [#allocation6], 4294966256 }
  0x3d   :  { %7307 = dma.done.wait [#allocation9], 2080  }
  0x3e   :  { %7308 = vsyncadd [#allocation9], 4294965216 }
  0x3f   :  { %7309 = dma.done.wait [#allocation12], 8224  }
  0x40   :  { %7310 = vsyncadd [#allocation12], 4294959072 }
  0x41   :  { %7311 = dma.done.wait [#allocation15], 128  }
  0x42   :  { %7312 = vsyncadd [#allocation15], 4294967168 }
  0x43   :  { %7313 = dma.done.wait [#allocation18], 32832  }
  0x44   :  { %7314 = vsyncadd [#allocation18], 4294934464 }
  0x45   :  { %7315 = dma.done.wait [#allocation21], 256  }
  0x46   :  { %7316 = vsyncadd [#allocation21], 4294967040 }
  0x47   :  { %7317 = dma.done.wait [#allocation24], 16384  }
  0x48   :  { %7318 = vsyncadd [#allocation24], 4294950912  ;;  %v6416_v0 = vld [vmem:[#allocation5 + $0x38] sm:$0xff]  ;;  %v6415_v1 = vld [vmem:[#allocation5 + $0x30] sm:$0xff]  ;;  %s4504_s1 = sshll.u32 %s7935_s17, 4  ;;  %s4505_s1 = int_to_ptr.hbm [resolvable:$true] %s4504_s1 }
  0x49   :  { %327 = vmatpush.bf16.msra.mxu0 %v6416_v0  ;;  %v4611_v2 = vld [vmem:[#allocation8 + $0x70] sm:$0xf]  ;;  %v6432_v3 = vld [vmem:[#allocation8 + $0x74] sm:$0xf0]  ;;  %v6431_v4 = vld [vmem:[#allocation8 + $0x74] sm:$0xf] }
  0x4a   :  { %v4612_v5 = vor.u32 %v6432_v3, %v4611_v2  ;;  %v4613_v6 = vld [vmem:[#allocation8 + $0x78] sm:$0xf0]  ;;  %v4603_v7 = vld [vmem:[#allocation8 + $0x60] sm:$0xf]  ;;  %v6430_v8 = vld [vmem:[#allocation8 + $0x64] sm:$0xf0] }
  0x4b   :  { %v4616_v9 = vor.u32 %v6431_v4, %v4613_v6  ;;  %v6429_v10 = vld [vmem:[#allocation8 + $0x64] sm:$0xf]  ;;  %v4605_v11 = vld [vmem:[#allocation8 + $0x68] sm:$0xf0]  ;;  %v4604_v13 = vor.u32 %v6430_v8, %v4603_v7  ;;  %v4595_v15 = vld [vmem:[#allocation8 + $0x50] sm:$0xf] }
  0x4c   :  { %v6414_v12 = vld [vmem:[#allocation5 + $0x28] sm:$0xff]  ;;  %446 = vmatpush.bf16.msra.mxu1 %v4612_v5  ;;  %v4608_v14 = vor.u32 %v6429_v10, %v4605_v11  ;;  %v6428_v16 = vld [vmem:[#allocation8 + $0x54] sm:$0xf0]  ;;  %v6427_v17 = vld [vmem:[#allocation8 + $0x54] sm:$0xf] }
  0x4d   :  { %328 = vmatpush.bf16.msra.mxu0 %v6415_v1  ;;  %459 = vmatpush.bf16.msra.mxu2 %v4616_v9  ;;  %v4597_v18 = vld [vmem:[#allocation8 + $0x58] sm:$0xf0]  ;;  %v4596_v20 = vor.u32 %v6428_v16, %v4595_v15  ;;  %v4587_v22 = vld [vmem:[#allocation8 + $0x40] sm:$0xf]  ;;  %v6426_v23 = vld [vmem:[#allocation8 + $0x44] sm:$0xf0] }
  0x4e   :  { %v6413_v19 = vld [vmem:[#allocation5 + $0x20] sm:$0xff]  ;;  %v4600_v21 = vor.u32 %v6427_v17, %v4597_v18  ;;  %v4589_v25 = vld [vmem:[#allocation8 + $0x48] sm:$0xf0]  ;;  %v6412_v26 = vld [vmem:[#allocation5 + $0x18] sm:$0xff]  ;;  %v4588_v27 = vor.u32 %v6426_v23, %v4587_v22  ;;  %v7343_v1 = vmov 8.0  }
  0x4f   :  { %v6425_v24 = vld [vmem:[#allocation8 + $0x44] sm:$0xf]  ;;  %v4579_v29 = vld [vmem:[#allocation8 + $0x30] sm:$0xf]  ;;  %v6424_v30 = vld [vmem:[#allocation8 + $0x34] sm:$0xf0]  ;;  %6906 = vrcp.f32 %v7343_v1 }
  0x50   :  { %447 = vmatpush.bf16.msra.mxu1 %v4604_v13  ;;  %v4592_v28 = vor.u32 %v6425_v24, %v4589_v25  ;;  %v6423_v31 = vld [vmem:[#allocation8 + $0x34] sm:$0xf]  ;;  %v4581_v32 = vld [vmem:[#allocation8 + $0x38] sm:$0xf0]  ;;  %v4580_v34 = vor.u32 %v6424_v30, %v4579_v29  ;;  %v4571_v36 = vld [vmem:[#allocation8 + $0x20] sm:$0xf] }
  0x51   :  { %329 = vmatpush.bf16.msra.mxu0 %v6414_v12  ;;  %460 = vmatpush.bf16.msra.mxu2 %v4608_v14  ;;  %v6411_v33 = vld [vmem:[#allocation5 + $0x10] sm:$0xff]  ;;  %v4584_v35 = vor.u32 %v6423_v31, %v4581_v32  ;;  %v6422_v37 = vld [vmem:[#allocation8 + $0x24] sm:$0xf0]  ;;  %v6421_v38 = vld [vmem:[#allocation8 + $0x24] sm:$0xf] }
  0x52   :  { %v4573_v39 = vld [vmem:[#allocation8 + $0x28] sm:$0xf0]  ;;  %v4572_v41 = vor.u32 %v6422_v37, %v4571_v36  ;;  %v6409_v43 = vld [vmem:[#allocation5] sm:$0xff]  ;;  %v257_v44 = vld [vmem:[#allocation2] sm:$0xff] }
  0x53   :  { %v6410_v40 = vld [vmem:[#allocation5 + $0x8] sm:$0xff]  ;;  %v4576_v42 = vor.u32 %v6421_v38, %v4573_v39  ;;  %v258_v45 = vpack.c.bf16 %v257_v44, %v257_v44  ;;  %v4563_v46 = vld [vmem:[#allocation8 + $0x10] sm:$0xf]  ;;  %v6420_v47 = vld [vmem:[#allocation8 + $0x14] sm:$0xf0] }
  0x54   :  { %448 = vmatpush.bf16.msra.mxu1 %v4596_v20  ;;  %v6419_v48 = vld [vmem:[#allocation8 + $0x14] sm:$0xf]  ;;  %v4564_v49 = vor.u32 %v6420_v47, %v4563_v46  ;;  %v4565_v50 = vld [vmem:[#allocation8 + $0x18] sm:$0xf0]  ;;  %v4555_v52 = vld [vmem:[#allocation8] sm:$0xf] }
  0x55   :  { %330 = vmatpush.bf16.msra.mxu0 %v6413_v19  ;;  %461 = vmatpush.bf16.msra.mxu2 %v4600_v21  ;;  %v4568_v51 = vor.u32 %v6419_v48, %v4565_v50  ;;  %v6418_v53 = vld [vmem:[#allocation8 + $0x4] sm:$0xf0]  ;;  %v6417_v54 = vld [vmem:[#allocation8 + $0x4] sm:$0xf]  ;;  %v4557_v56 = vld [vmem:[#allocation8 + $0x8] sm:$0xf0]  ;;  %v7488_v14 = vpop.eup %6906 }
  0x56   :  { %v4556_v55 = vor.u32 %v6418_v53, %v4555_v52  ;;  %v4560_v57 = vor.u32 %v6417_v54, %v4557_v56  ;;  %v6905_v58 = vld [vmem:[#allocation7] ss:$0 sm:$0xff]  ;;  %v4731_v2 = vld [vmem:[#allocation13 + $0xe0] sm:$0xf]  ;;  %v6463_v3 = vld [vmem:[#allocation13 + $0xec] sm:$0xf0]  ;;  %vm497_vm3 = vweird.f32 %v7488_v14 }
  0x57   :  { %v6461_v4 = vld [vmem:[#allocation13 + $0xe4] sm:$0xf]  ;;  %v4732_v5 = vor.u32 %v6463_v3, %v4731_v2  ;;  %v4733_v6 = vld [vmem:[#allocation13 + $0xf0] sm:$0xf0]  ;;  %v7486_v8 = vld [vmem:[%s7922_s4] sm:$0x3] }
  0x58   :  { %449 = vmatpush.bf16.msra.mxu1 %v4588_v27  ;;  %v4736_v7 = vor.u32 %v6461_v4, %v4733_v6  ;;  %v4715_v9 = vld [vmem:[#allocation13 + $0xc0] sm:$0xf]  ;;  %v6459_v10 = vld [vmem:[#allocation13 + $0xcc] sm:$0xf0]  ;;  %v6457_v11 = vld [vmem:[#allocation13 + $0xc4] sm:$0xf] }
  0x59   :  { %331 = vmatpush.bf16.msra.mxu0 %v6412_v26  ;;  %462 = vmatpush.bf16.msra.mxu2 %v4592_v28  ;;  %v4716_v12 = vor.u32 %v6459_v10, %v4715_v9  ;;  %v4717_v13 = vld [vmem:[#allocation13 + $0xd0] sm:$0xf0]  ;;  %v4859_v16 = vld [vmem:[#allocation13 + $0x1e0] sm:$0xf]  ;;  %v6495_v17 = vld [vmem:[#allocation13 + $0x1ec] sm:$0xf0] }
  0x5a   :  { %955 = vmatpush.bf16.msra.mxu3 %v4732_v5  ;;  %v4720_v15 = vor.u32 %v6457_v11, %v4717_v13  ;;  %v6493_v18 = vld [vmem:[#allocation13 + $0x1e4] sm:$0xf]  ;;  %v362_v19 = vperm.slane %v7486_v8, 0  ;;  %v4860_v20 = vor.u32 %v6495_v17, %v4859_v16  ;;  %v4861_v21 = vld [vmem:[#allocation13 + $0x1f0] sm:$0xf0]  ;;  %v493_v26 = vmul.f32 8.0, %v7488_v14 }
  0x5b   :  { %v4864_v22 = vor.u32 %v6493_v18, %v4861_v21  ;;  %v4699_v23 = vld [vmem:[#allocation13 + $0xa0] sm:$0xf]  ;;  %v6455_v24 = vld [vmem:[#allocation13 + $0xac] sm:$0xf0]  ;;  %v6453_v25 = vld [vmem:[#allocation13 + $0xa4] sm:$0xf] }
  0x5c   :  { %450 = vmatpush.bf16.msra.mxu1 %v4580_v34  ;;  %v4700_v27 = vor.u32 %v6455_v24, %v4699_v23  ;;  %v4701_v28 = vld [vmem:[#allocation13 + $0xb0] sm:$0xf0]  ;;  %v4843_v30 = vld [vmem:[#allocation13 + $0x1c0] sm:$0xf]  ;;  %v6491_v31 = vld [vmem:[#allocation13 + $0x1cc] sm:$0xf0] }
  0x5d   :  { %332 = vmatpush.bf16.msra.mxu0 %v6411_v33  ;;  %463 = vmatpush.bf16.msra.mxu2 %v4584_v35  ;;  %v4704_v29 = vor.u32 %v6453_v25, %v4701_v28  ;;  %v6489_v32 = vld [vmem:[#allocation13 + $0x1c4] sm:$0xf]  ;;  %v4844_v34 = vor.u32 %v6491_v31, %v4843_v30  ;;  %v4845_v35 = vld [vmem:[#allocation13 + $0x1d0] sm:$0xf0]  ;;  %v4683_v38 = vld [vmem:[#allocation13 + $0x80] sm:$0xf] }
  0x5e   :  { %956 = vmatpush.bf16.msra.mxu3 %v4716_v12  ;;  %v4848_v37 = vor.u32 %v6489_v32, %v4845_v35  ;;  %v6451_v39 = vld [vmem:[#allocation13 + $0x8c] sm:$0xf0]  ;;  %v4827_v47 = vld [vmem:[#allocation13 + $0x1a0] sm:$0xf]  ;;  %v4829_v50 = vld [vmem:[#allocation13 + $0x1b0] sm:$0xf0] }
  0x5f   :  { %v6487_v48 = vld [vmem:[#allocation13 + $0x1ac] sm:$0xf0]  ;;  %v4667_v54 = vld [vmem:[#allocation13 + $0x60] sm:$0xf]  ;;  %v6445_v56 = vld [vmem:[#allocation13 + $0x64] sm:$0xf] }
  0x60   :  { %451 = vmatpush.bf16.msra.mxu1 %v4572_v41  ;;  %v363_v41 = vperm.slane %v7486_v8, 1  ;;  %v4828_v52 = vor.u32 %v6487_v48, %v4827_v47  ;;  %v6483_v1 = vld [vmem:[#allocation13 + $0x18c] sm:$0xf0]  ;;  %v6481_v2 = vld [vmem:[#allocation13 + $0x184] sm:$0xf] }
  0x61   :  { %333 = vmatpush.bf16.msra.mxu0 %v6410_v40  ;;  %464 = vmatpush.bf16.msra.mxu2 %v4576_v42  ;;  %v6449_v40 = vld [vmem:[#allocation13 + $0x84] sm:$0xf]  ;;  %v4684_v42 = vor.u32 %v6451_v39, %v4683_v38  ;;  %v4813_v6 = vld [vmem:[#allocation13 + $0x190] sm:$0xf0]  ;;  %v4651_v9 = vld [vmem:[#allocation13 + $0x40] sm:$0xf] }
  0x62   :  { %957 = vmatpush.bf16.msra.mxu3 %v4700_v27  ;;  %v4816_v8 = vor.u32 %v6481_v2, %v4813_v6  ;;  %v6443_v11 = vld [vmem:[#allocation13 + $0x4c] sm:$0xf0]  ;;  %v6441_v12 = vld [vmem:[#allocation13 + $0x44] sm:$0xf]  ;;  %v4653_v17 = vld [vmem:[#allocation13 + $0x50] sm:$0xf0] }
  0x63   :  { %v4652_v16 = vor.u32 %v6443_v11, %v4651_v9  ;;  %v4795_v18 = vld [vmem:[#allocation13 + $0x160] sm:$0xf]  ;;  %v6477_v24 = vld [vmem:[#allocation13 + $0x164] sm:$0xf]  ;;  %v4797_v25 = vld [vmem:[#allocation13 + $0x170] sm:$0xf0] }
  0x64   :  { %452 = vmatpush.bf16.msra.mxu1 %v4564_v49  ;;  %v6485_v49 = vld [vmem:[#allocation13 + $0x1a4] sm:$0xf]  ;;  %v4635_v27 = vld [vmem:[#allocation13 + $0x20] sm:$0xf]  ;;  %v6439_v28 = vld [vmem:[#allocation13 + $0x2c] sm:$0xf0] }
  0x65   :  { %334 = vmatpush.bf16.msra.mxu0 %v6409_v43  ;;  %465 = vmatpush.bf16.msra.mxu2 %v4568_v51  ;;  %v4685_v43 = vld [vmem:[#allocation13 + $0x90] sm:$0xf0]  ;;  %v4832_v53 = vor.u32 %v6485_v49, %v4829_v50  ;;  %v6475_v38 = vld [vmem:[#allocation13 + $0x14c] sm:$0xf0]  ;;  %v6473_v39 = vld [vmem:[#allocation13 + $0x144] sm:$0xf] }
  0x66   :  { %v4688_v46 = vor.u32 %v6449_v40, %v4685_v43  ;;  %958 = vmatpush.bf16.msra.mxu3 %v4684_v42  ;;  %v4781_v43 = vld [vmem:[#allocation13 + $0x150] sm:$0xf0]  ;;  %v6433_v47 = vld [vmem:[#allocation13 + $0x4] sm:$0xf]  ;;  %v6460_v6 = vld [vmem:[#allocation13 + $0xd4] sm:$0xf0] }
  0x67   :  { %v4621_v50 = vld [vmem:[#allocation13 + $0x10] sm:$0xf0]  ;;  %v4747_v9 = vld [vmem:[#allocation13 + $0x100] sm:$0xf] }
  0x68   :  { %335 = vmatmul.bf16.vlgmr.msra.gmra.mxu0 %v258_v45  ;;  %453 = vmatpush.bf16.msra.mxu1 %v4556_v55  ;;  %v494_v45 = vsub.f32 1.0, %v493_v26  ;;  %v6447_v55 = vld [vmem:[#allocation13 + $0x6c] sm:$0xf0]  ;;  %v4800_v26 = vor.u32 %v6477_v24, %v4797_v25 }
  0x69   :  { %466 = vmatpush.bf16.msra.mxu2 %v4560_v57  ;;  %968 = vmatpush.bf16.msrb.mxu0 %v4860_v20 }
  0x6c   :  { %981 = vmatpush.bf16.msrb.mxu1 %v4736_v7 }
  0x6d   :  { %994 = vmatpush.bf16.msrb.mxu2 %v4864_v22  ;;  %969 = vmatpush.bf16.msrb.mxu0 %v4844_v34  ;;  %v4656_v22 = vor.u32 %v6441_v12, %v4653_v17  ;;  %v4637_v34 = vld [vmem:[#allocation13 + $0x30] sm:$0xf0] }
  0x6e   :  { %v4749_v17 = vld [vmem:[#allocation13 + $0x110] sm:$0xf0] }
  0x70   :  { %982 = vmatpush.bf16.msrb.mxu1 %v4720_v15 }
  0x71   :  { %995 = vmatpush.bf16.msrb.mxu2 %v4848_v37  ;;  %970 = vmatpush.bf16.msrb.mxu0 %v4828_v52  ;;  %v4779_v37 = vld [vmem:[#allocation13 + $0x140] sm:$0xf]  ;;  %v4739_v52 = vld [vmem:[#allocation13 + $0xe8] sm:$0xf] }
  0x72   :  { %v4780_v42 = vor.u32 %v6475_v38, %v4779_v37  ;;  %v6492_v37 = vld [vmem:[#allocation13 + $0x1d4] sm:$0xf0] }
  0x74   :  { %983 = vmatpush.bf16.msrb.mxu1 %v4704_v29  ;;  %v6437_v29 = vld [vmem:[#allocation13 + $0x24] sm:$0xf] }
  0x75   :  { %996 = vmatpush.bf16.msrb.mxu2 %v4832_v53  ;;  %v6464_v53 = vld [vmem:[#allocation13 + $0xf4] sm:$0xf0] }
  0x78   :  { %984 = vmatpush.bf16.msrb.mxu1 %v4688_v46  ;;  %v6435_v46 = vld [vmem:[#allocation13 + $0xc] sm:$0xf0] }
  0x79   :  { %997 = vmatpush.bf16.msrb.mxu2 %v4816_v8  ;;  %v4725_v8 = vld [vmem:[#allocation13 + $0xd8] sm:$0xf0] }
  0x7d   :  { %998 = vmatpush.bf16.msrb.mxu2 %v4800_v26  ;;  %v4869_v26 = vld [vmem:[#allocation13 + $0x1f8] sm:$0xf0] }
  0xe5   :  { %v336_v59 = vpop.f32.mrf.mxu0 }
  0xe6   :  { %v337_v60 = vadd.f32 %v6905_v58, %v336_v59  ;;  %v4668_v59 = vor.u32 %v6447_v55, %v4667_v54  ;;  %v4624_v54 = vor.u32 %v6433_v47, %v4621_v50  ;;  %v4740_v55 = vor.u32 %v6464_v53, %v4739_v52  ;;  %v6450_v47 = vld [vmem:[#allocation13 + $0x8c] sm:$0xf]  ;;  %v4835_v52 = vld [vmem:[#allocation13 + $0x1a8] sm:$0xf]  ;;  %v6488_v53 = vld [vmem:[#allocation13 + $0x1b4] sm:$0xf0] }
  0xe8   :  { %v341_v61 = vmul.f32 0.2, %v337_v60  ;;  %vm340_vm0 = vcmp.ge.f32.partialorder %v337_v60, 0.0  ;;  %959 = vmatpush.bf16.msra.mxu3 %v4668_v59 }
  0xea   :  { %v342_v62 = vsel %vm340_vm0, %v337_v60, %v341_v61  ;;  %v4669_v60 = vld [vmem:[#allocation13 + $0x70] sm:$0xf0]  ;;  %v495_v61 = vmul.f32 %v7488_v14, %v494_v45  ;;  %v4619_v45 = vld [vmem:[#allocation13] sm:$0xf] }
  0xeb   :  { %v343_v63 = vpack.c.bf16 %v342_v62, %v342_v62 }
  0xec   :  { %v496_v13 = vadd.f32 %v7488_v14, %v495_v61  ;;  %960 = vmatpush.bf16.msra.mxu3 %v4652_v16  ;;  %v6465_v16 = vld [vmem:[#allocation13 + $0x104] sm:$0xf] }
  0xed   :  { %v338_v0 = vpop.f32.mrf.mxu0  ;;  %454 = vmatmul.bf16.vlgmr.msra.gmra.mxu1 %v343_v63  ;;  %467 = vmatmul.bf16.vlgmr.msra.gmra.mxu2 %v343_v63  ;;  %v4672_v63 = vor.u32 %v6445_v56, %v4669_v60  ;;  %v6462_v56 = vld [vmem:[#allocation13 + $0xec] sm:$0xf] }
  0xee   :  { %v4811_v0 = vld [vmem:[#allocation13 + $0x180] sm:$0xf]  ;;  %v7507_v35 = vsel %vm497_vm3, %v7488_v14, %v496_v13  ;;  %v4620_v14 = vor.u32 %v6435_v46, %v4619_v45  ;;  %v6452_v45 = vld [vmem:[#allocation13 + $0x94] sm:$0xf0] }
  0xef   :  { %v4812_v5 = vor.u32 %v6483_v1, %v4811_v0  ;;  %985 = vmatpush.bf16.msrb.mxu1 %v4672_v63  ;;  %v6469_v63 = vld [vmem:[#allocation13 + $0x124] sm:$0xf]  ;;  %v4765_v1 = vld [vmem:[#allocation13 + $0x130] sm:$0xf0] }
  0xf1   :  { %971 = vmatpush.bf16.msrb.mxu0 %v4812_v5  ;;  %v4723_v5 = vld [vmem:[#allocation13 + $0xc8] sm:$0xf] }
  0xf3   :  { %986 = vmatpush.bf16.msrb.mxu1 %v4656_v22  ;;  %v6494_v22 = vld [vmem:[#allocation13 + $0x1ec] sm:$0xf] }
 0x16a   :  { %v455_v33 = vpop.f32.mrf.mxu1 }
 0x16b   :  { %v456_v36 = vadd.f32 %v455_v33, %v362_v19  ;;  %v6479_v19 = vld [vmem:[#allocation13 + $0x16c] sm:$0xf0]  ;;  %v4636_v33 = vor.u32 %v6439_v28, %v4635_v27  ;;  %v4707_v27 = vld [vmem:[#allocation13 + $0xa8] sm:$0xf]  ;;  %v6456_v28 = vld [vmem:[#allocation13 + $0xb4] sm:$0xf0] }
 0x16c   :  { %v4796_v23 = vor.u32 %v6479_v19, %v4795_v18  ;;  %v4752_v19 = vor.u32 %v6465_v16, %v4749_v17  ;;  %v6442_v17 = vld [vmem:[#allocation13 + $0x4c] sm:$0xf] }
 0x16d   :  { %vm472_vm1 = vcmp.ge.f32.partialorder %v456_v36, 0.0  ;;  %v474_v44 = vmul.f32 0.2, %v456_v36  ;;  %961 = vmatpush.bf16.msra.mxu3 %v4636_v33 }
 0x16e   :  { %972 = vmatpush.bf16.msrb.mxu0 %v4796_v23 }
 0x16f   :  { %v7493_v51 = vsel %vm472_vm1, %v456_v36, %v474_v44  ;;  %v4640_v36 = vor.u32 %v6437_v29, %v4637_v34  ;;  %v4784_v44 = vor.u32 %v6473_v39, %v4781_v43  ;;  %v4872_v29 = vor.u32 %v6494_v22, %v4869_v26  ;;  %v6490_v39 = vld [vmem:[#allocation13 + $0x1cc] sm:$0xf]  ;;  %v6480_v22 = vld [vmem:[#allocation13 + $0x174] sm:$0xf0]  ;;  %v4805_v26 = vld [vmem:[#allocation13 + $0x178] sm:$0xf0] }
 0x170   :  { %v480_v57 = vrot.slane %v7493_v51, 4  ;;  %v468_v58 = vpop.f32.mrf.mxu2 }
 0x171   :  { %v469_v62 = vadd.f32 %v468_v58, %v363_v41  ;;  %987 = vmatpush.bf16.msrb.mxu1 %v4640_v36  ;;  %999 = vmatpush.bf16.msrb.mxu2 %v4784_v44  ;;  %v4763_v58 = vld [vmem:[#allocation13 + $0x120] sm:$0xf]  ;;  %v4691_v44 = vld [vmem:[#allocation13 + $0x88] sm:$0xf] }
 0x172   :  { %v481_v3 = vadd.f32 %v480_v57, %v7493_v51  ;;  %v457_v4 = vpop.f32.mrf.mxu1  ;;  %973 = vmatpush.bf16.msrb.mxu0 %v4780_v42  ;;  %v4741_v57 = vld [vmem:[#allocation13 + $0xf8] sm:$0xf0]  ;;  %962 = vmatpush.bf16.msra.mxu3 %v4620_v14  ;;  %v4692_v46 = vor.u32 %v6452_v45, %v4691_v44  ;;  %v6434_v44 = vld [vmem:[#allocation13 + $0xc] sm:$0xf] }
 0x173   :  { %vm473_vm2 = vcmp.ge.f32.partialorder %v469_v62, 0.0  ;;  %v475_v7 = vmul.f32 0.2, %v469_v62  ;;  %v4744_v61 = vor.u32 %v6462_v56, %v4741_v57  ;;  %v4768_v4 = vor.u32 %v6469_v63, %v4765_v1  ;;  %v4837_v56 = vld [vmem:[#allocation13 + $0x1b8] sm:$0xf0] }
 0x174   :  { %v482_v10 = vrot.slane %v481_v3, 2  ;;  %v4677_v1 = vld [vmem:[#allocation13 + $0x78] sm:$0xf0] }
 0x175   :  { %v7500_v15 = vsel %vm473_vm2, %v469_v62, %v475_v7  ;;  %v6471_v62 = vld [vmem:[#allocation13 + $0x12c] sm:$0xf0]  ;;  %988 = vmatpush.bf16.msrb.mxu1 %v4624_v54  ;;  %v6458_v7 = vld [vmem:[#allocation13 + $0xcc] sm:$0xf]  ;;  %1000 = vmatpush.bf16.msrb.mxu2 %v4768_v4  ;;  %v4836_v54 = vor.u32 %v6488_v53, %v4835_v52  ;;  %v4773_v53 = vld [vmem:[#allocation13 + $0x138] sm:$0xf0] }
 0x176   :  { %v483_v20 = vadd.f32 %v482_v10, %v481_v3  ;;  %v486_v21 = vrot.slane %v7500_v15, 4  ;;  %v4764_v0 = vor.u32 %v6471_v62, %v4763_v58  ;;  %1007 = vmatpush.bf16.msrb.mxu3 %v4740_v55  ;;  %v6467_v10 = vld [vmem:[#allocation13 + $0x10c] sm:$0xf0]  ;;  %v4728_v13 = vor.u32 %v6458_v7, %v4725_v8  ;;  %v6486_v55 = vld [vmem:[#allocation13 + $0x1ac] sm:$0xf] }
 0x177   :  { %v4748_v18 = vor.u32 %v6467_v10, %v4747_v9  ;;  %v6448_v62 = vld [vmem:[#allocation13 + $0x74] sm:$0xf0]  ;;  %v6482_v7 = vld [vmem:[#allocation13 + $0x18c] sm:$0xf]  ;;  %v4821_v8 = vld [vmem:[#allocation13 + $0x198] sm:$0xf0] }
 0x178   :  { %v484_v30 = vrot.slane %v483_v20, 1  ;;  %v487_v31 = vadd.f32 %v486_v21, %v7500_v15  ;;  %v470_v32 = vpop.f32.mrf.mxu2  ;;  %974 = vmatpush.bf16.msrb.mxu0 %v4764_v0  ;;  %v6496_v21 = vld [vmem:[#allocation13 + $0x1f4] sm:$0xf0]  ;;  %v6446_v0 = vld [vmem:[#allocation13 + $0x6c] sm:$0xf] }
 0x179   :  { %1033 = vmatpush.bf16.msra.mxu1 %v4744_v61  ;;  %v4709_v32 = vld [vmem:[#allocation13 + $0xb8] sm:$0xf0]  ;;  %1001 = vmatpush.bf16.msrb.mxu2 %v4752_v19  ;;  %v4675_v61 = vld [vmem:[#allocation13 + $0x68] sm:$0xf]  ;;  %v4680_v4 = vor.u32 %v6446_v0, %v4677_v1  ;;  %v6444_v10 = vld [vmem:[#allocation13 + $0x54] sm:$0xf0] }
 0x17a   :  { %v485_v40 = vadd.f32 %v484_v30, %v483_v20  ;;  %v488_v41 = vrot.slane %v487_v31, 2  ;;  %v4867_v20 = vld [vmem:[#allocation13 + $0x1e8] sm:$0xf]  ;;  %v4708_v30 = vor.u32 %v6456_v28, %v4707_v27  ;;  %v4676_v63 = vor.u32 %v6448_v62, %v4675_v61  ;;  %v6470_v52 = vld [vmem:[#allocation13 + $0x12c] sm:$0xf] }
 0x17b   :  { %v4868_v25 = vor.u32 %v6496_v21, %v4867_v20  ;;  %v4659_v9 = vld [vmem:[#allocation13 + $0x48] sm:$0xf]  ;;  %v6468_v62 = vld [vmem:[#allocation13 + $0x114] sm:$0xf0] }
 0x17c   :  { %v499_v48 = vmul.f32 %v7507_v35, %v485_v40  ;;  %v489_v49 = vadd.f32 %v488_v41, %v487_v31  ;;  %975 = vmatpush.bf16.msrb.mxu0 %v4748_v18  ;;  %v6454_v31 = vld [vmem:[#allocation13 + $0xac] sm:$0xf]  ;;  %v4853_v40 = vld [vmem:[#allocation13 + $0x1d8] sm:$0xf0]  ;;  %v4660_v16 = vor.u32 %v6444_v10, %v4659_v9  ;;  %v4803_v21 = vld [vmem:[#allocation13 + $0x168] sm:$0xf] }
 0x17d   :  { %1034 = vmatpush.bf16.msra.mxu1 %v4728_v13  ;;  %v4712_v36 = vor.u32 %v6454_v31, %v4709_v32  ;;  %1046 = vmatpush.bf16.msra.mxu2 %v4872_v29  ;;  %v4856_v43 = vor.u32 %v6490_v39, %v4853_v40  ;;  %v4824_v13 = vor.u32 %v6482_v7, %v4821_v8  ;;  %v4661_v18 = vld [vmem:[#allocation13 + $0x58] sm:$0xf0]  ;;  %v4643_v29 = vld [vmem:[#allocation13 + $0x28] sm:$0xf]  ;;  %v6438_v31 = vld [vmem:[#allocation13 + $0x2c] sm:$0xf] }
 0x17e   :  { %v7511_v59 = vsub.f32 %v7493_v51, %v499_v48  ;;  %v490_v60 = vrot.slane %v489_v49, 1  ;;  %v4724_v51 = vor.u32 %v6460_v6, %v4723_v5  ;;  %v4693_v48 = vld [vmem:[#allocation13 + $0x98] sm:$0xf0]  ;;  %v4819_v5 = vld [vmem:[#allocation13 + $0x188] sm:$0xf]  ;;  %v4664_v20 = vor.u32 %v6442_v17, %v4661_v18 }
 0x17f   :  { %v4696_v50 = vor.u32 %v6450_v47, %v4693_v48  ;;  %v6484_v6 = vld [vmem:[#allocation13 + $0x194] sm:$0xf0]  ;;  %v6474_v39 = vld [vmem:[#allocation13 + $0x14c] sm:$0xf]  ;;  %v4789_v40 = vld [vmem:[#allocation13 + $0x158] sm:$0xf0] }
 0x180   :  { %v503_v2 = vmul.f32 %v7511_v59, %v7511_v59  ;;  %v491_v3 = vadd.f32 %v490_v60, %v489_v49  ;;  %1008 = vmatpush.bf16.msrb.mxu3 %v4724_v51  ;;  %1020 = vmatpush.bf16.msra.mxu0 %v4868_v25  ;;  %v4840_v60 = vor.u32 %v6486_v55, %v4837_v56  ;;  %v4629_v47 = vld [vmem:[#allocation13 + $0x18] sm:$0xf0]  ;;  %v4771_v48 = vld [vmem:[#allocation13 + $0x128] sm:$0xf] }
 0x181   :  { %1035 = vmatpush.bf16.msra.mxu1 %v4712_v36  ;;  %1047 = vmatpush.bf16.msra.mxu2 %v4856_v43  ;;  %v4820_v51 = vor.u32 %v6484_v6, %v4819_v5  ;;  %v4804_v25 = vor.u32 %v6480_v22, %v4803_v21  ;;  %v6476_v36 = vld [vmem:[#allocation13 + $0x154] sm:$0xf0]  ;;  %v4776_v56 = vor.u32 %v6470_v52, %v4773_v53  ;;  %v4755_v61 = vld [vmem:[#allocation13 + $0x108] sm:$0xf]  ;;  %v479_v9 = vld [vmem:[#allocation11] sm:$0x3] }
 0x182   :  { %v505_v11 = vrot.slane %v503_v2, 4  ;;  %v500_v12 = vmul.f32 %v7507_v35, %v491_v3  ;;  %v6436_v43 = vld [vmem:[#allocation13 + $0x14] sm:$0xf0]  ;;  %v553_v17 = vperm.slane %v479_v9, 0  ;;  %v6597_v53 = vld [vmem:[#allocation19 + $0x31c] sm:$0xf0] }
 0x184   :  { %v506_v23 = vadd.f32 %v505_v11, %v503_v2  ;;  %v7517_v24 = vsub.f32 %v7500_v15, %v500_v12  ;;  %v4851_v15 = vld [vmem:[#allocation13 + $0x1c8] sm:$0xf]  ;;  %1009 = vmatpush.bf16.msrb.mxu3 %v4708_v30  ;;  %v6440_v30 = vld [vmem:[#allocation13 + $0x34] sm:$0xf0] }
 0x185   :  { %v4852_v38 = vor.u32 %v6492_v37, %v4851_v15  ;;  %1036 = vmatpush.bf16.msra.mxu1 %v4696_v50  ;;  %1048 = vmatpush.bf16.msra.mxu2 %v4840_v60  ;;  %v4644_v32 = vor.u32 %v6440_v30, %v4643_v29  ;;  %v4632_v50 = vor.u32 %v6434_v44, %v4629_v47  ;;  %v6557_v29 = vld [vmem:[#allocation19 + $0x1dc] sm:$0xf0] }
 0x186   :  { %v507_v33 = vrot.slane %v506_v23, 2  ;;  %v504_v34 = vmul.f32 %v7517_v24, %v7517_v24  ;;  %v5291_v44 = vld [vmem:[#allocation19 + $0x340] sm:$0xf] }
 0x187   :  { %1021 = vmatpush.bf16.msra.mxu0 %v4852_v38 }
 0x188   :  { %v508_v41 = vadd.f32 %v507_v33, %v506_v23  ;;  %v511_v42 = vrot.slane %v504_v34, 4  ;;  %1010 = vmatpush.bf16.msrb.mxu3 %v4692_v46  ;;  %v6478_v23 = vld [vmem:[#allocation13 + $0x16c] sm:$0xf]  ;;  %v4645_v33 = vld [vmem:[#allocation13 + $0x38] sm:$0xf0] }
 0x189   :  { %1037 = vmatpush.bf16.msra.mxu1 %v4680_v4  ;;  %1049 = vmatpush.bf16.msra.mxu2 %v4824_v13  ;;  %v4808_v28 = vor.u32 %v6478_v23, %v4805_v26  ;;  %v4648_v37 = vor.u32 %v6438_v31, %v4645_v33  ;;  %v5067_v31 = vld [vmem:[#allocation19 + $0x180] sm:$0xf] }
 0x18a   :  { %v509_v49 = vrot.slane %v508_v41, 1  ;;  %v512_v14 = vadd.f32 %v511_v42, %v504_v34  ;;  %v4787_v34 = vld [vmem:[#allocation13 + $0x148] sm:$0xf]  ;;  %v5355_v33 = vld [vmem:[#allocation19 + $0x3c0] sm:$0xf] }
 0x18b   :  { %1022 = vmatpush.bf16.msra.mxu0 %v4836_v54  ;;  %v4788_v38 = vor.u32 %v6476_v36, %v4787_v34  ;;  %v4627_v42 = vld [vmem:[#allocation13 + $0x8] sm:$0xf]  ;;  %v6621_v36 = vld [vmem:[#allocation19 + $0x3dc] sm:$0xf0] }
 0x18c   :  { %v510_v57 = vadd.f32 %v509_v49, %v508_v41  ;;  %v513_v58 = vrot.slane %v512_v14, 2  ;;  %1011 = vmatpush.bf16.msrb.mxu3 %v4676_v63  ;;  %v4792_v41 = vor.u32 %v6474_v39, %v4789_v40  ;;  %v4628_v46 = vor.u32 %v6436_v43, %v4627_v42  ;;  %v6472_v49 = vld [vmem:[#allocation13 + $0x134] sm:$0xf0]  ;;  %v6466_v63 = vld [vmem:[#allocation13 + $0x10c] sm:$0xf] }
 0x18d   :  { %1038 = vmatpush.bf16.msra.mxu1 %v4664_v20  ;;  %1050 = vmatpush.bf16.msra.mxu2 %v4808_v28  ;;  %v4772_v54 = vor.u32 %v6472_v49, %v4771_v48  ;;  %v6613_v40 = vld [vmem:[#allocation19 + $0x39c] sm:$0xf0] }
 0x18e   :  { %v517_v2 = vmul.f32 %v510_v57, %v7507_v35  ;;  %v514_v3 = vadd.f32 %v513_v58, %v512_v14  ;;  %v478_v57 = vld [vmem:[#allocation10] sm:$0x3]  ;;  %v5003_v42 = vld [vmem:[#allocation19 + $0x100] sm:$0xf] }
 0x18f   :  { %1023 = vmatpush.bf16.msra.mxu0 %v4820_v51  ;;  %v542_v4 = vperm.slane %v478_v57, 0  ;;  %v6533_v43 = vld [vmem:[#allocation19 + $0x11c] sm:$0xf0] }
 0x190   :  { %v7522_v11 = vadd.f32 1e-05, %v517_v2  ;;  %v515_v12 = vrot.slane %v514_v3, 1  ;;  %1012 = vmatpush.bf16.msrb.mxu3 %v4660_v16  ;;  %v4756_v2 = vor.u32 %v6468_v62, %v4755_v61  ;;  %v543_v16 = vperm.slane %v478_v57, 1  ;;  %v4971_v49 = vld [vmem:[#allocation19 + $0xc0] sm:$0xf] }
 0x191   :  { %1039 = vmatpush.bf16.msra.mxu1 %v4648_v37  ;;  %1051 = vmatpush.bf16.msra.mxu2 %v4792_v41  ;;  %v6541_v37 = vld [vmem:[#allocation19 + $0x15c] sm:$0xf0] }
 0x192   :  { %6908 = vrsqrt.f32 %v7522_v11  ;;  %v516_v19 = vadd.f32 %v515_v12, %v514_v3  ;;  %v4757_v3 = vld [vmem:[#allocation13 + $0x118] sm:$0xf0]  ;;  %vm527_vm5 = vweird.f32 %v7522_v11  ;;  %v4939_v61 = vld [vmem:[#allocation19 + $0x80] sm:$0xf] }
 0x193   :  { %1024 = vmatpush.bf16.msra.mxu0 %v4804_v25  ;;  %v4760_v5 = vor.u32 %v6466_v63, %v4757_v3  ;;  %v554_v25 = vperm.slane %v479_v9, 1  ;;  %v6517_v62 = vld [vmem:[#allocation19 + $0x9c] sm:$0xf0] }
 0x194   :  { %v518_v27 = vmul.f32 %v516_v19, %v7507_v35  ;;  %1013 = vmatpush.bf16.msrb.mxu3 %v4644_v32  ;;  %v6549_v32 = vld [vmem:[#allocation19 + $0x19c] sm:$0xf0] }
 0x195   :  { %1040 = vmatpush.bf16.msra.mxu1 %v4632_v50  ;;  %1052 = vmatpush.bf16.msra.mxu2 %v4776_v56  ;;  %v5068_v34 = vor.u32 %v6549_v32, %v5067_v31  ;;  %v5259_v50 = vld [vmem:[#allocation19 + $0x300] sm:$0xf]  ;;  %v7535_v56 = vld [vmem:[#allocation14] sm:$0xf] }
 0x196   :  { %v7526_v15 = vadd.f32 1e-05, %v518_v27  ;;  %v5260_v57 = vor.u32 %v6597_v53, %v5259_v50  ;;  %v5227_v63 = vld [vmem:[#allocation19 + $0x2c0] sm:$0xf]  ;;  %v628_v9 = vperm.slane %v7535_v56, 1 }
 0x197   :  { %1025 = vmatpush.bf16.msra.mxu0 %v4788_v38  ;;  %v5323_v38 = vld [vmem:[#allocation19 + $0x380] sm:$0xf]  ;;  %v5101_v53 = vld [vmem:[#allocation19 + $0x1e0] sm:$0xf0] }
 0x198   :  { %v6909_v45 = vpop.eup %6908  ;;  %6910 = vrsqrt.f32 %v7526_v15  ;;  %1014 = vmatpush.bf16.msrb.mxu3 %v4628_v46  ;;  %vm537_vm8 = vweird.f32 %v7526_v15  ;;  %v5324_v41 = vor.u32 %v6613_v40, %v5323_v38  ;;  %v6605_v46 = vld [vmem:[#allocation19 + $0x35c] sm:$0xf0] }
 0x199   :  { %v522_v14 = vmul.f32 %v6909_v45, %v7522_v11  ;;  %vm528_vm4 = vweird.f32 %v6909_v45  ;;  %1053 = vmatpush.bf16.msra.mxu2 %v4760_v5  ;;  %v5292_v47 = vor.u32 %v6605_v46, %v5291_v44  ;;  %v6677_v3 = vld [vmem:[#allocation19 + $0x59c] sm:$0xf0] }
 0x19a   :  { %vm529_vm6 = vmor %vm527_vm5, %vm528_vm4  ;;  %v4875_v31 = vld [vmem:[#allocation19] sm:$0xf] }
 0x19b   :  { %v523_v55 = vmul.f32 %v6909_v45, %v522_v14  ;;  %1026 = vmatpush.bf16.msra.mxu0 %v4772_v54  ;;  %v6525_v14 = vld [vmem:[#allocation19 + $0xdc] sm:$0xf0] }
 0x19c   :  { %v4972_v52 = vor.u32 %v6525_v14, %v4971_v49  ;;  %v5611_v54 = vld [vmem:[#allocation19 + $0x5c0] sm:$0xf]  ;;  %v6553_v14 = vld [vmem:[#allocation19 + $0x1c4] sm:$0xf] }
 0x19d   :  { %v524_v58 = vmul.f32 0.5, %v523_v55  ;;  %v6685_v55 = vld [vmem:[#allocation19 + $0x5dc] sm:$0xf0] }
 0x19e   :  { %v6911_v60 = vpop.eup %6910  ;;  %v6501_v32 = vld [vmem:[#allocation19 + $0x1c] sm:$0xf0] }
 0x19f   :  { %v525_v0 = vsub.f32 1.5, %v524_v58  ;;  %v532_v1 = vmul.f32 %v6911_v60, %v7526_v15  ;;  %1027 = vmatpush.bf16.msra.mxu0 %v4756_v2  ;;  %vm538_vm7 = vweird.f32 %v6911_v60  ;;  %v5035_v15 = vld [vmem:[#allocation19 + $0x140] sm:$0xf]  ;;  %v5612_v58 = vor.u32 %v6685_v55, %v5611_v54 }
 0x1a0   :  { %vm539_vm9 = vmor %vm537_vm8, %vm538_vm7  ;;  %v5036_v39 = vor.u32 %v6541_v37, %v5035_v15  ;;  %v5579_v2 = vld [vmem:[#allocation19 + $0x580] sm:$0xf] }
 0x1a1   :  { %v526_v6 = vmul.f32 %v6909_v45, %v525_v0  ;;  %v533_v7 = vmul.f32 %v6911_v60, %v532_v1  ;;  %v4940_v0 = vor.u32 %v6517_v62, %v4939_v61  ;;  %v6589_v1 = vld [vmem:[#allocation19 + $0x2dc] sm:$0xf0] }
 0x1a2   :  { %v6573_v15 = vld [vmem:[#allocation19 + $0x25c] sm:$0xf0] }
 0x1a3   :  { %v530_v51 = vsel %vm529_vm6, %v6909_v45, %v526_v6  ;;  %v534_v8 = vmul.f32 0.5, %v533_v7  ;;  %v5004_v45 = vor.u32 %v6533_v43, %v5003_v42  ;;  %v5228_v6 = vor.u32 %v6589_v1, %v5227_v63  ;;  %v5515_v37 = vld [vmem:[#allocation19 + $0x500] sm:$0xf] }
 0x1a4   :  { %v546_v10 = vmul.f32 %v542_v4, %v530_v51  ;;  %v5580_v7 = vor.u32 %v6677_v3, %v5579_v2  ;;  %v5867_v51 = vld [vmem:[#allocation19 + $0x7c0] sm:$0xf]  ;;  %v630_v42 = vperm.slane %v7535_v56, 3 }
 0x1a5   :  { %v535_v12 = vsub.f32 1.5, %v534_v8  ;;  %v6749_v8 = vld [vmem:[#allocation19 + $0x7dc] sm:$0xf0] }
 0x1a6   :  { %v548_v13 = vperm.slane %v546_v10, 0  ;;  %v6661_v38 = vld [vmem:[#allocation19 + $0x51c] sm:$0xf0] }
 0x1a7   :  { %v536_v18 = vmul.f32 %v6911_v60, %v535_v12  ;;  %v5868_v12 = vor.u32 %v6749_v8, %v5867_v51  ;;  %v5516_v44 = vor.u32 %v6661_v38, %v5515_v37  ;;  %v6733_v46 = vld [vmem:[#allocation19 + $0x75c] sm:$0xf0]  ;;  %v5357_v51 = vld [vmem:[#allocation19 + $0x3e0] sm:$0xf0] }
 0x1a8   :  { %v550_v19 = vmul.f32 %v548_v13, %v7511_v59  ;;  %v5099_v59 = vld [vmem:[#allocation19 + $0x1c0] sm:$0xf] }
 0x1a9   :  { %v540_v11 = vsel %vm539_vm9, %v6911_v60, %v536_v18  ;;  %v5100_v30 = vor.u32 %v6557_v29, %v5099_v59  ;;  %v627_v60 = vperm.slane %v7535_v56, 0  ;;  %v5195_v18 = vld [vmem:[#allocation19 + $0x280] sm:$0xf] }
 0x1aa   :  { %v547_v20 = vmul.f32 %v543_v16, %v540_v11  ;;  %v557_v21 = vadd.f32 %v553_v17, %v550_v19  ;;  %v4907_v16 = vld [vmem:[#allocation19 + $0x40] sm:$0xf] }
 0x1ab   :  { %v6509_v17 = vld [vmem:[#allocation19 + $0x5c] sm:$0xf0] }
 0x1ac   :  { %v549_v22 = vperm.slane %v547_v20, 0  ;;  %v559_v23 = vpack.c.bf16 %v557_v21, %v557_v21  ;;  %v4908_v11 = vor.u32 %v6509_v17, %v4907_v16  ;;  %v6581_v20 = vld [vmem:[#allocation19 + $0x29c] sm:$0xf0] }
 0x1ad   :  { %v5547_v21 = vld [vmem:[#allocation19 + $0x540] sm:$0xf] }
 0x1ae   :  { %v551_v26 = vmul.f32 %v549_v22, %v7517_v24  ;;  %963 = vmatmul.bf16.vlgmr.msra.gmra.mxu3 %v559_v23  ;;  %989 = vmatmul.bf16.vlgmr.msrb.gmra.mxu1 %v559_v23  ;;  %v5356_v24 = vor.u32 %v6621_v36, %v5355_v33  ;;  %v6669_v22 = vld [vmem:[#allocation19 + $0x55c] sm:$0xf0] }
 0x1af   :  { %2773 = vmatpush.bf16.msra.mxu3 %v5100_v30  ;;  %2799 = vmatpush.bf16.msrb.mxu1 %v5612_v58  ;;  %v5163_v33 = vld [vmem:[#allocation19 + $0x240] sm:$0xf]  ;;  %v5104_v58 = vor.u32 %v6553_v14, %v5101_v53 }
 0x1b0   :  { %v558_v27 = vadd.f32 %v554_v25, %v551_v26  ;;  %v5548_v25 = vor.u32 %v6669_v22, %v5547_v21  ;;  %v5835_v26 = vld [vmem:[#allocation19 + $0x780] sm:$0xf]  ;;  %v5164_v43 = vor.u32 %v6573_v15, %v5163_v33  ;;  %v5037_v21 = vld [vmem:[#allocation19 + $0x160] sm:$0xf0] }
 0x1b1   :  { %v5131_v54 = vld [vmem:[#allocation19 + $0x200] sm:$0xf] }
 0x1b2   :  { %v560_v28 = vpack.c.bf16 %v558_v27, %v558_v27  ;;  %v6741_v27 = vld [vmem:[#allocation19 + $0x79c] sm:$0xf0] }
 0x1b3   :  { %2774 = vmatpush.bf16.msra.mxu3 %v5068_v34  ;;  %2800 = vmatpush.bf16.msrb.mxu1 %v5580_v7  ;;  %v5836_v29 = vor.u32 %v6741_v27, %v5835_v26  ;;  %v6565_v55 = vld [vmem:[#allocation19 + $0x21c] sm:$0xf0]  ;;  %v6617_v7 = vld [vmem:[#allocation19 + $0x3c4] sm:$0xf] }
 0x1b4   :  { %976 = vmatmul.bf16.vlgmr.msrb.gmra.mxu0 %v560_v28  ;;  %1002 = vmatmul.bf16.vlgmr.msrb.gmra.mxu2 %v560_v28  ;;  %v5483_v61 = vld [vmem:[#allocation19 + $0x4c0] sm:$0xf] }
 0x1b5   :  { %2786 = vmatpush.bf16.msrb.mxu0 %v5356_v24  ;;  %2812 = vmatpush.bf16.msrb.mxu2 %v5868_v12  ;;  %v4876_v24 = vor.u32 %v6501_v32, %v4875_v31  ;;  %v6653_v62 = vld [vmem:[#allocation19 + $0x4dc] sm:$0xf0] }
 0x1b6   :  { %v5771_v63 = vld [vmem:[#allocation19 + $0x700] sm:$0xf]  ;;  %v5484_v2 = vor.u32 %v6653_v62, %v5483_v61 }
 0x1b7   :  { %2775 = vmatpush.bf16.msra.mxu3 %v5036_v39  ;;  %2801 = vmatpush.bf16.msrb.mxu1 %v5548_v25  ;;  %v6725_v3 = vld [vmem:[#allocation19 + $0x71c] sm:$0xf0] }
 0x1b8   :  { %v6645_v16 = vld [vmem:[#allocation19 + $0x49c] sm:$0xf0] }
 0x1b9   :  { %2787 = vmatpush.bf16.msrb.mxu0 %v5324_v41  ;;  %2813 = vmatpush.bf16.msrb.mxu2 %v5836_v29  ;;  %v5739_v17 = vld [vmem:[#allocation19 + $0x6c0] sm:$0xf] }
 0x1ba   :  { %v6637_v15 = vld [vmem:[#allocation19 + $0x45c] sm:$0xf0] }
 0x1bb   :  { %2776 = vmatpush.bf16.msra.mxu3 %v5004_v45  ;;  %v5803_v45 = vld [vmem:[#allocation19 + $0x740] sm:$0xf]  ;;  %2802 = vmatpush.bf16.msrb.mxu1 %v5516_v44 }
 0x1bc   :  { %v5804_v49 = vor.u32 %v6733_v46, %v5803_v45  ;;  %v5707_v37 = vld [vmem:[#allocation19 + $0x680] sm:$0xf] }
 0x1bd   :  { %2788 = vmatpush.bf16.msrb.mxu0 %v5292_v47  ;;  %v6629_v61 = vld [vmem:[#allocation19 + $0x41c] sm:$0xf0] }
 0x1be   :  { %1015 = vmatmul.bf16.vlgmr.msrb.gmra.mxu3 %v559_v23  ;;  %1041 = vmatmul.bf16.vlgmr.msra.gmra.mxu1 %v559_v23  ;;  %v5196_v23 = vor.u32 %v6581_v20, %v5195_v18  ;;  %v5360_v18 = vor.u32 %v6617_v7, %v5357_v51  ;;  %v6537_v20 = vld [vmem:[#allocation19 + $0x144] sm:$0xf] }
 0x1bf   :  { %2777 = vmatpush.bf16.msra.mxu3 %v4972_v52  ;;  %2814 = vmatpush.bf16.msrb.mxu2 %v5804_v49  ;;  %v5293_v49 = vld [vmem:[#allocation19 + $0x360] sm:$0xf0] }
 0x1c0   :  { %2803 = vmatpush.bf16.msrb.mxu1 %v5484_v2  ;;  %v6593_v7 = vld [vmem:[#allocation19 + $0x304] sm:$0xf] }
 0x1c1   :  { %2789 = vmatpush.bf16.msrb.mxu0 %v5260_v57  ;;  %v5261_v51 = vld [vmem:[#allocation19 + $0x320] sm:$0xf0] }
 0x1c3   :  { %2778 = vmatpush.bf16.msra.mxu3 %v4940_v0 }
 0x1c4   :  { %1028 = vmatmul.bf16.vlgmr.msra.gmra.mxu0 %v560_v28  ;;  %1054 = vmatmul.bf16.vlgmr.msra.gmra.mxu2 %v560_v28 }
 0x1c5   :  { %2790 = vmatpush.bf16.msrb.mxu0 %v5228_v6  ;;  %v5069_v6 = vld [vmem:[#allocation19 + $0x1a0] sm:$0xf0] }
 0x1c7   :  { %2779 = vmatpush.bf16.msra.mxu3 %v4908_v11  ;;  %v6717_v11 = vld [vmem:[#allocation19 + $0x6dc] sm:$0xf0] }
 0x1c8   :  { %v5740_v27 = vor.u32 %v6717_v11, %v5739_v17 }
 0x1c9   :  { %2791 = vmatpush.bf16.msrb.mxu0 %v5196_v23 }
 0x1cb   :  { %2780 = vmatpush.bf16.msra.mxu3 %v4876_v24  ;;  %v5419_v24 = vld [vmem:[#allocation19 + $0x440] sm:$0xf] }
 0x1cd   :  { %2792 = vmatpush.bf16.msrb.mxu0 %v5164_v43  ;;  %v5005_v43 = vld [vmem:[#allocation19 + $0x120] sm:$0xf0] }
 0x1cf   :  { %2825 = vmatpush.bf16.msrb.mxu3 %v5104_v58 }
 0x22b   :  { %v990_v48 = vpop.f32.mrf.mxu1 }
 0x22c   :  { %v991_v28 = vadd.f32 %v990_v48, %v628_v9  ;;  %v629_v48 = vperm.slane %v7535_v56, 2  ;;  %v5675_v56 = vld [vmem:[#allocation19 + $0x640] sm:$0xf] }
 0x231   :  { %v964_v4 = vpop.f32.mrf.mxu3  ;;  %v977_v5 = vpop.f32.mrf.mxu0 }
 0x232   :  { %v965_v10 = vadd.f32 %v964_v4, %v627_v60  ;;  %v5132_v60 = vor.u32 %v6565_v55, %v5131_v54  ;;  %v6545_v4 = vld [vmem:[#allocation19 + $0x184] sm:$0xf] }
 0x233   :  { %v992_v13 = vpop.f32.mrf.mxu1  ;;  %v5072_v12 = vor.u32 %v6545_v4, %v5069_v6 }
 0x234   :  { %v978_v19 = vadd.f32 %v977_v5, %v965_v10  ;;  %v5772_v5 = vor.u32 %v6725_v3, %v5771_v63  ;;  %2793 = vmatpush.bf16.msrb.mxu0 %v5132_v60  ;;  %v5451_v13 = vld [vmem:[#allocation19 + $0x480] sm:$0xf] }
 0x235   :  { %2826 = vmatpush.bf16.msrb.mxu3 %v5072_v12  ;;  %v5387_v60 = vld [vmem:[#allocation19 + $0x400] sm:$0xf]  ;;  %v6681_v12 = vld [vmem:[#allocation19 + $0x5c4] sm:$0xf] }
 0x236   :  { %vm1059_vm10 = vcmp.ge.f32.partialorder %v978_v19, 0.0  ;;  %v1063_v59 = vmul.f32 0.2, %v978_v19  ;;  %2815 = vmatpush.bf16.msrb.mxu2 %v5772_v5  ;;  %v6701_v63 = vld [vmem:[#allocation19 + $0x65c] sm:$0xf0] }
 0x237   :  { %v1003_v30 = vpop.f32.mrf.mxu2  ;;  %v5676_v6 = vor.u32 %v6701_v63, %v5675_v56 }
 0x238   :  { %v7539_v34 = vsel %vm1059_vm10, %v978_v19, %v1063_v59  ;;  %v1004_v36 = vadd.f32 %v1003_v30, %v991_v28  ;;  %v5452_v19 = vor.u32 %v6645_v16, %v5451_v13  ;;  %v6609_v28 = vld [vmem:[#allocation19 + $0x384] sm:$0xf]  ;;  %2838 = vmatpush.bf16.msra.mxu0 %v5360_v18  ;;  %v5040_v30 = vor.u32 %v6537_v20, %v5037_v21  ;;  %v6693_v21 = vld [vmem:[#allocation19 + $0x61c] sm:$0xf0] }
 0x239   :  { %v1073_v39 = vrot.slane %v7539_v34, 4  ;;  %v966_v40 = vpop.f32.mrf.mxu3  ;;  %v979_v41 = vpop.f32.mrf.mxu0  ;;  %v5325_v59 = vld [vmem:[#allocation19 + $0x3a0] sm:$0xf0] }
 0x23a   :  { %vm1060_vm11 = vcmp.ge.f32.partialorder %v1004_v36, 0.0  ;;  %v1064_v47 = vmul.f32 0.2, %v1004_v36  ;;  %v5328_v31 = vor.u32 %v6609_v28, %v5325_v59  ;;  %2804 = vmatpush.bf16.msrb.mxu1 %v5452_v19  ;;  %2816 = vmatpush.bf16.msrb.mxu2 %v5740_v27  ;;  %v6709_v40 = vld [vmem:[#allocation19 + $0x69c] sm:$0xf0] }
 0x23b   :  { %v1074_v50 = vadd.f32 %v1073_v39, %v7539_v34  ;;  %v7545_v52 = vpop.f32.mrf.mxu1  ;;  %v5420_v39 = vor.u32 %v6637_v15, %v5419_v24  ;;  %v6529_v41 = vld [vmem:[#allocation19 + $0x104] sm:$0xf]  ;;  %2827 = vmatpush.bf16.msrb.mxu3 %v5040_v30  ;;  %v5643_v19 = vld [vmem:[#allocation19 + $0x600] sm:$0xf] }
 0x23c   :  { %v7547_v57 = vsel %vm1060_vm11, %v1004_v36, %v1064_v47  ;;  %v1043_v46 = vadd.f32 %v7545_v52, %v630_v42  ;;  %v5708_v47 = vor.u32 %v6709_v40, %v5707_v37  ;;  %2839 = vmatpush.bf16.msra.mxu0 %v5328_v31  ;;  %v5388_v52 = vor.u32 %v6629_v61, %v5387_v60  ;;  %v5613_v18 = vld [vmem:[#allocation19 + $0x5e0] sm:$0xf0] }
 0x23d   :  { %v1075_v0 = vrot.slane %v1074_v50, 2  ;;  %v1079_v1 = vrot.slane %v7547_v57, 4  ;;  %v5616_v20 = vor.u32 %v6681_v12, %v5613_v18  ;;  %v6585_v28 = vld [vmem:[#allocation19 + $0x2c4] sm:$0xf] }
 0x23e   :  { %2805 = vmatpush.bf16.msrb.mxu1 %v5420_v39  ;;  %2817 = vmatpush.bf16.msrb.mxu2 %v5708_v47  ;;  %v5229_v59 = vld [vmem:[#allocation19 + $0x2e0] sm:$0xf0] }
 0x23f   :  { %v1076_v8 = vadd.f32 %v1075_v0, %v1074_v50  ;;  %v1080_v9 = vadd.f32 %v1079_v1, %v7547_v57  ;;  %v1005_v10 = vpop.f32.mrf.mxu2  ;;  %v5008_v50 = vor.u32 %v6529_v41, %v5005_v43  ;;  %v6521_v0 = vld [vmem:[#allocation19 + $0xc4] sm:$0xf]  ;;  %v5232_v31 = vor.u32 %v6585_v28, %v5229_v59 }
 0x240   :  { %v4973_v1 = vld [vmem:[#allocation19 + $0xe0] sm:$0xf0]  ;;  %v5264_v10 = vor.u32 %v6593_v7, %v5261_v51 }
 0x241   :  { %v1077_v22 = vrot.slane %v1076_v8, 1  ;;  %v1081_v23 = vrot.slane %v1080_v9, 2  ;;  %v1016_v25 = vpop.f32.mrf.mxu3  ;;  %v1029_v26 = vpop.f32.mrf.mxu0  ;;  %2828 = vmatpush.bf16.msrb.mxu3 %v5008_v50  ;;  %v5869_v39 = vld [vmem:[#allocation19 + $0x7e0] sm:$0xf0] }
 0x242   :  { %v1017_v29 = vadd.f32 %v1016_v25, %v629_v48  ;;  %v6601_v48 = vld [vmem:[#allocation19 + $0x344] sm:$0xf]  ;;  %2806 = vmatpush.bf16.msrb.mxu1 %v5388_v52  ;;  %2818 = vmatpush.bf16.msrb.mxu2 %v5676_v6 }
 0x243   :  { %v1078_v32 = vadd.f32 %v1077_v22, %v1076_v8  ;;  %v1082_v33 = vadd.f32 %v1081_v23, %v1080_v9  ;;  %v1044_v36 = vpop.f32.mrf.mxu1  ;;  %v5296_v53 = vor.u32 %v6601_v48, %v5293_v49  ;;  %v4976_v9 = vor.u32 %v6521_v0, %v4973_v1  ;;  %v6513_v22 = vld [vmem:[#allocation19 + $0x84] sm:$0xf] }
 0x244   :  { %v1030_v38 = vadd.f32 %v1029_v26, %v1017_v29  ;;  %v4941_v23 = vld [vmem:[#allocation19 + $0xa0] sm:$0xf0]  ;;  %v5644_v29 = vor.u32 %v6693_v21, %v5643_v19 }
 0x245   :  { %v1097_v44 = vmul.f32 %v1078_v32, %v7507_v35  ;;  %v1083_v45 = vrot.slane %v1082_v33, 1  ;;  %2840 = vmatpush.bf16.msra.mxu0 %v5296_v53  ;;  %2829 = vmatpush.bf16.msrb.mxu3 %v4976_v9  ;;  %v4944_v30 = vor.u32 %v6513_v22, %v4941_v23  ;;  %v6673_v32 = vld [vmem:[#allocation19 + $0x584] sm:$0xf] }
 0x246   :  { %vm1061_vm12 = vcmp.ge.f32.partialorder %v1030_v38, 0.0  ;;  %v1065_v14 = vmul.f32 0.2, %v1030_v38  ;;  %v6745_v36 = vld [vmem:[#allocation19 + $0x7c4] sm:$0xf]  ;;  %2851 = vmatpush.bf16.msra.mxu1 %v5616_v20  ;;  %2819 = vmatpush.bf16.msrb.mxu2 %v5644_v29 }
 0x247   :  { %v7556_v54 = vsub.f32 %v7539_v34, %v1097_v44  ;;  %v1084_v55 = vadd.f32 %v1083_v45, %v1082_v33  ;;  %v1055_v58 = vpop.f32.mrf.mxu2  ;;  %v5581_v33 = vld [vmem:[#allocation19 + $0x5a0] sm:$0xf0]  ;;  %v5872_v43 = vor.u32 %v6745_v36, %v5869_v39 }
 0x248   :  { %v7558_v62 = vsel %vm1061_vm12, %v1030_v38, %v1065_v14  ;;  %v1056_v42 = vadd.f32 %v1055_v58, %v1043_v46  ;;  %v5584_v41 = vor.u32 %v6673_v32, %v5581_v33  ;;  %v6505_v44 = vld [vmem:[#allocation19 + $0x44] sm:$0xf] }
 0x249   :  { %v1105_v2 = vmul.f32 %v7556_v54, %v7556_v54  ;;  %v1098_v34 = vmul.f32 %v1084_v55, %v7507_v35  ;;  %v1085_v3 = vrot.slane %v7558_v62, 4  ;;  %v1018_v4 = vpop.f32.mrf.mxu3  ;;  %v1031_v5 = vpop.f32.mrf.mxu0  ;;  %2841 = vmatpush.bf16.msra.mxu0 %v5264_v10  ;;  %v4909_v45 = vld [vmem:[#allocation19 + $0x60] sm:$0xf0]  ;;  %2830 = vmatpush.bf16.msrb.mxu3 %v4944_v30 }
 0x24a   :  { %vm1062_vm13 = vcmp.ge.f32.partialorder %v1056_v42, 0.0  ;;  %v1066_v8 = vmul.f32 0.2, %v1056_v42  ;;  %v6577_v46 = vld [vmem:[#allocation19 + $0x284] sm:$0xf]  ;;  %v4912_v55 = vor.u32 %v6505_v44, %v4909_v45  ;;  %2852 = vmatpush.bf16.msra.mxu1 %v5584_v41  ;;  %2864 = vmatpush.bf16.msra.mxu2 %v5872_v43 }
 0x24b   :  { %v1109_v13 = vrot.slane %v1105_v2, 4  ;;  %v7565_v16 = vsub.f32 %v7547_v57, %v1098_v34  ;;  %v1086_v17 = vadd.f32 %v1085_v3, %v7558_v62  ;;  %v5197_v14 = vld [vmem:[#allocation19 + $0x2a0] sm:$0xf0] }
 0x24c   :  { %v7568_v11 = vsel %vm1062_vm13, %v1056_v42, %v1066_v8  ;;  %v6665_v50 = vld [vmem:[#allocation19 + $0x544] sm:$0xf]  ;;  %v5200_v58 = vor.u32 %v6577_v46, %v5197_v14 }
 0x24d   :  { %v1110_v25 = vadd.f32 %v1109_v13, %v1105_v2  ;;  %v1106_v26 = vmul.f32 %v7565_v16, %v7565_v16  ;;  %v1087_v27 = vrot.slane %v1086_v17, 2  ;;  %v1091_v57 = vrot.slane %v7568_v11, 4  ;;  %2842 = vmatpush.bf16.msra.mxu0 %v5232_v31  ;;  %v5549_v60 = vld [vmem:[#allocation19 + $0x560] sm:$0xf0]  ;;  %2831 = vmatpush.bf16.msrb.mxu3 %v4912_v55 }
 0x24e   :  { %v6737_v61 = vld [vmem:[#allocation19 + $0x784] sm:$0xf]  ;;  %v5552_v63 = vor.u32 %v6665_v50, %v5549_v60 }
 0x24f   :  { %v1111_v24 = vrot.slane %v1110_v25, 2  ;;  %v1115_v15 = vrot.slane %v1106_v26, 4  ;;  %v1088_v37 = vadd.f32 %v1087_v27, %v1086_v17  ;;  %v1057_v38 = vpop.f32.mrf.mxu2  ;;  %v1092_v40 = vadd.f32 %v1091_v57, %v7568_v11  ;;  %v5837_v0 = vld [vmem:[#allocation19 + $0x7a0] sm:$0xf0] }
 0x250   :  { %v5840_v2 = vor.u32 %v6737_v61, %v5837_v0  ;;  %v6497_v34 = vld [vmem:[#allocation19 + $0x4] sm:$0xf]  ;;  %2853 = vmatpush.bf16.msra.mxu1 %v5552_v63 }
 0x251   :  { %v1112_v47 = vadd.f32 %v1111_v24, %v1110_v25  ;;  %v1116_v48 = vadd.f32 %v1115_v15, %v1106_v26  ;;  %v1089_v49 = vrot.slane %v1088_v37, 1  ;;  %v1093_v53 = vrot.slane %v1092_v40, 2  ;;  %v4877_v3 = vld [vmem:[#allocation19 + $0x20] sm:$0xf0]  ;;  %2843 = vmatpush.bf16.msra.mxu0 %v5200_v58 }
 0x252   :  { %v6569_v4 = vld [vmem:[#allocation19 + $0x244] sm:$0xf]  ;;  %v4880_v10 = vor.u32 %v6497_v34, %v4877_v3  ;;  %2865 = vmatpush.bf16.msra.mxu2 %v5840_v2 }
 0x253   :  { %v1113_v56 = vrot.slane %v1112_v47, 1  ;;  %v1117_v42 = vrot.slane %v1116_v48, 2  ;;  %v1090_v52 = vadd.f32 %v1089_v49, %v1088_v37  ;;  %v1094_v1 = vadd.f32 %v1093_v53, %v1092_v40  ;;  %v5165_v51 = vld [vmem:[#allocation19 + $0x260] sm:$0xf0] }
 0x254   :  { %v6657_v8 = vld [vmem:[#allocation19 + $0x504] sm:$0xf]  ;;  %v5168_v12 = vor.u32 %v6569_v4, %v5165_v51  ;;  %2832 = vmatpush.bf16.msrb.mxu3 %v4880_v10 }
 0x255   :  { %v1114_v5 = vadd.f32 %v1113_v56, %v1112_v47  ;;  %v1118_v6 = vadd.f32 %v1117_v42, %v1116_v48  ;;  %v1099_v7 = vmul.f32 %v1090_v52, %v7507_v35  ;;  %v1095_v9 = vrot.slane %v1094_v1, 1  ;;  %v5517_v13 = vld [vmem:[#allocation19 + $0x520] sm:$0xf0]  ;;  %v7595_v42 = vld [vmem:[#allocation16] sm:$0xf] }
 0x256   :  { %v6729_v17 = vld [vmem:[#allocation19 + $0x744] sm:$0xf]  ;;  %v5520_v21 = vor.u32 %v6657_v8, %v5517_v13  ;;  %2844 = vmatpush.bf16.msra.mxu0 %v5168_v12  ;;  %v1182_v10 = vperm.slane %v7595_v42, 0 }
 0x257   :  { %v1133_v18 = vmul.f32 %v1114_v5, %v7507_v35  ;;  %v1119_v19 = vrot.slane %v1118_v6, 1  ;;  %v7577_v20 = vsub.f32 %v7558_v62, %v1099_v7  ;;  %v5805_v22 = vld [vmem:[#allocation19 + $0x760] sm:$0xf0]  ;;  %v1096_v23 = vadd.f32 %v1095_v9, %v1094_v1 }
 0x258   :  { %v5808_v25 = vor.u32 %v6729_v17, %v5805_v22  ;;  %v6561_v26 = vld [vmem:[#allocation19 + $0x204] sm:$0xf]  ;;  %2854 = vmatpush.bf16.msra.mxu1 %v5520_v21 }
 0x259   :  { %v5133_v27 = vld [vmem:[#allocation19 + $0x220] sm:$0xf0]  ;;  %v7579_v57 = vadd.f32 1e-05, %v1133_v18  ;;  %v1120_v28 = vadd.f32 %v1119_v19, %v1118_v6  ;;  %v1107_v59 = vmul.f32 %v7577_v20, %v7577_v20  ;;  %v1100_v31 = vmul.f32 %v1096_v23, %v7507_v35 }
 0x25a   :  { %v6649_v29 = vld [vmem:[#allocation19 + $0x4c4] sm:$0xf]  ;;  %v5136_v62 = vor.u32 %v6561_v26, %v5133_v27  ;;  %2866 = vmatpush.bf16.msra.mxu2 %v5808_v25 }
 0x25b   :  { %v5485_v30 = vld [vmem:[#allocation19 + $0x4e0] sm:$0xf0]  ;;  %6912 = vrsqrt.f32 %v7579_v57  ;;  %v1134_v36 = vmul.f32 %v1120_v28, %v7507_v35  ;;  %v1121_v24 = vrot.slane %v1107_v59, 4  ;;  %v7587_v37 = vsub.f32 %v7568_v11, %v1100_v31 }
 0x25c   :  { %v6721_v32 = vld [vmem:[#allocation19 + $0x704] sm:$0xf]  ;;  %v5488_v15 = vor.u32 %v6649_v29, %v5485_v30  ;;  %2845 = vmatpush.bf16.msra.mxu0 %v5136_v62  ;;  %vm1147_vm15 = vweird.f32 %v7579_v57  ;;  %v7604_v29 = vld [vmem:[#allocation17] sm:$0xf] }
 0x25d   :  { %v5773_v33 = vld [vmem:[#allocation19 + $0x720] sm:$0xf0]  ;;  %v7589_v40 = vadd.f32 1e-05, %v1134_v36  ;;  %v1122_v41 = vadd.f32 %v1121_v24, %v1107_v59  ;;  %v1108_v45 = vmul.f32 %v7587_v37, %v7587_v37 }
 0x25e   :  { %v5776_v38 = vor.u32 %v6721_v32, %v5773_v33  ;;  %v6641_v39 = vld [vmem:[#allocation19 + $0x484] sm:$0xf]  ;;  %2855 = vmatpush.bf16.msra.mxu1 %v5488_v15  ;;  %v1183_v33 = vperm.slane %v7595_v42, 1  ;;  %v1203_v15 = vperm.slane %v7604_v29, 0 }
 0x25f   :  { %v5453_v43 = vld [vmem:[#allocation19 + $0x4a0] sm:$0xf0]  ;;  %6914 = vrsqrt.f32 %v7589_v40  ;;  %v1123_v47 = vrot.slane %v1122_v41, 2  ;;  %v1127_v49 = vrot.slane %v1108_v45, 4  ;;  %vm1157_vm2 = vweird.f32 %v7589_v40 }
 0x260   :  { %v6713_v44 = vld [vmem:[#allocation19 + $0x6c4] sm:$0xf]  ;;  %2867 = vmatpush.bf16.msra.mxu2 %v5776_v38  ;;  %v5456_v48 = vor.u32 %v6641_v39, %v5453_v43 }
 0x261   :  { %v5741_v46 = vld [vmem:[#allocation19 + $0x6e0] sm:$0xf0]  ;;  %v6913_v53 = vpop.eup %6912  ;;  %v1124_v55 = vadd.f32 %v1123_v47, %v1122_v41  ;;  %v1128_v56 = vadd.f32 %v1127_v49, %v1108_v45  ;;  %v6558_v45 = vld [vmem:[#allocation19 + $0x1e4] sm:$0xf0] }
 0x262   :  { %v5744_v11 = vor.u32 %v6713_v44, %v5741_v46  ;;  %v6633_v14 = vld [vmem:[#allocation19 + $0x444] sm:$0xf]  ;;  %v1142_v61 = vmul.f32 %v6913_v53, %v7579_v57  ;;  %2856 = vmatpush.bf16.msra.mxu1 %v5456_v48  ;;  %vm1148_vm14 = vweird.f32 %v6913_v53  ;;  %v5107_v44 = vld [vmem:[#allocation19 + $0x1c8] sm:$0xf]  ;;  %v1204_v48 = vperm.slane %v7604_v29, 1 }
 0x263   :  { %v5421_v50 = vld [vmem:[#allocation19 + $0x460] sm:$0xf0]  ;;  %v1125_v52 = vrot.slane %v1124_v55, 1  ;;  %v1129_v2 = vrot.slane %v1128_v56, 2  ;;  %vm1149_vm0 = vmor %vm1147_vm15, %vm1148_vm14  ;;  %v5108_v49 = vor.u32 %v6558_v45, %v5107_v44  ;;  %v4947_v45 = vld [vmem:[#allocation19 + $0x88] sm:$0xf] }
 0x264   :  { %v6705_v58 = vld [vmem:[#allocation19 + $0x684] sm:$0xf]  ;;  %2868 = vmatpush.bf16.msra.mxu2 %v5744_v11  ;;  %v5424_v63 = vor.u32 %v6633_v14, %v5421_v50  ;;  %v1143_v1 = vmul.f32 %v6913_v53, %v1142_v61  ;;  %v5075_v14 = vld [vmem:[#allocation19 + $0x188] sm:$0xf] }
 0x265   :  { %v5709_v60 = vld [vmem:[#allocation19 + $0x6a0] sm:$0xf0]  ;;  %v6915_v4 = vpop.eup %6914  ;;  %v1126_v5 = vadd.f32 %v1125_v52, %v1124_v55  ;;  %v1130_v9 = vadd.f32 %v1129_v2, %v1128_v56  ;;  %v6550_v55 = vld [vmem:[#allocation19 + $0x1a4] sm:$0xf0]  ;;  %v1184_v52 = vperm.slane %v7595_v42, 2 }
 0x266   :  { %v5712_v0 = vor.u32 %v6705_v58, %v5709_v60  ;;  %v6625_v34 = vld [vmem:[#allocation19 + $0x404] sm:$0xf]  ;;  %v1144_v51 = vmul.f32 0.5, %v1143_v1  ;;  %v1152_v8 = vmul.f32 %v6915_v4, %v7589_v40  ;;  %2857 = vmatpush.bf16.msra.mxu1 %v5424_v63  ;;  %vm1158_vm1 = vweird.f32 %v6915_v4  ;;  %v5363_v58 = vld [vmem:[#allocation19 + $0x3c8] sm:$0xf] }
 0x267   :  { %v5389_v3 = vld [vmem:[#allocation19 + $0x420] sm:$0xf0]  ;;  %v1135_v12 = vmul.f32 %v1126_v5, %v7507_v35  ;;  %v1131_v21 = vrot.slane %v1130_v9, 1  ;;  %vm1159_vm3 = vmor %vm1157_vm2, %vm1158_vm1  ;;  %v6622_v60 = vld [vmem:[#allocation19 + $0x3e4] sm:$0xf0]  ;;  %v5076_v1 = vor.u32 %v6550_v55, %v5075_v14 }
 0x268   :  { %v6697_v6 = vld [vmem:[#allocation19 + $0x644] sm:$0xf]  ;;  %2869 = vmatpush.bf16.msra.mxu2 %v5712_v0  ;;  %v5392_v13 = vor.u32 %v6625_v34, %v5389_v3  ;;  %v1145_v18 = vsub.f32 1.5, %v1144_v51  ;;  %v1153_v19 = vmul.f32 %v6915_v4, %v1152_v8  ;;  %v5364_v2 = vor.u32 %v6622_v60, %v5363_v58  ;;  %v5043_v34 = vld [vmem:[#allocation19 + $0x148] sm:$0xf] }
 0x269   :  { %v5677_v7 = vld [vmem:[#allocation19 + $0x660] sm:$0xf0]  ;;  %v7600_v22 = vadd.f32 1e-05, %v1135_v12  ;;  %v1132_v28 = vadd.f32 %v1131_v21, %v1130_v9  ;;  %v5331_v5 = vld [vmem:[#allocation19 + $0x388] sm:$0xf] }
 0x26a   :  { %v5680_v17 = vor.u32 %v6697_v6, %v5677_v7  ;;  %v6689_v23 = vld [vmem:[#allocation19 + $0x604] sm:$0xf]  ;;  %v1146_v26 = vmul.f32 %v6913_v53, %v1145_v18  ;;  %v1154_v27 = vmul.f32 0.5, %v1153_v19  ;;  %2858 = vmatpush.bf16.msra.mxu1 %v5392_v13  ;;  %v6614_v6 = vld [vmem:[#allocation19 + $0x3a4] sm:$0xf0] }
 0x26b   :  { %v5645_v25 = vld [vmem:[#allocation19 + $0x620] sm:$0xf0]  ;;  %6916 = vrsqrt.f32 %v7600_v22  ;;  %v1136_v62 = vmul.f32 %v1132_v28, %v7507_v35  ;;  %vm1167_vm5 = vweird.f32 %v7600_v22  ;;  %v5011_v12 = vld [vmem:[#allocation19 + $0x108] sm:$0xf] }
 0x26c   :  { %2870 = vmatpush.bf16.msra.mxu2 %v5680_v17  ;;  %v5648_v59 = vor.u32 %v6689_v23, %v5645_v25  ;;  %v1150_v30 = vsel %vm1149_vm0, %v6913_v53, %v1146_v26  ;;  %v1155_v31 = vsub.f32 1.5, %v1154_v27  ;;  %v6534_v13 = vld [vmem:[#allocation19 + $0x124] sm:$0xf0]  ;;  %v1185_v23 = vperm.slane %v7595_v42, 3 }
 0x26d   :  { %v1190_v32 = vmul.f32 %v1182_v10, %v1150_v30  ;;  %v7609_v57 = vadd.f32 1e-05, %v1136_v62  ;;  %v5332_v10 = vor.u32 %v6614_v6, %v5331_v5  ;;  %v5299_v19 = vld [vmem:[#allocation19 + $0x348] sm:$0xf]  ;;  %v5012_v27 = vor.u32 %v6534_v13, %v5011_v12 }
 0x26e   :  { %v1156_v36 = vmul.f32 %v6915_v4, %v1155_v31  ;;  %v6606_v21 = vld [vmem:[#allocation19 + $0x364] sm:$0xf0] }
 0x26f   :  { %v1194_v24 = vperm.slane %v1190_v32, 0  ;;  %6918 = vrsqrt.f32 %v7609_v57  ;;  %vm1177_vm8 = vweird.f32 %v7609_v57  ;;  %v5300_v28 = vor.u32 %v6606_v21, %v5299_v19  ;;  %v6526_v62 = vld [vmem:[#allocation19 + $0xe4] sm:$0xf0] }
 0x270   :  { %2871 = vmatpush.bf16.msra.mxu2 %v5648_v59  ;;  %v1160_v38 = vsel %vm1159_vm3, %v6915_v4, %v1156_v36  ;;  %v6542_v4 = vld [vmem:[#allocation19 + $0x164] sm:$0xf0] }
 0x271   :  { %v6917_v39 = vpop.eup %6916  ;;  %v1198_v41 = vmul.f32 %v1194_v24, %v7556_v54  ;;  %v1191_v43 = vmul.f32 %v1183_v33, %v1160_v38  ;;  %v5044_v9 = vor.u32 %v6542_v4, %v5043_v34  ;;  %v4979_v59 = vld [vmem:[#allocation19 + $0xc8] sm:$0xf] }
 0x272   :  { %v1162_v46 = vmul.f32 %v6917_v39, %v7600_v22  ;;  %vm1168_vm4 = vweird.f32 %v6917_v39  ;;  %v1205_v22 = vperm.slane %v7604_v29, 2  ;;  %v5267_v32 = vld [vmem:[#allocation19 + $0x308] sm:$0xf] }
 0x273   :  { %v1211_v47 = vadd.f32 %v1203_v15, %v1198_v41  ;;  %v1195_v40 = vperm.slane %v1191_v43, 0  ;;  %vm1169_vm6 = vmor %vm1167_vm5, %vm1168_vm4  ;;  %v6598_v33 = vld [vmem:[#allocation19 + $0x324] sm:$0xf0] }
 0x274   :  { %v1163_v11 = vmul.f32 %v6917_v39, %v1162_v46  ;;  %v5619_v42 = vld [vmem:[#allocation19 + $0x5c8] sm:$0xf]  ;;  %v5268_v41 = vor.u32 %v6598_v33, %v5267_v32  ;;  %v5077_v32 = vld [vmem:[#allocation19 + $0x1a8] sm:$0xf0] }
 0x275   :  { %v7616_v50 = vpack.c.bf16 %v1211_v47, %v1211_v47  ;;  %v1199_v53 = vmul.f32 %v1195_v40, %v7565_v16  ;;  %v6919_v54 = vpop.eup %6918  ;;  %v6686_v24 = vld [vmem:[#allocation19 + $0x5e4] sm:$0xf0]  ;;  %v6618_v33 = vld [vmem:[#allocation19 + $0x3cc] sm:$0xf] }
 0x276   :  { %v1164_v61 = vmul.f32 0.5, %v1163_v11  ;;  %v1172_v63 = vmul.f32 %v6919_v54, %v7609_v57  ;;  %vm1178_vm7 = vweird.f32 %v6919_v54  ;;  %v4980_v57 = vor.u32 %v6526_v62, %v4979_v59  ;;  %v5235_v46 = vld [vmem:[#allocation19 + $0x2c8] sm:$0xf]  ;;  %v6546_v62 = vld [vmem:[#allocation19 + $0x18c] sm:$0xf] }
 0x277   :  { %v1212_v56 = vadd.f32 %v1204_v48, %v1199_v53  ;;  %2781 = vmatmul.bf16.vlgmr.msra.gmra.mxu3 %v7616_v50  ;;  %vm1179_vm9 = vmor %vm1177_vm8, %vm1178_vm7  ;;  %v5620_v44 = vor.u32 %v6686_v24, %v5619_v42  ;;  %v6590_v40 = vld [vmem:[#allocation19 + $0x2e4] sm:$0xf0] }
 0x278   :  { %v1165_v0 = vsub.f32 1.5, %v1164_v61  ;;  %2877 = vmatpush.bf16.msra.mxu3 %v5108_v49  ;;  %v1173_v16 = vmul.f32 %v6919_v54, %v1172_v63  ;;  %v5587_v48 = vld [vmem:[#allocation19 + $0x588] sm:$0xf]  ;;  %v5236_v55 = vor.u32 %v6590_v40, %v5235_v46  ;;  %v5045_v46 = vld [vmem:[#allocation19 + $0x168] sm:$0xf0] }
 0x279   :  { %v7622_v3 = vpack.c.bf16 %v1212_v56, %v1212_v56  ;;  %v6678_v11 = vld [vmem:[#allocation19 + $0x5a4] sm:$0xf0]  ;;  %v5333_v40 = vld [vmem:[#allocation19 + $0x3a8] sm:$0xf0] }
 0x27a   :  { %v1166_v7 = vmul.f32 %v6917_v39, %v1165_v0  ;;  %v1174_v51 = vmul.f32 0.5, %v1173_v16  ;;  %v6750_v49 = vld [vmem:[#allocation19 + $0x7e4] sm:$0xf0]  ;;  %v5588_v58 = vor.u32 %v6678_v11, %v5587_v48 }
 0x27b   :  { %2794 = vmatmul.bf16.vlgmr.msrb.gmra.mxu0 %v7622_v3  ;;  %v4915_v60 = vld [vmem:[#allocation19 + $0x48] sm:$0xf] }
 0x27c   :  { %v1170_v8 = vsel %vm1169_vm6, %v6917_v39, %v1166_v7  ;;  %2878 = vmatpush.bf16.msra.mxu3 %v5076_v1  ;;  %2890 = vmatpush.bf16.msrb.mxu0 %v5364_v2  ;;  %v1175_v18 = vsub.f32 1.5, %v1174_v51  ;;  %v1206_v39 = vperm.slane %v7604_v29, 3  ;;  %v5875_v29 = vld [vmem:[#allocation19 + $0x7c8] sm:$0xf] }
 0x27d   :  { %v1192_v17 = vmul.f32 %v1184_v52, %v1170_v8  ;;  %v5203_v61 = vld [vmem:[#allocation19 + $0x288] sm:$0xf]  ;;  %v5876_v56 = vor.u32 %v6750_v49, %v5875_v29 }
 0x27e   :  { %v1176_v26 = vmul.f32 %v6919_v54, %v1175_v18  ;;  %v6582_v52 = vld [vmem:[#allocation19 + $0x2a4] sm:$0xf0]  ;;  %v5109_v18 = vld [vmem:[#allocation19 + $0x1e8] sm:$0xf0] }
 0x27f   :  { %v1196_v25 = vperm.slane %v1192_v17, 0  ;;  %v5555_v63 = vld [vmem:[#allocation19 + $0x548] sm:$0xf]  ;;  %v5204_v4 = vor.u32 %v6582_v52, %v5203_v61  ;;  %v6554_v17 = vld [vmem:[#allocation19 + $0x1cc] sm:$0xf] }
 0x280   :  { %2879 = vmatpush.bf16.msra.mxu3 %v5044_v9  ;;  %2891 = vmatpush.bf16.msrb.mxu0 %v5332_v10  ;;  %v1180_v31 = vsel %vm1179_vm9, %v6919_v54, %v1176_v26  ;;  %v6510_v54 = vld [vmem:[#allocation19 + $0x64] sm:$0xf0]  ;;  %v6602_v61 = vld [vmem:[#allocation19 + $0x34c] sm:$0xf] }
 0x281   :  { %v1200_v30 = vmul.f32 %v1196_v25, %v7577_v20  ;;  %v1193_v36 = vmul.f32 %v1185_v23, %v1180_v31  ;;  %v6518_v20 = vld [vmem:[#allocation19 + $0xa4] sm:$0xf0]  ;;  %v4916_v34 = vor.u32 %v6510_v54, %v4915_v60  ;;  %v6530_v60 = vld [vmem:[#allocation19 + $0x10c] sm:$0xf] }
 0x282   :  { %v4948_v53 = vor.u32 %v6518_v20, %v4947_v45  ;;  %v6670_v0 = vld [vmem:[#allocation19 + $0x564] sm:$0xf0]  ;;  %v6538_v20 = vld [vmem:[#allocation19 + $0x14c] sm:$0xf] }
 0x283   :  { %v1213_v15 = vadd.f32 %v1205_v22, %v1200_v30  ;;  %v1197_v38 = vperm.slane %v1193_v36, 0  ;;  %v5843_v1 = vld [vmem:[#allocation19 + $0x788] sm:$0xf]  ;;  %v5556_v5 = vor.u32 %v6670_v0, %v5555_v63  ;;  %v5365_v36 = vld [vmem:[#allocation19 + $0x3e8] sm:$0xf0]  ;;  %v5048_v29 = vor.u32 %v6538_v20, %v5045_v46 }
 0x284   :  { %2880 = vmatpush.bf16.msra.mxu3 %v5012_v27  ;;  %2892 = vmatpush.bf16.msrb.mxu0 %v5300_v28  ;;  %v6742_v2 = vld [vmem:[#allocation19 + $0x7a4] sm:$0xf0]  ;;  %v5112_v27 = vor.u32 %v6554_v17, %v5109_v18  ;;  %v5013_v54 = vld [vmem:[#allocation19 + $0x128] sm:$0xf0] }
 0x285   :  { %v7631_v43 = vpack.c.bf16 %v1213_v15, %v1213_v15  ;;  %v1201_v47 = vmul.f32 %v1197_v38, %v7587_v37  ;;  %v4883_v16 = vld [vmem:[#allocation19 + $0x8] sm:$0xf]  ;;  %v5844_v8 = vor.u32 %v6742_v2, %v5843_v1  ;;  %v5080_v38 = vor.u32 %v6546_v62, %v5077_v32  ;;  %v6498_v20 = vld [vmem:[#allocation19 + $0xc] sm:$0xf] }
 0x286   :  { %v6502_v6 = vld [vmem:[#allocation19 + $0x24] sm:$0xf0]  ;;  %v5016_v1 = vor.u32 %v6530_v60, %v5013_v54  ;;  %v6559_v60 = vld [vmem:[#allocation19 + $0x1ec] sm:$0xf0] }
 0x287   :  { %2807 = vmatmul.bf16.vlgmr.msrb.gmra.mxu1 %v7631_v43  ;;  %2833 = vmatmul.bf16.vlgmr.msrb.gmra.mxu3 %v7616_v50  ;;  %v1214_v14 = vadd.f32 %v1206_v39, %v1201_v47  ;;  %v5171_v7 = vld [vmem:[#allocation19 + $0x248] sm:$0xf]  ;;  %v4884_v19 = vor.u32 %v6502_v6, %v4883_v16  ;;  %v6610_v47 = vld [vmem:[#allocation19 + $0x38c] sm:$0xf] }
 0x288   :  { %2881 = vmatpush.bf16.msra.mxu3 %v4980_v57  ;;  %2893 = vmatpush.bf16.msrb.mxu0 %v5268_v41  ;;  %v6574_v51 = vld [vmem:[#allocation19 + $0x264] sm:$0xf0]  ;;  %v4981_v6 = vld [vmem:[#allocation19 + $0xe8] sm:$0xf0] }
 0x289   :  { %2903 = vmatpush.bf16.msrb.mxu1 %v5620_v44  ;;  %v7636_v37 = vpack.c.bf16 %v1214_v14, %v1214_v14  ;;  %v5523_v9 = vld [vmem:[#allocation19 + $0x508] sm:$0xf]  ;;  %v5172_v21 = vor.u32 %v6574_v51, %v5171_v7  ;;  %v5368_v44 = vor.u32 %v6618_v33, %v5365_v36  ;;  %v6594_v7 = vld [vmem:[#allocation19 + $0x30c] sm:$0xf] }
 0x28a   :  { %v6662_v10 = vld [vmem:[#allocation19 + $0x524] sm:$0xf0]  ;;  %v5269_v51 = vld [vmem:[#allocation19 + $0x328] sm:$0xf0] }
 0x28b   :  { %2846 = vmatmul.bf16.vlgmr.msra.gmra.mxu0 %v7622_v3  ;;  %2820 = vmatmul.bf16.vlgmr.msrb.gmra.mxu2 %v7636_v37  ;;  %v5811_v12 = vld [vmem:[#allocation19 + $0x748] sm:$0xf]  ;;  %v5524_v23 = vor.u32 %v6662_v10, %v5523_v9  ;;  %v5621_v9 = vld [vmem:[#allocation19 + $0x5e8] sm:$0xf0] }
 0x28c   :  { %2882 = vmatpush.bf16.msra.mxu3 %v4948_v53  ;;  %2894 = vmatpush.bf16.msrb.mxu0 %v5236_v55  ;;  %v6734_v13 = vld [vmem:[#allocation19 + $0x764] sm:$0xf0]  ;;  %v5336_v55 = vor.u32 %v6610_v47, %v5333_v40  ;;  %v6506_v36 = vld [vmem:[#allocation19 + $0x4c] sm:$0xf] }
 0x28d   :  { %2904 = vmatpush.bf16.msrb.mxu1 %v5588_v58  ;;  %2916 = vmatpush.bf16.msrb.mxu2 %v5876_v56  ;;  %v5139_v25 = vld [vmem:[#allocation19 + $0x208] sm:$0xf]  ;;  %v5812_v26 = vor.u32 %v6734_v13, %v5811_v12  ;;  %v5301_v56 = vld [vmem:[#allocation19 + $0x368] sm:$0xf0] }
 0x28e   :  { %v6566_v22 = vld [vmem:[#allocation19 + $0x224] sm:$0xf0]  ;;  %v4885_v40 = vld [vmem:[#allocation19 + $0x28] sm:$0xf0] }
 0x28f   :  { %v5491_v28 = vld [vmem:[#allocation19 + $0x4c8] sm:$0xf]  ;;  %v5140_v42 = vor.u32 %v6566_v22, %v5139_v25  ;;  %v4949_v25 = vld [vmem:[#allocation19 + $0xa8] sm:$0xf0]  ;;  %v4888_v54 = vor.u32 %v6498_v20, %v4885_v40  ;;  %v6527_v40 = vld [vmem:[#allocation19 + $0xec] sm:$0xf0] }
 0x290   :  { %2883 = vmatpush.bf16.msra.mxu3 %v4916_v34  ;;  %2895 = vmatpush.bf16.msrb.mxu0 %v5204_v4  ;;  %v6654_v59 = vld [vmem:[#allocation19 + $0x4e4] sm:$0xf0]  ;;  %v5304_v4 = vor.u32 %v6602_v61, %v5301_v56  ;;  %v6586_v22 = vld [vmem:[#allocation19 + $0x2cc] sm:$0xf] }
 0x291   :  { %2905 = vmatpush.bf16.msrb.mxu1 %v5556_v5  ;;  %2917 = vmatpush.bf16.msrb.mxu2 %v5844_v8  ;;  %v5779_v30 = vld [vmem:[#allocation19 + $0x708] sm:$0xf]  ;;  %v5492_v24 = vor.u32 %v6654_v59, %v5491_v28  ;;  %v6522_v5 = vld [vmem:[#allocation19 + $0xcc] sm:$0xf] }
 0x292   :  { %v6726_v31 = vld [vmem:[#allocation19 + $0x724] sm:$0xf0]  ;;  %v6682_v8 = vld [vmem:[#allocation19 + $0x5cc] sm:$0xf]  ;;  %v4984_v13 = vor.u32 %v6522_v5, %v4981_v6  ;;  %v5083_v5 = vld [vmem:[#allocation19 + $0x190] sm:$0xf] }
 0x293   :  { %v5780_v15 = vor.u32 %v6726_v31, %v5779_v30  ;;  %v5459_v39 = vld [vmem:[#allocation19 + $0x488] sm:$0xf]  ;;  %v5589_v28 = vld [vmem:[#allocation19 + $0x5a8] sm:$0xf0]  ;;  %v6551_v6 = vld [vmem:[#allocation19 + $0x1ac] sm:$0xf0] }
 0x294   :  { %2884 = vmatpush.bf16.msra.mxu3 %v4884_v19  ;;  %2896 = vmatpush.bf16.msrb.mxu0 %v5172_v21  ;;  %v6646_v57 = vld [vmem:[#allocation19 + $0x4a4] sm:$0xf0]  ;;  %v5272_v19 = vor.u32 %v6594_v7, %v5269_v51  ;;  %v5624_v21 = vor.u32 %v6682_v8, %v5621_v9  ;;  %v6746_v59 = vld [vmem:[#allocation19 + $0x7cc] sm:$0xf]  ;;  %v5371_v7 = vld [vmem:[#allocation19 + $0x3d0] sm:$0xf] }
 0x295   :  { %2906 = vmatpush.bf16.msrb.mxu1 %v5524_v23  ;;  %2918 = vmatpush.bf16.msrb.mxu2 %v5812_v26  ;;  %v5747_v41 = vld [vmem:[#allocation19 + $0x6c8] sm:$0xf]  ;;  %v5460_v48 = vor.u32 %v6646_v57, %v5459_v39  ;;  %v6514_v23 = vld [vmem:[#allocation19 + $0x8c] sm:$0xf]  ;;  %v6623_v51 = vld [vmem:[#allocation19 + $0x3ec] sm:$0xf0] }
 0x296   :  { %v6718_v45 = vld [vmem:[#allocation19 + $0x6e4] sm:$0xf0]  ;;  %v5237_v26 = vld [vmem:[#allocation19 + $0x2e8] sm:$0xf0]  ;;  %v4952_v62 = vor.u32 %v6514_v23, %v4949_v25  ;;  %v5051_v23 = vld [vmem:[#allocation19 + $0x150] sm:$0xf] }
 0x297   :  { %2859 = vmatmul.bf16.vlgmr.msra.gmra.mxu1 %v7631_v43  ;;  %2885 = vmatmul.bf16.vlgmr.msra.gmra.mxu3 %v7616_v50  ;;  %v5748_v11 = vor.u32 %v6718_v45, %v5747_v41  ;;  %v5427_v49 = vld [vmem:[#allocation19 + $0x448] sm:$0xf]  ;;  %v5877_v30 = vld [vmem:[#allocation19 + $0x7e8] sm:$0xf0]  ;;  %v5240_v32 = vor.u32 %v6586_v22, %v5237_v26  ;;  %v6543_v25 = vld [vmem:[#allocation19 + $0x16c] sm:$0xf0] }
 0x298   :  { %2929 = vmatpush.bf16.msrb.mxu3 %v5112_v27  ;;  %2897 = vmatpush.bf16.msrb.mxu0 %v5140_v42  ;;  %v6638_v14 = vld [vmem:[#allocation19 + $0x464] sm:$0xf0]  ;;  %v6674_v27 = vld [vmem:[#allocation19 + $0x58c] sm:$0xf]  ;;  %v5339_v22 = vld [vmem:[#allocation19 + $0x390] sm:$0xf] }
 0x299   :  { %2907 = vmatpush.bf16.msrb.mxu1 %v5492_v24  ;;  %2919 = vmatpush.bf16.msrb.mxu2 %v5780_v15  ;;  %v5715_v53 = vld [vmem:[#allocation19 + $0x688] sm:$0xf]  ;;  %v5428_v52 = vor.u32 %v6638_v14, %v5427_v49  ;;  %v5592_v33 = vor.u32 %v6674_v27, %v5589_v28  ;;  %v4917_v42 = vld [vmem:[#allocation19 + $0x68] sm:$0xf0]  ;;  %v5880_v15 = vor.u32 %v6746_v59, %v5877_v30  ;;  %v6615_v26 = vld [vmem:[#allocation19 + $0x3ac] sm:$0xf0] }
 0x29a   :  { %v6710_v58 = vld [vmem:[#allocation19 + $0x6a4] sm:$0xf0]  ;;  %v6578_v24 = vld [vmem:[#allocation19 + $0x28c] sm:$0xf]  ;;  %v4920_v45 = vor.u32 %v6506_v36, %v4917_v42  ;;  %v5052_v59 = vor.u32 %v6543_v25, %v5051_v23  ;;  %v5019_v36 = vld [vmem:[#allocation19 + $0x110] sm:$0xf] }
 0x29b   :  { %2872 = vmatmul.bf16.vlgmr.msra.gmra.mxu2 %v7636_v37  ;;  %2898 = vmatmul.bf16.vlgmr.msrb.gmra.mxu0 %v7622_v3  ;;  %v5395_v63 = vld [vmem:[#allocation19 + $0x408] sm:$0xf]  ;;  %v5716_v0 = vor.u32 %v6710_v58, %v5715_v53  ;;  %v6666_v39 = vld [vmem:[#allocation19 + $0x54c] sm:$0xf]  ;;  %v5115_v58 = vld [vmem:[#allocation19 + $0x1d0] sm:$0xf] }
 0x29c   :  { %2930 = vmatpush.bf16.msrb.mxu3 %v5080_v38  ;;  %2942 = vmatpush.bf16.msra.mxu0 %v5368_v44  ;;  %v6630_v2 = vld [vmem:[#allocation19 + $0x424] sm:$0xf0]  ;;  %v5205_v38 = vld [vmem:[#allocation19 + $0x2a8] sm:$0xf0]  ;;  %v6535_v42 = vld [vmem:[#allocation19 + $0x12c] sm:$0xf0] }
 0x29d   :  { %2908 = vmatpush.bf16.msrb.mxu1 %v5460_v48  ;;  %2920 = vmatpush.bf16.msrb.mxu2 %v5748_v11  ;;  %v5683_v34 = vld [vmem:[#allocation19 + $0x648] sm:$0xf]  ;;  %v5396_v10 = vor.u32 %v6630_v2, %v5395_v63  ;;  %v5557_v57 = vld [vmem:[#allocation19 + $0x568] sm:$0xf0]  ;;  %v5208_v46 = vor.u32 %v6578_v24, %v5205_v38  ;;  %v5307_v24 = vld [vmem:[#allocation19 + $0x350] sm:$0xf] }
 0x29e   :  { %v6702_v16 = vld [vmem:[#allocation19 + $0x664] sm:$0xf0]  ;;  %v6738_v41 = vld [vmem:[#allocation19 + $0x78c] sm:$0xf]  ;;  %v5560_v47 = vor.u32 %v6666_v39, %v5557_v57  ;;  %v4891_v23 = vld [vmem:[#allocation19 + $0x10] sm:$0xf] }
 0x29f   :  { %v5684_v12 = vor.u32 %v6702_v16, %v5683_v34  ;;  %v5651_v17 = vld [vmem:[#allocation19 + $0x608] sm:$0xf]  ;;  %v5845_v44 = vld [vmem:[#allocation19 + $0x7a8] sm:$0xf0] }
 0x2a0   :  { %2931 = vmatpush.bf16.msrb.mxu3 %v5048_v29  ;;  %2943 = vmatpush.bf16.msra.mxu0 %v5336_v55  ;;  %v6694_v18 = vld [vmem:[#allocation19 + $0x624] sm:$0xf0]  ;;  %v6570_v48 = vld [vmem:[#allocation19 + $0x24c] sm:$0xf]  ;;  %v5848_v29 = vor.u32 %v6738_v41, %v5845_v44  ;;  %v5020_v41 = vor.u32 %v6535_v42, %v5019_v36  ;;  %v5117_v36 = vld [vmem:[#allocation19 + $0x1f0] sm:$0xf0] }
 0x2a1   :  { %2909 = vmatpush.bf16.msrb.mxu1 %v5428_v52  ;;  %2921 = vmatpush.bf16.msrb.mxu2 %v5716_v0  ;;  %v5652_v31 = vor.u32 %v6694_v18, %v5651_v17  ;;  %v5173_v11 = vld [vmem:[#allocation19 + $0x268] sm:$0xf0] }
 0x2a2   :  { %v6658_v49 = vld [vmem:[#allocation19 + $0x50c] sm:$0xf]  ;;  %v5176_v61 = vor.u32 %v6570_v48, %v5173_v11  ;;  %v5275_v48 = vld [vmem:[#allocation19 + $0x310] sm:$0xf] }
 0x2a3   :  { %v5525_v14 = vld [vmem:[#allocation19 + $0x528] sm:$0xf0]  ;;  %v6599_v11 = vld [vmem:[#allocation19 + $0x32c] sm:$0xf0] }
 0x2a4   :  { %2932 = vmatpush.bf16.msrb.mxu3 %v5016_v1  ;;  %2944 = vmatpush.bf16.msra.mxu0 %v5304_v4  ;;  %v6730_v53 = vld [vmem:[#allocation19 + $0x74c] sm:$0xf]  ;;  %v5528_v56 = vor.u32 %v6658_v49, %v5525_v14  ;;  %v5116_v1 = vor.u32 %v6559_v60, %v5115_v58  ;;  %v6687_v49 = vld [vmem:[#allocation19 + $0x5ec] sm:$0xf0] }
 0x2a5   :  { %2910 = vmatpush.bf16.msrb.mxu1 %v5396_v10  ;;  %2922 = vmatpush.bf16.msrb.mxu2 %v5684_v12  ;;  %v5813_v55 = vld [vmem:[#allocation19 + $0x768] sm:$0xf0]  ;;  %v5084_v12 = vor.u32 %v6551_v6, %v5083_v5 }
 0x2a6   :  { %v6562_v52 = vld [vmem:[#allocation19 + $0x20c] sm:$0xf]  ;;  %v5816_v0 = vor.u32 %v6730_v53, %v5813_v55 }
 0x2a7   :  { %v5141_v63 = vld [vmem:[#allocation19 + $0x228] sm:$0xf0] }
 0x2a8   :  { %2933 = vmatpush.bf16.msrb.mxu3 %v4984_v13  ;;  %2945 = vmatpush.bf16.msra.mxu0 %v5272_v19  ;;  %v6650_v2 = vld [vmem:[#allocation19 + $0x4cc] sm:$0xf]  ;;  %v5144_v8 = vor.u32 %v6562_v52, %v5141_v63  ;;  %v5372_v19 = vor.u32 %v6623_v51, %v5371_v7  ;;  %v6519_v52 = vld [vmem:[#allocation19 + $0xac] sm:$0xf0] }
 0x2a9   :  { %2955 = vmatpush.bf16.msra.mxu1 %v5624_v21  ;;  %2923 = vmatpush.bf16.msrb.mxu2 %v5652_v31  ;;  %v5493_v34 = vld [vmem:[#allocation19 + $0x4e8] sm:$0xf0]  ;;  %v5243_v63 = vld [vmem:[#allocation19 + $0x2d0] sm:$0xf] }
 0x2aa   :  { %2911 = vmatmul.bf16.vlgmr.msrb.gmra.mxu1 %v7631_v43  ;;  %v6722_v16 = vld [vmem:[#allocation19 + $0x70c] sm:$0xf]  ;;  %v5496_v9 = vor.u32 %v6650_v2, %v5493_v34  ;;  %v6679_v2 = vld [vmem:[#allocation19 + $0x5ac] sm:$0xf0] }
 0x2ab   :  { %v5781_v4 = vld [vmem:[#allocation19 + $0x728] sm:$0xf0]  ;;  %v5883_v34 = vld [vmem:[#allocation19 + $0x7d0] sm:$0xf] }
 0x2ac   :  { %2934 = vmatpush.bf16.msrb.mxu3 %v4952_v62  ;;  %2946 = vmatpush.bf16.msra.mxu0 %v5240_v32  ;;  %v5784_v10 = vor.u32 %v6722_v16, %v5781_v4  ;;  %v6642_v13 = vld [vmem:[#allocation19 + $0x48c] sm:$0xf]  ;;  %v5340_v32 = vor.u32 %v6615_v26, %v5339_v22  ;;  %v6751_v16 = vld [vmem:[#allocation19 + $0x7ec] sm:$0xf0] }
 0x2ad   :  { %2956 = vmatpush.bf16.msra.mxu1 %v5592_v33  ;;  %2968 = vmatpush.bf16.msra.mxu2 %v5880_v15  ;;  %v5461_v17 = vld [vmem:[#allocation19 + $0x4a8] sm:$0xf0]  ;;  %v6607_v15 = vld [vmem:[#allocation19 + $0x36c] sm:$0xf0] }
 0x2ae   :  { %2924 = vmatmul.bf16.vlgmr.msrb.gmra.mxu2 %v7636_v37  ;;  %v6714_v18 = vld [vmem:[#allocation19 + $0x6cc] sm:$0xf]  ;;  %v5464_v27 = vor.u32 %v6642_v13, %v5461_v17  ;;  %v4923_v51 = vld [vmem:[#allocation19 + $0x50] sm:$0xf] }
 0x2af   :  { %v5749_v21 = vld [vmem:[#allocation19 + $0x6e8] sm:$0xf0]  ;;  %v5563_v13 = vld [vmem:[#allocation19 + $0x550] sm:$0xf] }
 0x2b0   :  { %2935 = vmatpush.bf16.msrb.mxu3 %v4920_v45  ;;  %2947 = vmatpush.bf16.msra.mxu0 %v5208_v46  ;;  %v5752_v28 = vor.u32 %v6714_v18, %v5749_v21  ;;  %v6634_v30 = vld [vmem:[#allocation19 + $0x44c] sm:$0xf]  ;;  %v5308_v46 = vor.u32 %v6607_v15, %v5307_v24  ;;  %v6671_v17 = vld [vmem:[#allocation19 + $0x56c] sm:$0xf0] }
 0x2b1   :  { %2957 = vmatpush.bf16.msra.mxu1 %v5560_v47  ;;  %2969 = vmatpush.bf16.msra.mxu2 %v5848_v29  ;;  %v5429_v31 = vld [vmem:[#allocation19 + $0x468] sm:$0xf0]  ;;  %v4987_v47 = vld [vmem:[#allocation19 + $0xd0] sm:$0xf]  ;;  %v5564_v22 = vor.u32 %v6671_v17, %v5563_v13 }
 0x2b2   :  { %v6706_v62 = vld [vmem:[#allocation19 + $0x68c] sm:$0xf]  ;;  %v5432_v38 = vor.u32 %v6634_v30, %v5429_v31  ;;  %v5627_v29 = vld [vmem:[#allocation19 + $0x5d0] sm:$0xf]  ;;  %v4988_v55 = vor.u32 %v6527_v40, %v4987_v47  ;;  %v6547_v47 = vld [vmem:[#allocation19 + $0x194] sm:$0xf] }
 0x2b3   :  { %v5717_v33 = vld [vmem:[#allocation19 + $0x6a8] sm:$0xf0]  ;;  %v5851_v18 = vld [vmem:[#allocation19 + $0x790] sm:$0xf]  ;;  %v5085_v40 = vld [vmem:[#allocation19 + $0x1b0] sm:$0xf0] }
 0x2b4   :  { %2936 = vmatpush.bf16.msrb.mxu3 %v4888_v54  ;;  %2948 = vmatpush.bf16.msra.mxu0 %v5176_v61  ;;  %v6626_v39 = vld [vmem:[#allocation19 + $0x40c] sm:$0xf]  ;;  %v5720_v57 = vor.u32 %v6706_v62, %v5717_v33  ;;  %v5276_v54 = vor.u32 %v6599_v11, %v5275_v48  ;;  %v5628_v61 = vor.u32 %v6687_v49, %v5627_v29  ;;  %v6503_v26 = vld [vmem:[#allocation19 + $0x2c] sm:$0xf0]  ;;  %v6555_v33 = vld [vmem:[#allocation19 + $0x1d4] sm:$0xf] }
 0x2b5   :  { %2958 = vmatpush.bf16.msra.mxu1 %v5528_v56  ;;  %2970 = vmatpush.bf16.msra.mxu2 %v5816_v0  ;;  %v5397_v44 = vld [vmem:[#allocation19 + $0x428] sm:$0xf0]  ;;  %v4955_v56 = vld [vmem:[#allocation19 + $0x90] sm:$0xf]  ;;  %v4892_v42 = vor.u32 %v6503_v26, %v4891_v23  ;;  %v6619_v48 = vld [vmem:[#allocation19 + $0x3d4] sm:$0xf] }
 0x2b6   :  { %v6698_v45 = vld [vmem:[#allocation19 + $0x64c] sm:$0xf]  ;;  %v5400_v14 = vor.u32 %v6626_v39, %v5397_v44  ;;  %v6591_v0 = vld [vmem:[#allocation19 + $0x2ec] sm:$0xf0]  ;;  %v4956_v5 = vor.u32 %v6519_v52, %v4955_v56  ;;  %v5373_v11 = vld [vmem:[#allocation19 + $0x3f0] sm:$0xf0] }
 0x2b7   :  { %2937 = vmatmul.bf16.vlgmr.msrb.gmra.mxu3 %v7616_v50  ;;  %v5685_v20 = vld [vmem:[#allocation19 + $0x668] sm:$0xf0]  ;;  %v5244_v6 = vor.u32 %v6591_v0, %v5243_v63  ;;  %v5531_v30 = vld [vmem:[#allocation19 + $0x510] sm:$0xf]  ;;  %v6539_v56 = vld [vmem:[#allocation19 + $0x154] sm:$0xf] }
 0x2b8   :  { %2981 = vmatpush.bf16.msra.mxu3 %v5116_v1  ;;  %2949 = vmatpush.bf16.msra.mxu0 %v5144_v8  ;;  %v5688_v53 = vor.u32 %v6698_v45, %v5685_v20  ;;  %v6690_v58 = vld [vmem:[#allocation19 + $0x60c] sm:$0xf]  ;;  %v5595_v1 = vld [vmem:[#allocation19 + $0x590] sm:$0xf]  ;;  %v5053_v52 = vld [vmem:[#allocation19 + $0x170] sm:$0xf0] }
 0x2b9   :  { %2959 = vmatpush.bf16.msra.mxu1 %v5496_v9  ;;  %2971 = vmatpush.bf16.msra.mxu2 %v5784_v10  ;;  %v5653_v60 = vld [vmem:[#allocation19 + $0x628] sm:$0xf0]  ;;  %v5596_v7 = vor.u32 %v6679_v2, %v5595_v1  ;;  %v6511_v8 = vld [vmem:[#allocation19 + $0x6c] sm:$0xf0]  ;;  %v5884_v10 = vor.u32 %v6751_v16, %v5883_v34  ;;  %v6611_v63 = vld [vmem:[#allocation19 + $0x394] sm:$0xf]  ;;  %v5056_v34 = vor.u32 %v6539_v56, %v5053_v52 }
 0x2ba   :  { %v5656_v4 = vor.u32 %v6690_v58, %v5653_v60  ;;  %v5211_v9 = vld [vmem:[#allocation19 + $0x290] sm:$0xf]  ;;  %v4924_v21 = vor.u32 %v6511_v8, %v4923_v51  ;;  %v5341_v0 = vld [vmem:[#allocation19 + $0x3b0] sm:$0xf0] }
 0x2bb   :  { %2950 = vmatmul.bf16.vlgmr.msra.gmra.mxu0 %v7622_v3  ;;  %v6663_v31 = vld [vmem:[#allocation19 + $0x52c] sm:$0xf0]  ;;  %v6531_v51 = vld [vmem:[#allocation19 + $0x114] sm:$0xf] }
 0x2bc   :  { %2982 = vmatpush.bf16.msra.mxu3 %v5084_v12  ;;  %2994 = vmatpush.bf16.msrb.mxu0 %v5372_v19  ;;  %v6583_v12 = vld [vmem:[#allocation19 + $0x2ac] sm:$0xf0]  ;;  %v5532_v15 = vor.u32 %v6663_v31, %v5531_v30  ;;  %v5021_v8 = vld [vmem:[#allocation19 + $0x130] sm:$0xf0] }
 0x2bd   :  { %2960 = vmatpush.bf16.msra.mxu1 %v5464_v27  ;;  %2972 = vmatpush.bf16.msra.mxu2 %v5752_v28  ;;  %v6743_v19 = vld [vmem:[#allocation19 + $0x7ac] sm:$0xf0]  ;;  %v5212_v25 = vor.u32 %v6583_v12, %v5211_v9  ;;  %v6603_v9 = vld [vmem:[#allocation19 + $0x354] sm:$0xf] }
 0x2be   :  { %v5179_v27 = vld [vmem:[#allocation19 + $0x250] sm:$0xf]  ;;  %v4989_v26 = vld [vmem:[#allocation19 + $0xf0] sm:$0xf0] }
 0x2bf   :  { %v6575_v28 = vld [vmem:[#allocation19 + $0x26c] sm:$0xf0]  ;;  %v5629_v30 = vld [vmem:[#allocation19 + $0x5f0] sm:$0xf0] }
 0x2c0   :  { %2983 = vmatpush.bf16.msra.mxu3 %v5052_v59  ;;  %2995 = vmatpush.bf16.msrb.mxu0 %v5340_v32  ;;  %v5852_v59 = vor.u32 %v6743_v19, %v5851_v18  ;;  %v5819_v62 = vld [vmem:[#allocation19 + $0x750] sm:$0xf]  ;;  %v5180_v24 = vor.u32 %v6575_v28, %v5179_v27  ;;  %v5024_v18 = vor.u32 %v6531_v51, %v5021_v8  ;;  %v6595_v27 = vld [vmem:[#allocation19 + $0x314] sm:$0xf]  ;;  %v6560_v51 = vld [vmem:[#allocation19 + $0x1f4] sm:$0xf0] }
 0x2c1   :  { %2961 = vmatpush.bf16.msra.mxu1 %v5432_v38  ;;  %2973 = vmatpush.bf16.msra.mxu2 %v5720_v57  ;;  %v6735_v32 = vld [vmem:[#allocation19 + $0x76c] sm:$0xf0]  ;;  %v5277_v28 = vld [vmem:[#allocation19 + $0x330] sm:$0xf0] }
 0x2c2   :  { %v5147_v38 = vld [vmem:[#allocation19 + $0x210] sm:$0xf]  ;;  %v5820_v57 = vor.u32 %v6735_v32, %v5819_v62  ;;  %v6499_v56 = vld [vmem:[#allocation19 + $0x14] sm:$0xf] }
 0x2c3   :  { %v6567_v39 = vld [vmem:[#allocation19 + $0x22c] sm:$0xf0] }
 0x2c4   :  { %2984 = vmatpush.bf16.msra.mxu3 %v5020_v41  ;;  %2996 = vmatpush.bf16.msrb.mxu0 %v5308_v46  ;;  %v5120_v41 = vor.u32 %v6555_v33, %v5117_v36  ;;  %v5499_v44 = vld [vmem:[#allocation19 + $0x4d0] sm:$0xf]  ;;  %v5148_v29 = vor.u32 %v6567_v39, %v5147_v38  ;;  %v4957_v38 = vld [vmem:[#allocation19 + $0xb0] sm:$0xf0] }
 0x2c5   :  { %2962 = vmatpush.bf16.msra.mxu1 %v5400_v14  ;;  %2974 = vmatpush.bf16.msra.mxu2 %v5688_v53  ;;  %v6655_v45 = vld [vmem:[#allocation19 + $0x4ec] sm:$0xf0]  ;;  %v5088_v53 = vor.u32 %v6547_v47, %v5085_v40  ;;  %v6587_v39 = vld [vmem:[#allocation19 + $0x2d4] sm:$0xf] }
 0x2c6   :  { %v5787_v20 = vld [vmem:[#allocation19 + $0x710] sm:$0xf]  ;;  %v5500_v49 = vor.u32 %v6655_v45, %v5499_v44  ;;  %v5597_v44 = vld [vmem:[#allocation19 + $0x5b0] sm:$0xf0] }
 0x2c7   :  { %v6727_v46 = vld [vmem:[#allocation19 + $0x72c] sm:$0xf0]  ;;  %v6747_v45 = vld [vmem:[#allocation19 + $0x7d4] sm:$0xf] }
 0x2c8   :  { %2985 = vmatpush.bf16.msra.mxu3 %v4988_v55  ;;  %2997 = vmatpush.bf16.msrb.mxu0 %v5276_v54  ;;  %v5788_v14 = vor.u32 %v6727_v46, %v5787_v20  ;;  %v5467_v55 = vld [vmem:[#allocation19 + $0x490] sm:$0xf]  ;;  %v5376_v54 = vor.u32 %v6619_v48, %v5373_v11  ;;  %v5885_v20 = vld [vmem:[#allocation19 + $0x7f0] sm:$0xf0] }
 0x2c9   :  { %3007 = vmatpush.bf16.msrb.mxu1 %v5628_v61  ;;  %2975 = vmatpush.bf16.msra.mxu2 %v5656_v4  ;;  %v6647_v58 = vld [vmem:[#allocation19 + $0x4ac] sm:$0xf0]  ;;  %v6507_v11 = vld [vmem:[#allocation19 + $0x54] sm:$0xf] }
 0x2ca   :  { %2963 = vmatmul.bf16.vlgmr.msra.gmra.mxu1 %v7631_v43  ;;  %v5755_v60 = vld [vmem:[#allocation19 + $0x6d0] sm:$0xf]  ;;  %v5468_v1 = vor.u32 %v6647_v58, %v5467_v55  ;;  %v6667_v55 = vld [vmem:[#allocation19 + $0x554] sm:$0xf] }
 0x2cb   :  { %v6719_v61 = vld [vmem:[#allocation19 + $0x6ec] sm:$0xf0]  ;;  %v5565_v58 = vld [vmem:[#allocation19 + $0x570] sm:$0xf0] }
 0x2cc   :  { %2986 = vmatpush.bf16.msra.mxu3 %v4956_v5  ;;  %2998 = vmatpush.bf16.msrb.mxu0 %v5244_v6  ;;  %v5756_v2 = vor.u32 %v6719_v61, %v5755_v60  ;;  %v5435_v16 = vld [vmem:[#allocation19 + $0x450] sm:$0xf]  ;;  %v5344_v6 = vor.u32 %v6611_v63, %v5341_v0  ;;  %v6739_v60 = vld [vmem:[#allocation19 + $0x794] sm:$0xf]  ;;  %v5568_v63 = vor.u32 %v6667_v55, %v5565_v58 }
 0x2cd   :  { %3008 = vmatpush.bf16.msrb.mxu1 %v5596_v7  ;;  %3020 = vmatpush.bf16.msrb.mxu2 %v5884_v10  ;;  %v6639_v4 = vld [vmem:[#allocation19 + $0x46c] sm:$0xf0]  ;;  %v5309_v10 = vld [vmem:[#allocation19 + $0x370] sm:$0xf0] }
 0x2ce   :  { %2976 = vmatmul.bf16.vlgmr.msra.gmra.mxu2 %v7636_v37  ;;  %v5723_v5 = vld [vmem:[#allocation19 + $0x690] sm:$0xf]  ;;  %v5436_v12 = vor.u32 %v6639_v4, %v5435_v16  ;;  %v4893_v0 = vld [vmem:[#allocation19 + $0x30] sm:$0xf0] }
 0x2cf   :  { %v6711_v7 = vld [vmem:[#allocation19 + $0x6ac] sm:$0xf0]  ;;  %v6659_v16 = vld [vmem:[#allocation19 + $0x514] sm:$0xf]  ;;  %v4896_v8 = vor.u32 %v6499_v56, %v4893_v0  ;;  %v4995_v0 = vld [vmem:[#allocation19 + $0xd8] sm:$0xf] }
 0x2d0   :  { %2987 = vmatpush.bf16.msra.mxu3 %v4924_v21  ;;  %2999 = vmatpush.bf16.msrb.mxu0 %v5212_v25  ;;  %v5403_v13 = vld [vmem:[#allocation19 + $0x410] sm:$0xf]  ;;  %v5724_v17 = vor.u32 %v6711_v7, %v5723_v5  ;;  %v5312_v25 = vor.u32 %v6603_v9, %v5309_v10  ;;  %v5533_v4 = vld [vmem:[#allocation19 + $0x530] sm:$0xf0]  ;;  %v5123_v7 = vld [vmem:[#allocation19 + $0x1d8] sm:$0xf] }
 0x2d1   :  { %3009 = vmatpush.bf16.msrb.mxu1 %v5564_v22  ;;  %3021 = vmatpush.bf16.msrb.mxu2 %v5852_v59  ;;  %v6631_v19 = vld [vmem:[#allocation19 + $0x42c] sm:$0xf0]  ;;  %v6523_v22 = vld [vmem:[#allocation19 + $0xd4] sm:$0xf]  ;;  %v5536_v10 = vor.u32 %v6659_v16, %v5533_v4  ;;  %v6600_v16 = vld [vmem:[#allocation19 + $0x334] sm:$0xf0] }
 0x2d2   :  { %v5691_v21 = vld [vmem:[#allocation19 + $0x650] sm:$0xf]  ;;  %v6683_v59 = vld [vmem:[#allocation19 + $0x5d4] sm:$0xf]  ;;  %v5404_v31 = vor.u32 %v6631_v19, %v5403_v13  ;;  %v4992_v32 = vor.u32 %v6523_v22, %v4989_v26  ;;  %v5091_v22 = vld [vmem:[#allocation19 + $0x198] sm:$0xf] }
 0x2d3   :  { %v6703_v23 = vld [vmem:[#allocation19 + $0x66c] sm:$0xf0]  ;;  %v6731_v5 = vld [vmem:[#allocation19 + $0x754] sm:$0xf]  ;;  %v6552_v26 = vld [vmem:[#allocation19 + $0x1b4] sm:$0xf0] }
 0x2d4   :  { %2988 = vmatpush.bf16.msra.mxu3 %v4892_v42  ;;  %3000 = vmatpush.bf16.msrb.mxu0 %v5180_v24  ;;  %v5692_v62 = vor.u32 %v6703_v23, %v5691_v21  ;;  %v5659_v33 = vld [vmem:[#allocation19 + $0x610] sm:$0xf]  ;;  %v5280_v42 = vor.u32 %v6595_v27, %v5277_v28  ;;  %v5632_v24 = vor.u32 %v6683_v59, %v5629_v30  ;;  %v5149_v13 = vld [vmem:[#allocation19 + $0x230] sm:$0xf0]  ;;  %v5379_v27 = vld [vmem:[#allocation19 + $0x3d8] sm:$0xf] }
 0x2d5   :  { %3010 = vmatpush.bf16.msrb.mxu1 %v5532_v15  ;;  %3022 = vmatpush.bf16.msrb.mxu2 %v5820_v57  ;;  %v6695_v36 = vld [vmem:[#allocation19 + $0x62c] sm:$0xf0]  ;;  %v6515_v15 = vld [vmem:[#allocation19 + $0x94] sm:$0xf]  ;;  %v6624_v28 = vld [vmem:[#allocation19 + $0x3f4] sm:$0xf0] }
 0x2d6   :  { %v5245_v57 = vld [vmem:[#allocation19 + $0x2f0] sm:$0xf0]  ;;  %v5660_v46 = vor.u32 %v6695_v36, %v5659_v33  ;;  %v4960_v47 = vor.u32 %v6515_v15, %v4957_v38  ;;  %v5059_v15 = vld [vmem:[#allocation19 + $0x158] sm:$0xf] }
 0x2d7   :  { %2989 = vmatmul.bf16.vlgmr.msra.gmra.mxu3 %v7616_v50  ;;  %v5248_v40 = vor.u32 %v6587_v39, %v5245_v57  ;;  %v6651_v19 = vld [vmem:[#allocation19 + $0x4d4] sm:$0xf]  ;;  %v6544_v38 = vld [vmem:[#allocation19 + $0x174] sm:$0xf0] }
 0x2d8   :  { %3033 = vmatpush.bf16.msrb.mxu3 %v5120_v41  ;;  %3001 = vmatpush.bf16.msrb.mxu0 %v5148_v29  ;;  %v6675_v41 = vld [vmem:[#allocation19 + $0x594] sm:$0xf]  ;;  %v5347_v39 = vld [vmem:[#allocation19 + $0x398] sm:$0xf] }
 0x2d9   :  { %3011 = vmatpush.bf16.msrb.mxu1 %v5500_v49  ;;  %3023 = vmatpush.bf16.msrb.mxu2 %v5788_v14  ;;  %v5600_v48 = vor.u32 %v6675_v41, %v5597_v44  ;;  %v4925_v29 = vld [vmem:[#allocation19 + $0x70] sm:$0xf0]  ;;  %v5888_v14 = vor.u32 %v6747_v45, %v5885_v20  ;;  %v6616_v57 = vld [vmem:[#allocation19 + $0x3b4] sm:$0xf0]  ;;  %v5060_v45 = vor.u32 %v6544_v38, %v5059_v15 }
 0x2da   :  { %v6579_v49 = vld [vmem:[#allocation19 + $0x294] sm:$0xf]  ;;  %v4928_v61 = vor.u32 %v6507_v11, %v4925_v29  ;;  %v5027_v11 = vld [vmem:[#allocation19 + $0x118] sm:$0xf] }
 0x2db   :  { %3002 = vmatmul.bf16.vlgmr.msrb.gmra.mxu0 %v7622_v3  ;;  %v5501_v21 = vld [vmem:[#allocation19 + $0x4f0] sm:$0xf0]  ;;  %v6536_v29 = vld [vmem:[#allocation19 + $0x134] sm:$0xf0] }
 0x2dc   :  { %3034 = vmatpush.bf16.msrb.mxu3 %v5088_v53  ;;  %3046 = vmatpush.bf16.msra.mxu0 %v5376_v54  ;;  %v5213_v53 = vld [vmem:[#allocation19 + $0x2b0] sm:$0xf0]  ;;  %v5504_v30 = vor.u32 %v6651_v19, %v5501_v21  ;;  %v5635_v4 = vld [vmem:[#allocation19 + $0x5d8] sm:$0xf] }
 0x2dd   :  { %3012 = vmatpush.bf16.msrb.mxu1 %v5468_v1  ;;  %3024 = vmatpush.bf16.msrb.mxu2 %v5756_v2  ;;  %v5853_v54 = vld [vmem:[#allocation19 + $0x7b0] sm:$0xf0]  ;;  %v5216_v52 = vor.u32 %v6579_v49, %v5213_v53  ;;  %v5315_v49 = vld [vmem:[#allocation19 + $0x358] sm:$0xf] }
 0x2de   :  { %v6571_v1 = vld [vmem:[#allocation19 + $0x254] sm:$0xf]  ;;  %v6592_v19 = vld [vmem:[#allocation19 + $0x2f4] sm:$0xf0] }
 0x2df   :  { %v5181_v2 = vld [vmem:[#allocation19 + $0x270] sm:$0xf0]  ;;  %v5603_v21 = vld [vmem:[#allocation19 + $0x598] sm:$0xf] }
 0x2e0   :  { %3035 = vmatpush.bf16.msrb.mxu3 %v5056_v34  ;;  %3047 = vmatpush.bf16.msra.mxu0 %v5344_v6  ;;  %v5856_v34 = vor.u32 %v6739_v60, %v5853_v54  ;;  %v5821_v6 = vld [vmem:[#allocation19 + $0x770] sm:$0xf0]  ;;  %v5184_v9 = vor.u32 %v6571_v1, %v5181_v2  ;;  %v5028_v60 = vor.u32 %v6536_v29, %v5027_v11  ;;  %v6528_v1 = vld [vmem:[#allocation19 + $0xf4] sm:$0xf0] }
 0x2e1   :  { %3013 = vmatpush.bf16.msrb.mxu1 %v5436_v12  ;;  %3025 = vmatpush.bf16.msrb.mxu2 %v5724_v17  ;;  %v6563_v12 = vld [vmem:[#allocation19 + $0x214] sm:$0xf]  ;;  %v5824_v17 = vor.u32 %v6731_v5, %v5821_v6  ;;  %v5283_v2 = vld [vmem:[#allocation19 + $0x318] sm:$0xf] }
 0x2e2   :  { %v6723_v23 = vld [vmem:[#allocation19 + $0x714] sm:$0xf]  ;;  %v5152_v59 = vor.u32 %v6563_v12, %v5149_v13  ;;  %v6688_v5 = vld [vmem:[#allocation19 + $0x5f4] sm:$0xf0] }
 0x2e3   :  { %v5469_v33 = vld [vmem:[#allocation19 + $0x4b0] sm:$0xf0]  ;;  %v5636_v12 = vor.u32 %v6688_v5, %v5635_v4  ;;  %v4963_v13 = vld [vmem:[#allocation19 + $0x98] sm:$0xf] }
 0x2e4   :  { %3036 = vmatpush.bf16.msrb.mxu3 %v5024_v18  ;;  %3048 = vmatpush.bf16.msra.mxu0 %v5312_v25  ;;  %v5124_v18 = vor.u32 %v6560_v51, %v5123_v7  ;;  %v5789_v25 = vld [vmem:[#allocation19 + $0x730] sm:$0xf0]  ;;  %v4996_v51 = vor.u32 %v6528_v1, %v4995_v0  ;;  %v5571_v15 = vld [vmem:[#allocation19 + $0x558] sm:$0xf] }
 0x2e5   :  { %3014 = vmatpush.bf16.msrb.mxu1 %v5404_v31  ;;  %3026 = vmatpush.bf16.msrb.mxu2 %v5692_v62  ;;  %v5792_v31 = vor.u32 %v6723_v23, %v5789_v25  ;;  %v5092_v62 = vor.u32 %v6552_v26, %v5091_v22  ;;  %v6715_v36 = vld [vmem:[#allocation19 + $0x6d4] sm:$0xf]  ;;  %v6680_v23 = vld [vmem:[#allocation19 + $0x5b4] sm:$0xf0]  ;;  %v7663_v26 = vld [vmem:[%s7930_s12] sm:$0xff] }
 0x2e6   :  { %v6635_v20 = vld [vmem:[#allocation19 + $0x454] sm:$0xf]  ;;  %v5891_v25 = vld [vmem:[#allocation19 + $0x7d8] sm:$0xf] }
 0x2e7   :  { %v6627_v55 = vld [vmem:[#allocation19 + $0x414] sm:$0xf]  ;;  %v6752_v22 = vld [vmem:[#allocation19 + $0x7f4] sm:$0xf0] }
 0x2e8   :  { %3037 = vmatpush.bf16.msrb.mxu3 %v4992_v32  ;;  %3049 = vmatpush.bf16.msra.mxu0 %v5280_v42  ;;  %v6643_v32 = vld [vmem:[#allocation19 + $0x494] sm:$0xf]  ;;  %v5380_v42 = vor.u32 %v6624_v28, %v5379_v27  ;;  %v6672_v38 = vld [vmem:[#allocation19 + $0x574] sm:$0xf0] }
 0x2e9   :  { %3059 = vmatpush.bf16.msra.mxu1 %v5632_v24  ;;  %3027 = vmatpush.bf16.msrb.mxu2 %v5660_v46  ;;  %v5757_v24 = vld [vmem:[#allocation19 + $0x6f0] sm:$0xf0]  ;;  %v5472_v41 = vor.u32 %v6643_v32, %v5469_v33  ;;  %v6512_v32 = vld [vmem:[#allocation19 + $0x74] sm:$0xf0] }
 0x2ea   :  { %3015 = vmatmul.bf16.vlgmr.msrb.gmra.mxu1 %v7631_v43  ;;  %v5760_v44 = vor.u32 %v6715_v36, %v5757_v24  ;;  %v5437_v46 = vld [vmem:[#allocation19 + $0x470] sm:$0xf0]  ;;  %v5219_v33 = vld [vmem:[#allocation19 + $0x298] sm:$0xf]  ;;  %v5892_v36 = vor.u32 %v6752_v22, %v5891_v25 }
 0x2eb   :  { %v5440_v53 = vor.u32 %v6635_v20, %v5437_v46  ;;  %v6699_v56 = vld [vmem:[#allocation19 + $0x654] sm:$0xf]  ;;  %v6584_v24 = vld [vmem:[#allocation19 + $0x2b4] sm:$0xf0] }
 0x2ec   :  { %3038 = vmatpush.bf16.msrb.mxu3 %v4960_v47  ;;  %3050 = vmatpush.bf16.msra.mxu0 %v5248_v40  ;;  %v6707_v47 = vld [vmem:[#allocation19 + $0x694] sm:$0xf]  ;;  %v5348_v40 = vor.u32 %v6616_v57, %v5347_v39  ;;  %v5859_v39 = vld [vmem:[#allocation19 + $0x798] sm:$0xf]  ;;  %v5220_v46 = vor.u32 %v6584_v24, %v5219_v33 }
 0x2ed   :  { %3060 = vmatpush.bf16.msra.mxu1 %v5600_v48  ;;  %3072 = vmatpush.bf16.msra.mxu2 %v5888_v14  ;;  %v5725_v48 = vld [vmem:[#allocation19 + $0x6b0] sm:$0xf0]  ;;  %v6608_v14 = vld [vmem:[#allocation19 + $0x374] sm:$0xf0] }
 0x2ee   :  { %3028 = vmatmul.bf16.vlgmr.msrb.gmra.mxu2 %v7636_v37  ;;  %v5728_v58 = vor.u32 %v6707_v47, %v5725_v48  ;;  %v6744_v57 = vld [vmem:[#allocation19 + $0x7b4] sm:$0xf0]  ;;  %v5572_v47 = vor.u32 %v6672_v38, %v5571_v15 }
 0x2ef   :  { %v4899_v20 = vld [vmem:[#allocation19 + $0x18] sm:$0xf]  ;;  %v5860_v29 = vor.u32 %v6744_v57, %v5859_v39 }
 0x2f0   :  { %3039 = vmatpush.bf16.msrb.mxu3 %v4928_v61  ;;  %3051 = vmatpush.bf16.msra.mxu0 %v5216_v52  ;;  %v5405_v61 = vld [vmem:[#allocation19 + $0x430] sm:$0xf0]  ;;  %v5187_v48 = vld [vmem:[#allocation19 + $0x258] sm:$0xf] }
 0x2f1   :  { %3061 = vmatpush.bf16.msra.mxu1 %v5568_v63  ;;  %3073 = vmatpush.bf16.msra.mxu2 %v5856_v34  ;;  %v5693_v52 = vld [vmem:[#allocation19 + $0x670] sm:$0xf0]  ;;  %v5316_v63 = vor.u32 %v6608_v14, %v5315_v49  ;;  %v5408_v6 = vor.u32 %v6627_v55, %v5405_v61  ;;  %v6576_v11 = vld [vmem:[#allocation19 + $0x274] sm:$0xf0] }
 0x2f2   :  { %v5696_v7 = vor.u32 %v6699_v56, %v5693_v52  ;;  %v5539_v49 = vld [vmem:[#allocation19 + $0x518] sm:$0xf] }
 0x2f3   :  { %v6664_v14 = vld [vmem:[#allocation19 + $0x534] sm:$0xf0] }
 0x2f4   :  { %3040 = vmatpush.bf16.msrb.mxu3 %v4896_v8  ;;  %3052 = vmatpush.bf16.msra.mxu0 %v5184_v9  ;;  %v6691_v8 = vld [vmem:[#allocation19 + $0x614] sm:$0xf]  ;;  %v6736_v55 = vld [vmem:[#allocation19 + $0x774] sm:$0xf0]  ;;  %v5540_v0 = vor.u32 %v6664_v14, %v5539_v49  ;;  %v6604_v49 = vld [vmem:[#allocation19 + $0x35c] sm:$0xf] }
 0x2f5   :  { %3062 = vmatpush.bf16.msra.mxu1 %v5536_v10  ;;  %3074 = vmatpush.bf16.msra.mxu2 %v5824_v17  ;;  %v5661_v9 = vld [vmem:[#allocation19 + $0x630] sm:$0xf0]  ;;  %v5284_v10 = vor.u32 %v6600_v16, %v5283_v2  ;;  %v6520_v17 = vld [vmem:[#allocation19 + $0xb4] sm:$0xf0]  ;;  %v5317_v14 = vld [vmem:[#allocation19 + $0x378] sm:$0xf0] }
 0x2f6   :  { %v5664_v27 = vor.u32 %v6691_v8, %v5661_v9  ;;  %v4964_v28 = vor.u32 %v6520_v17, %v4963_v13  ;;  %v5155_v1 = vld [vmem:[#allocation19 + $0x218] sm:$0xf]  ;;  %v5093_v9 = vld [vmem:[#allocation19 + $0x1b8] sm:$0xf0] }
 0x2f7   :  { %3041 = vmatmul.bf16.vlgmr.msrb.gmra.mxu3 %v7616_v50  ;;  %v6568_v2 = vld [vmem:[#allocation19 + $0x234] sm:$0xf0]  ;;  %v6620_v13 = vld [vmem:[#allocation19 + $0x3dc] sm:$0xf] }
 0x2f8   :  { %3085 = vmatpush.bf16.msra.mxu3 %v5124_v18  ;;  %3053 = vmatpush.bf16.msra.mxu0 %v5152_v59  ;;  %v7656_v54 = vpop.f32.mrf.mxu0  ;;  %v5251_v18 = vld [vmem:[#allocation19 + $0x2d8] sm:$0xf]  ;;  %v5381_v17 = vld [vmem:[#allocation19 + $0x3f8] sm:$0xf0] }
 0x2f9   :  { %3063 = vmatpush.bf16.msra.mxu1 %v5504_v30  ;;  %3075 = vmatpush.bf16.msra.mxu2 %v5792_v31  ;;  %v5252_v30 = vor.u32 %v6592_v19, %v5251_v18  ;;  %v5604_v31 = vor.u32 %v6680_v23, %v5603_v21  ;;  %v6728_v8 = vld [vmem:[#allocation19 + $0x734] sm:$0xf0]  ;;  %v5156_v18 = vor.u32 %v6568_v2, %v5155_v1 }
 0x2fa   :  { %v7658_v34 = vpop.f32.mrf.mxu3  ;;  %v5475_v22 = vld [vmem:[#allocation19 + $0x498] sm:$0xf]  ;;  %v5320_v2 = vor.u32 %v6604_v49, %v5317_v14 }
 0x2fb   :  { %3054 = vmatmul.bf16.vlgmr.msra.gmra.mxu0 %v7622_v3  ;;  %v5443_v15 = vld [vmem:[#allocation19 + $0x458] sm:$0xf] }
 0x2fc   :  { %3086 = vmatpush.bf16.msra.mxu3 %v5092_v62  ;;  %3098 = vmatpush.bf16.msrb.mxu0 %v5380_v42  ;;  %v4931_v62 = vld [vmem:[#allocation19 + $0x58] sm:$0xf] }
 0x2fd   :  { %3064 = vmatpush.bf16.msra.mxu1 %v5472_v41  ;;  %3076 = vmatpush.bf16.msra.mxu2 %v5760_v44  ;;  %v1477_v41 = vperm.slane %v7663_v26, 0  ;;  %v4932_v44 = vor.u32 %v6512_v32, %v4931_v62  ;;  %v5061_v62 = vld [vmem:[#allocation19 + $0x178] sm:$0xf0]  ;;  %v6640_v38 = vld [vmem:[#allocation19 + $0x474] sm:$0xf0] }
 0x2ff   :  { %v2783_v61 = vadd.f32 %v7658_v34, %v1477_v41  ;;  %v6548_v34 = vld [vmem:[#allocation19 + $0x19c] sm:$0xf] }
 0x300   :  { %3087 = vmatpush.bf16.msra.mxu3 %v5060_v45  ;;  %3099 = vmatpush.bf16.msrb.mxu0 %v5348_v40  ;;  %v2797_v59 = vpop.f32.mrf.mxu0  ;;  %v6504_v40 = vld [vmem:[#allocation19 + $0x34] sm:$0xf0]  ;;  %v5096_v25 = vor.u32 %v6548_v34, %v5093_v9  ;;  %v6684_v34 = vld [vmem:[#allocation19 + $0x5dc] sm:$0xf] }
 0x301   :  { %3065 = vmatpush.bf16.msra.mxu1 %v5440_v53  ;;  %3077 = vmatpush.bf16.msra.mxu2 %v5728_v58  ;;  %v5827_v53 = vld [vmem:[#allocation19 + $0x758] sm:$0xf]  ;;  %v6556_v58 = vld [vmem:[#allocation19 + $0x1dc] sm:$0xf]  ;;  %v4900_v56 = vor.u32 %v6504_v40, %v4899_v20  ;;  %v5384_v59 = vor.u32 %v6620_v13, %v5381_v17 }
 0x302   :  { %v2784_v42 = vpop.f32.mrf.mxu3  ;;  %v5828_v16 = vor.u32 %v6736_v55, %v5827_v53  ;;  %v5029_v40 = vld [vmem:[#allocation19 + $0x138] sm:$0xf0]  ;;  %v5444_v55 = vor.u32 %v6640_v38, %v5443_v15 }
 0x303   :  { %v5349_v42 = vld [vmem:[#allocation19 + $0x3b8] sm:$0xf0] }
 0x304   :  { %3088 = vmatpush.bf16.msra.mxu3 %v5028_v60  ;;  %3100 = vmatpush.bf16.msrb.mxu0 %v5316_v63  ;;  %v2808_v45 = vpop.f32.mrf.mxu1  ;;  %v5125_v60 = vld [vmem:[#allocation19 + $0x1f8] sm:$0xf0]  ;;  %v5188_v63 = vor.u32 %v6576_v11, %v5187_v48  ;;  %v1478_v48 = vperm.slane %v7663_v26, 1 }
 0x305   :  { %3066 = vmatpush.bf16.msra.mxu1 %v5408_v6  ;;  %3078 = vmatpush.bf16.msra.mxu2 %v5696_v7  ;;  %v5128_v4 = vor.u32 %v6556_v58, %v5125_v60  ;;  %v5507_v6 = vld [vmem:[#allocation19 + $0x4d8] sm:$0xf]  ;;  %v5637_v9 = vld [vmem:[#allocation19 + $0x5f8] sm:$0xf0] }
 0x306   :  { %v6656_v7 = vld [vmem:[#allocation19 + $0x4f4] sm:$0xf0] }
 0x307   :  { %v5508_v19 = vor.u32 %v6656_v7, %v5507_v6  ;;  %v5411_v58 = vld [vmem:[#allocation19 + $0x418] sm:$0xf]  ;;  %v4997_v6 = vld [vmem:[#allocation19 + $0xf8] sm:$0xf0] }
 0x308   :  { %3089 = vmatpush.bf16.msra.mxu3 %v4996_v51  ;;  %3101 = vmatpush.bf16.msrb.mxu0 %v5284_v10  ;;  %v7669_v52 = vpop.f32.mrf.mxu0  ;;  %v5795_v51 = vld [vmem:[#allocation19 + $0x718] sm:$0xf]  ;;  %v2796_v10 = vadd.f32 %v7656_v54, %v2783_v61  ;;  %v6596_v7 = vld [vmem:[#allocation19 + $0x31c] sm:$0xf] }
 0x309   :  { %3111 = vmatpush.bf16.msrb.mxu1 %v5636_v12  ;;  %3079 = vmatpush.bf16.msra.mxu2 %v5664_v27  ;;  %v5796_v23 = vor.u32 %v6728_v8, %v5795_v51  ;;  %v6648_v27 = vld [vmem:[#allocation19 + $0x4b4] sm:$0xf0]  ;;  %v5285_v8 = vld [vmem:[#allocation19 + $0x338] sm:$0xf0] }
 0x30a   :  { %3067 = vmatmul.bf16.vlgmr.msra.gmra.mxu1 %v7631_v43  ;;  %v7671_v5 = vpop.f32.mrf.mxu3  ;;  %v2809_v21 = vadd.f32 %v2808_v45, %v2796_v10  ;;  %v5476_v24 = vor.u32 %v6648_v27, %v5475_v22  ;;  %v5731_v45 = vld [vmem:[#allocation19 + $0x698] sm:$0xf]  ;;  %v5288_v22 = vor.u32 %v6596_v7, %v5285_v8  ;;  %v6516_v27 = vld [vmem:[#allocation19 + $0x9c] sm:$0xf] }
 0x30b   :  { %v2835_v51 = vadd.f32 %v7671_v5, %v1478_v48  ;;  %v5640_v5 = vor.u32 %v6684_v34, %v5637_v9  ;;  %v6668_v48 = vld [vmem:[#allocation19 + $0x55c] sm:$0xf] }
 0x30c   :  { %3090 = vmatpush.bf16.msra.mxu3 %v4964_v28  ;;  %3102 = vmatpush.bf16.msrb.mxu0 %v5252_v30  ;;  %v2810_v12 = vpop.f32.mrf.mxu1  ;;  %v5763_v28 = vld [vmem:[#allocation19 + $0x6d8] sm:$0xf]  ;;  %v5541_v8 = vld [vmem:[#allocation19 + $0x538] sm:$0xf0] }
 0x30d   :  { %3112 = vmatpush.bf16.msrb.mxu1 %v5604_v31  ;;  %3124 = vmatpush.bf16.msrb.mxu2 %v5892_v36  ;;  %v6720_v30 = vld [vmem:[#allocation19 + $0x6f4] sm:$0xf0]  ;;  %v6540_v31 = vld [vmem:[#allocation19 + $0x15c] sm:$0xf] }
 0x30e   :  { %3080 = vmatmul.bf16.vlgmr.msra.gmra.mxu2 %v7636_v37  ;;  %v2821_v54 = vpop.f32.mrf.mxu2  ;;  %v6612_v36 = vld [vmem:[#allocation19 + $0x39c] sm:$0xf]  ;;  %v5764_v57 = vor.u32 %v6720_v30, %v5763_v28  ;;  %v5064_v41 = vor.u32 %v6540_v31, %v5061_v62 }
 0x30f   :  { %v2822_v32 = vadd.f32 %v2821_v54, %v2809_v21  ;;  %v5352_v20 = vor.u32 %v6612_v36, %v5349_v42  ;;  %v5667_v21 = vld [vmem:[#allocation19 + $0x618] sm:$0xf]  ;;  %v4965_v28 = vld [vmem:[#allocation19 + $0xb8] sm:$0xf0]  ;;  %v2848_v54 = vadd.f32 %v7669_v52, %v2835_v51 }
 0x310   :  { %3091 = vmatpush.bf16.msra.mxu3 %v4932_v44  ;;  %3103 = vmatpush.bf16.msrb.mxu0 %v5220_v46  ;;  %v2849_v33 = vpop.f32.mrf.mxu0  ;;  %v6712_v46 = vld [vmem:[#allocation19 + $0x6b4] sm:$0xf0]  ;;  %v5253_v31 = vld [vmem:[#allocation19 + $0x2f8] sm:$0xf0]  ;;  %v4968_v38 = vor.u32 %v6516_v27, %v4965_v28 }
 0x311   :  { %3113 = vmatpush.bf16.msrb.mxu1 %v5572_v47  ;;  %3125 = vmatpush.bf16.msrb.mxu2 %v5860_v29  ;;  %vm3189_vm10 = vcmp.ge.f32.partialorder %v2822_v32, 0.0  ;;  %v3197_v39 = vmul.f32 0.2, %v2822_v32  ;;  %v6532_v47 = vld [vmem:[#allocation19 + $0x11c] sm:$0xf]  ;;  %v5732_v60 = vor.u32 %v6712_v46, %v5731_v45 }
 0x312   :  { %v2836_v44 = vpop.f32.mrf.mxu3  ;;  %v5032_v61 = vor.u32 %v6532_v47, %v5029_v40  ;;  %v6676_v62 = vld [vmem:[#allocation19 + $0x59c] sm:$0xf] }
 0x313   :  { %v7676_v11 = vsel %vm3189_vm10, %v2822_v32, %v3197_v39  ;;  %v5605_v32 = vld [vmem:[#allocation19 + $0x5b8] sm:$0xf0] }
 0x314   :  { %3092 = vmatpush.bf16.msra.mxu3 %v4900_v56  ;;  %3104 = vmatpush.bf16.msrb.mxu0 %v5188_v63  ;;  %v2860_v29 = vpop.f32.mrf.mxu1  ;;  %v3215_v53 = vrot.slane %v7676_v11, 4  ;;  %v6632_v56 = vld [vmem:[#allocation19 + $0x434] sm:$0xf0]  ;;  %v6748_v36 = vld [vmem:[#allocation19 + $0x7dc] sm:$0xf] }
 0x315   :  { %3114 = vmatpush.bf16.msrb.mxu1 %v5540_v0  ;;  %3126 = vmatpush.bf16.msrb.mxu2 %v5828_v16  ;;  %v5699_v63 = vld [vmem:[#allocation19 + $0x658] sm:$0xf]  ;;  %v5412_v12 = vor.u32 %v6632_v56, %v5411_v58  ;;  %v5893_v42 = vld [vmem:[#allocation19 + $0x7f8] sm:$0xf0] }
 0x316   :  { %v6704_v0 = vld [vmem:[#allocation19 + $0x674] sm:$0xf0]  ;;  %v3216_v1 = vadd.f32 %v3215_v53, %v7676_v11  ;;  %v2823_v16 = vpop.f32.mrf.mxu2  ;;  %v6508_v52 = vld [vmem:[#allocation19 + $0x5c] sm:$0xf]  ;;  %v5896_v46 = vor.u32 %v6748_v36, %v5893_v42 }
 0x317   :  { %3093 = vmatmul.bf16.vlgmr.msra.gmra.mxu3 %v7616_v50  ;;  %v5700_v17 = vor.u32 %v6704_v0, %v5699_v63  ;;  %v4933_v45 = vld [vmem:[#allocation19 + $0x78] sm:$0xf0] }
 0x318   :  { %3137 = vmatpush.bf16.msrb.mxu3 %v5128_v4  ;;  %3105 = vmatpush.bf16.msrb.mxu0 %v5156_v18  ;;  %v6524_v4 = vld [vmem:[#allocation19 + $0xdc] sm:$0xf]  ;;  %v3217_v10 = vrot.slane %v3216_v1, 2  ;;  %v7682_v13 = vpop.f32.mrf.mxu0 }
 0x319   :  { %3115 = vmatpush.bf16.msrb.mxu1 %v5508_v19  ;;  %3127 = vmatpush.bf16.msrb.mxu2 %v5796_v23  ;;  %v5000_v18 = vor.u32 %v6524_v4, %v4997_v6  ;;  %v6696_v23 = vld [vmem:[#allocation19 + $0x634] sm:$0xf0]  ;;  %v5221_v40 = vld [vmem:[#allocation19 + $0x2b8] sm:$0xf0] }
 0x31a   :  { %v7684_v19 = vpop.f32.mrf.mxu3  ;;  %v5668_v15 = vor.u32 %v6696_v23, %v5667_v21  ;;  %v6740_v53 = vld [vmem:[#allocation19 + $0x79c] sm:$0xf]  ;;  %v6768_v21 = vld [vmem:[#allocation23 + $0x74] sm:$0xf0] }
 0x31b   :  { %3106 = vmatmul.bf16.vlgmr.msrb.gmra.mxu0 %v7622_v3  ;;  %v6500_v58 = vld [vmem:[#allocation19 + $0x1c] sm:$0xf] }
 0x31c   :  { %3138 = vmatpush.bf16.msrb.mxu3 %v5096_v25  ;;  %3150 = vmatpush.bf16.msra.mxu0 %v5384_v59  ;;  %v3218_v25 = vadd.f32 %v3217_v10, %v3216_v1  ;;  %v6588_v59 = vld [vmem:[#allocation19 + $0x2dc] sm:$0xf]  ;;  %v2862_v30 = vpop.f32.mrf.mxu1 }
 0x31d   :  { %3116 = vmatpush.bf16.msrb.mxu1 %v5476_v24  ;;  %3128 = vmatpush.bf16.msrb.mxu2 %v5764_v57  ;;  %v2861_v24 = vadd.f32 %v2860_v29, %v2848_v54  ;;  %v5256_v57 = vor.u32 %v6588_v59, %v5253_v31  ;;  %v5573_v29 = vld [vmem:[#allocation19 + $0x578] sm:$0xf0] }
 0x31e   :  { %v3219_v33 = vrot.slane %v3218_v25, 1  ;;  %v2873_v44 = vpop.f32.mrf.mxu2  ;;  %v4901_v63 = vld [vmem:[#allocation19 + $0x38] sm:$0xf0] }
 0x31f   :  { %v2874_v47 = vadd.f32 %v2873_v44, %v2861_v24  ;;  %v6572_v16 = vld [vmem:[#allocation19 + $0x25c] sm:$0xf]  ;;  %v4904_v23 = vor.u32 %v6500_v58, %v4901_v63  ;;  %v5939_v58 = vld [vmem:[#allocation23 + $0x50] sm:$0xf]  ;;  %v6782_v63 = vld [vmem:[#allocation23 + $0xe4] sm:$0xf0] }
 0x320   :  { %3139 = vmatpush.bf16.msrb.mxu3 %v5064_v41  ;;  %3151 = vmatpush.bf16.msra.mxu0 %v5352_v20  ;;  %v3220_v39 = vadd.f32 %v3219_v33, %v3218_v25  ;;  %v5608_v41 = vor.u32 %v6676_v62, %v5605_v32  ;;  %v6580_v20 = vld [vmem:[#allocation19 + $0x29c] sm:$0xf]  ;;  %v2901_v14 = vpop.f32.mrf.mxu0 }
 0x321   :  { %3117 = vmatpush.bf16.msrb.mxu1 %v5444_v55  ;;  %3129 = vmatpush.bf16.msrb.mxu2 %v5732_v60  ;;  %v5861_v55 = vld [vmem:[#allocation19 + $0x7b8] sm:$0xf0]  ;;  %vm3190_vm11 = vcmp.ge.f32.partialorder %v2874_v47, 0.0  ;;  %v3198_v60 = vmul.f32 0.2, %v2874_v47  ;;  %v5224_v1 = vor.u32 %v6580_v20, %v5221_v40 }
 0x322   :  { %v3263_v49 = vmul.f32 %v3220_v39, %v7507_v35  ;;  %v2888_v56 = vpop.f32.mrf.mxu3  ;;  %v5189_v4 = vld [vmem:[#allocation19 + $0x278] sm:$0xf0]  ;;  %v5864_v51 = vor.u32 %v6740_v53, %v5861_v55  ;;  %v6766_v39 = vld [vmem:[#allocation23 + $0x64] sm:$0xf0] }
 0x323   :  { %v6660_v6 = vld [vmem:[#allocation19 + $0x51c] sm:$0xf]  ;;  %v7692_v7 = vsel %vm3190_vm11, %v2874_v47, %v3198_v60  ;;  %v5192_v27 = vor.u32 %v6572_v16, %v5189_v4  ;;  %v6764_v60 = vld [vmem:[#allocation23 + $0x54] sm:$0xf0]  ;;  %v6011_v56 = vld [vmem:[#allocation23 + $0xe0] sm:$0xf] }
 0x324   :  { %3140 = vmatpush.bf16.msrb.mxu3 %v5032_v61  ;;  %3152 = vmatpush.bf16.msra.mxu0 %v5320_v2  ;;  %v4936_v61 = vor.u32 %v6508_v52, %v4933_v45  ;;  %v7690_v0 = vsub.f32 %v7676_v11, %v3263_v49  ;;  %v5576_v2 = vor.u32 %v6668_v48, %v5573_v29  ;;  %v6732_v34 = vld [vmem:[#allocation19 + $0x75c] sm:$0xf]  ;;  %v1479_v11 = vperm.slane %v7663_v26, 2 }
 0x325   :  { %3118 = vmatpush.bf16.msrb.mxu1 %v5412_v12  ;;  %3130 = vmatpush.bf16.msrb.mxu2 %v5700_v17  ;;  %v5829_v9 = vld [vmem:[#allocation19 + $0x778] sm:$0xf0]  ;;  %v3221_v12 = vrot.slane %v7692_v7, 4  ;;  %v5544_v28 = vor.u32 %v6660_v6, %v5541_v8 }
 0x326   :  { %v3279_v10 = vmul.f32 %v7690_v0, %v7690_v0  ;;  %v6564_v25 = vld [vmem:[#allocation19 + $0x21c] sm:$0xf]  ;;  %v2875_v59 = vpop.f32.mrf.mxu2  ;;  %v5832_v31 = vor.u32 %v6732_v34, %v5829_v9  ;;  %v2887_v24 = vadd.f32 %v7684_v19, %v1479_v11 }
 0x327   :  { %v2912_v17 = vpop.f32.mrf.mxu1  ;;  %v5157_v54 = vld [vmem:[#allocation19 + $0x238] sm:$0xf0] }
 0x328   :  { %3141 = vmatpush.bf16.msrb.mxu3 %v5000_v18  ;;  %3153 = vmatpush.bf16.msra.mxu0 %v5288_v22  ;;  %v5955_v18 = vld [vmem:[#allocation23 + $0x70] sm:$0xf]  ;;  %v3287_v22 = vrot.slane %v3279_v10, 4  ;;  %v6652_v30 = vld [vmem:[#allocation19 + $0x4dc] sm:$0xf]  ;;  %v5160_v45 = vor.u32 %v6564_v25, %v5157_v54  ;;  %v2900_v53 = vadd.f32 %v7682_v13, %v2887_v24 }
 0x329   :  { %3163 = vmatpush.bf16.msra.mxu1 %v5640_v5  ;;  %3131 = vmatpush.bf16.msrb.mxu2 %v5668_v15  ;;  %v3222_v5 = vadd.f32 %v3221_v12, %v7692_v7  ;;  %v5509_v62 = vld [vmem:[#allocation19 + $0x4f8] sm:$0xf0]  ;;  %v5956_v36 = vor.u32 %v6768_v21, %v5955_v18  ;;  %v5931_v18 = vld [vmem:[#allocation23 + $0x40] sm:$0xf]  ;;  %v6762_v21 = vld [vmem:[#allocation23 + $0x44] sm:$0xf0] }
 0x32a   :  { %3119 = vmatmul.bf16.vlgmr.msrb.gmra.mxu1 %v7631_v43  ;;  %v6724_v32 = vld [vmem:[#allocation19 + $0x71c] sm:$0xf]  ;;  %v3288_v42 = vadd.f32 %v3287_v22, %v3279_v10  ;;  %v5512_v20 = vor.u32 %v6652_v30, %v5509_v62  ;;  %v2913_v16 = vadd.f32 %v2912_v17, %v2900_v53  ;;  %v6012_v17 = vor.u32 %v6782_v63, %v6011_v56  ;;  %v6003_v25 = vld [vmem:[#allocation23 + $0xd0] sm:$0xf]  ;;  %v6780_v22 = vld [vmem:[#allocation23 + $0xd4] sm:$0xf0] }
 0x32b   :  { %v5797_v33 = vld [vmem:[#allocation19 + $0x738] sm:$0xf0]  ;;  %v3223_v15 = vrot.slane %v3222_v5, 2  ;;  %v6004_v24 = vor.u32 %v6780_v22, %v6003_v25  ;;  %v6083_v53 = vld [vmem:[#allocation23 + $0x170] sm:$0xf] }
 0x32c   :  { %3142 = vmatpush.bf16.msrb.mxu3 %v4968_v38  ;;  %3154 = vmatpush.bf16.msra.mxu0 %v5256_v57  ;;  %v5947_v38 = vld [vmem:[#allocation23 + $0x60] sm:$0xf]  ;;  %v6019_v57 = vld [vmem:[#allocation23 + $0xf0] sm:$0xf]  ;;  %v3289_v44 = vrot.slane %v3288_v42, 2  ;;  %v5800_v47 = vor.u32 %v6724_v32, %v5797_v33  ;;  %v5932_v32 = vor.u32 %v6762_v21, %v5931_v18 }
 0x32d   :  { %3164 = vmatpush.bf16.msra.mxu1 %v5608_v41  ;;  %3176 = vmatpush.bf16.msra.mxu2 %v5896_v46  ;;  %v6784_v41 = vld [vmem:[#allocation23 + $0xf4] sm:$0xf0]  ;;  %v3224_v52 = vadd.f32 %v3223_v15, %v3222_v5  ;;  %v6644_v46 = vld [vmem:[#allocation19 + $0x49c] sm:$0xf]  ;;  %v5948_v19 = vor.u32 %v6766_v39, %v5947_v38  ;;  %v5995_v38 = vld [vmem:[#allocation23 + $0xc0] sm:$0xf] }
 0x32e   :  { %3132 = vmatmul.bf16.vlgmr.msrb.gmra.mxu2 %v7636_v37  ;;  %v5477_v40 = vld [vmem:[#allocation19 + $0x4b8] sm:$0xf0]  ;;  %v3290_v49 = vadd.f32 %v3289_v44, %v3288_v42  ;;  %v6760_v42 = vld [vmem:[#allocation23 + $0x34] sm:$0xf0]  ;;  %v6778_v39 = vld [vmem:[#allocation23 + $0xc4] sm:$0xf0] }
 0x32f   :  { %v6716_v48 = vld [vmem:[#allocation19 + $0x6dc] sm:$0xf]  ;;  %v3225_v14 = vrot.slane %v3224_v52, 1  ;;  %v2914_v55 = vpop.f32.mrf.mxu1  ;;  %v5480_v4 = vor.u32 %v6644_v46, %v5477_v40 }
 0x330   :  { %3143 = vmatpush.bf16.msrb.mxu3 %v4936_v61  ;;  %3155 = vmatpush.bf16.msra.mxu0 %v5224_v1  ;;  %v5765_v29 = vld [vmem:[#allocation19 + $0x6f8] sm:$0xf0]  ;;  %v6020_v61 = vor.u32 %v6784_v41, %v6019_v57  ;;  %v3291_v1 = vrot.slane %v3290_v49, 1  ;;  %v6800_v55 = vld [vmem:[#allocation23 + $0x174] sm:$0xf0] }
 0x331   :  { %3165 = vmatpush.bf16.msra.mxu1 %v5576_v2  ;;  %3177 = vmatpush.bf16.msra.mxu2 %v5864_v51  ;;  %v3226_v2 = vadd.f32 %v3225_v14, %v3224_v52  ;;  %v6636_v6 = vld [vmem:[#allocation19 + $0x45c] sm:$0xf]  ;;  %v5768_v8 = vor.u32 %v6716_v48, %v5765_v29  ;;  %v2925_v34 = vpop.f32.mrf.mxu2  ;;  %v5915_v29 = vld [vmem:[#allocation23 + $0x20] sm:$0xf]  ;;  %v5996_v14 = vor.u32 %v6778_v39, %v5995_v38  ;;  %v1480_v39 = vperm.slane %v7663_v26, 3 }
 0x332   :  { %v5445_v51 = vld [vmem:[#allocation19 + $0x478] sm:$0xf0]  ;;  %v3292_v9 = vadd.f32 %v3291_v1, %v3290_v49  ;;  %v2926_v11 = vadd.f32 %v2925_v34, %v2913_v16  ;;  %v6758_v49 = vld [vmem:[#allocation23 + $0x24] sm:$0xf0]  ;;  %v6084_v56 = vor.u32 %v6800_v55, %v6083_v53  ;;  %v6756_v34 = vld [vmem:[#allocation23 + $0x14] sm:$0xf0] }
 0x333   :  { %v6708_v13 = vld [vmem:[#allocation19 + $0x69c] sm:$0xf]  ;;  %v3264_v10 = vmul.f32 %v3226_v2, %v7507_v35  ;;  %v5916_v16 = vor.u32 %v6758_v49, %v5915_v29  ;;  %v5963_v29 = vld [vmem:[#allocation23 + $0x80] sm:$0xf]  ;;  %v7750_v55 = vld [vmem:[#allocation22] sm:$0xff] }
 0x334   :  { %3144 = vmatpush.bf16.msrb.mxu3 %v4904_v23  ;;  %3156 = vmatpush.bf16.msra.mxu0 %v5192_v27  ;;  %v5733_v12 = vld [vmem:[#allocation19 + $0x6b8] sm:$0xf0]  ;;  %v5448_v23 = vor.u32 %v6636_v6, %v5445_v51  ;;  %v3335_v5 = vmul.f32 %v3292_v9, %v7507_v35  ;;  %vm3191_vm12 = vcmp.ge.f32.partialorder %v2926_v11, 0.0 }
 0x335   :  { %3166 = vmatpush.bf16.msra.mxu1 %v5544_v28  ;;  %3178 = vmatpush.bf16.msra.mxu2 %v5832_v31  ;;  %v7707_v27 = vsub.f32 %v7692_v7, %v3264_v10  ;;  %v3199_v28 = vmul.f32 0.2, %v2926_v11  ;;  %v6628_v59 = vld [vmem:[#allocation19 + $0x41c] sm:$0xf]  ;;  %v5736_v54 = vor.u32 %v6708_v13, %v5733_v12  ;;  %v5923_v7 = vld [vmem:[#allocation23 + $0x30] sm:$0xf] }
 0x336   :  { %v5413_v30 = vld [vmem:[#allocation19 + $0x438] sm:$0xf0]  ;;  %v5924_v48 = vor.u32 %v6760_v42, %v5923_v7  ;;  %v6774_v12 = vld [vmem:[#allocation23 + $0xa4] sm:$0xf0]  ;;  %v5971_v7 = vld [vmem:[#allocation23 + $0x90] sm:$0xf] }
 0x337   :  { %3145 = vmatmul.bf16.vlgmr.msrb.gmra.mxu3 %v7616_v50  ;;  %v5940_v50 = vor.u32 %v6764_v60, %v5939_v58  ;;  %v6700_v31 = vld [vmem:[#allocation19 + $0x65c] sm:$0xf]  ;;  %v3280_v33 = vmul.f32 %v7707_v27, %v7707_v27  ;;  %v5416_v44 = vor.u32 %v6628_v59, %v5413_v30  ;;  %v5987_v60 = vld [vmem:[#allocation23 + $0xb0] sm:$0xf]  ;;  %v5899_v30 = vld [vmem:[#allocation23] sm:$0xf] }
 0x338   :  { %4279 = vmatpush.bf16.msra.mxu3 %v5956_v36  ;;  %3157 = vmatpush.bf16.msra.mxu0 %v5160_v45  ;;  %v5701_v62 = vld [vmem:[#allocation19 + $0x678] sm:$0xf0]  ;;  %v7713_v36 = vsel %vm3191_vm12, %v2926_v11, %v3199_v28  ;;  %v7717_v41 = vpop.f32.mrf.mxu0  ;;  %v5979_v11 = vld [vmem:[#allocation23 + $0xa0] sm:$0xf]  ;;  %v6067_v59 = vld [vmem:[#allocation23 + $0x150] sm:$0xf] }
 0x339   :  { %3167 = vmatpush.bf16.msra.mxu1 %v5512_v20  ;;  %3179 = vmatpush.bf16.msra.mxu2 %v5800_v47  ;;  %v3227_v15 = vrot.slane %v7713_v36, 4  ;;  %v3293_v57 = vrot.slane %v3280_v33, 4  ;;  %v5704_v45 = vor.u32 %v6700_v31, %v5701_v62  ;;  %v2927_v20 = vpop.f32.mrf.mxu2  ;;  %v6692_v47 = vld [vmem:[#allocation19 + $0x61c] sm:$0xf]  ;;  %v6754_v31 = vld [vmem:[#allocation23 + $0x4] sm:$0xf0] }
 0x33a   :  { %v7720_v46 = vpop.f32.mrf.mxu3  ;;  %v5669_v40 = vld [vmem:[#allocation19 + $0x638] sm:$0xf0]  ;;  %v6796_v62 = vld [vmem:[#allocation23 + $0x154] sm:$0xf0] }
 0x33b   :  { %3158 = vmatmul.bf16.vlgmr.msra.gmra.mxu0 %v7622_v3  ;;  %v7709_v3 = vadd.f32 1e-05, %v3335_v5  ;;  %v3228_v52 = vadd.f32 %v3227_v15, %v7713_v36  ;;  %v5672_v2 = vor.u32 %v6692_v47, %v5669_v40  ;;  %v6772_v42 = vld [vmem:[#allocation23 + $0x94] sm:$0xf0]  ;;  %v6059_v40 = vld [vmem:[#allocation23 + $0x140] sm:$0xf]  ;;  %v2939_v49 = vadd.f32 %v7720_v46, %v1480_v39 }
 0x33c   :  { %4280 = vmatpush.bf16.msra.mxu3 %v5948_v19  ;;  %4292 = vmatpush.bf16.msrb.mxu0 %v6020_v61  ;;  %v3294_v19 = vadd.f32 %v3293_v57, %v3280_v33  ;;  %v6776_v61 = vld [vmem:[#allocation23 + $0xb4] sm:$0xf0]  ;;  %v5972_v47 = vor.u32 %v6772_v42, %v5971_v7  ;;  %v3473_v46 = vperm.slane %v7750_v55, 0 }
 0x33d   :  { %3168 = vmatpush.bf16.msra.mxu1 %v5480_v4  ;;  %3180 = vmatpush.bf16.msra.mxu2 %v5768_v8  ;;  %6920 = vrsqrt.f32 %v7709_v3  ;;  %v3229_v58 = vrot.slane %v3228_v52, 2  ;;  %v6075_v4 = vld [vmem:[#allocation23 + $0x160] sm:$0xf]  ;;  %v5907_v8 = vld [vmem:[#allocation23 + $0x10] sm:$0xf]  ;;  %v5988_v13 = vor.u32 %v6776_v61, %v5987_v60  ;;  %vm3357_vm14 = vweird.f32 %v7709_v3 }
 0x33e   :  { %v3295_v63 = vrot.slane %v3294_v19, 2  ;;  %v5908_v28 = vor.u32 %v6756_v34, %v5907_v8 }
 0x33f   :  { %v3230_v1 = vadd.f32 %v3229_v58, %v3228_v52  ;;  %v6792_v58 = vld [vmem:[#allocation23 + $0x134] sm:$0xf0] }
 0x340   :  { %4281 = vmatpush.bf16.msra.mxu3 %v5940_v50  ;;  %4293 = vmatpush.bf16.msrb.mxu0 %v6012_v17  ;;  %v3296_v51 = vadd.f32 %v3295_v63, %v3294_v19  ;;  %v6798_v50 = vld [vmem:[#allocation23 + $0x164] sm:$0xf0]  ;;  %v2953_v17 = vpop.f32.mrf.mxu0 }
 0x341   :  { %3169 = vmatpush.bf16.msra.mxu1 %v5448_v23  ;;  %3181 = vmatpush.bf16.msra.mxu2 %v5736_v54  ;;  %v3231_v10 = vrot.slane %v3230_v1, 1  ;;  %v6076_v18 = vor.u32 %v6798_v50, %v6075_v4  ;;  %v7727_v23 = vld [vmem:[#allocation20] sm:$0xff]  ;;  %v6770_v19 = vld [vmem:[#allocation23 + $0x84] sm:$0xf0] }
 0x342   :  { %v3297_v21 = vrot.slane %v3296_v51, 1  ;;  %v2940_v5 = vpop.f32.mrf.mxu3  ;;  %v3432_v15 = vperm.slane %v7727_v23, 0  ;;  %v5964_v61 = vor.u32 %v6770_v19, %v5963_v29  ;;  %v6035_v17 = vld [vmem:[#allocation23 + $0x110] sm:$0xf]  ;;  %v6814_v29 = vld [vmem:[#allocation23 + $0x1e4] sm:$0xf0] }
 0x343   :  { %v7722_v6 = vpop.eup %6920  ;;  %v3232_v22 = vadd.f32 %v3231_v10, %v3230_v1 }
 0x344   :  { %4282 = vmatpush.bf16.msra.mxu3 %v5932_v32  ;;  %4294 = vmatpush.bf16.msrb.mxu0 %v6004_v24  ;;  %v3352_v9 = vmul.f32 %v7722_v6, %v7709_v3  ;;  %v3298_v54 = vadd.f32 %v3297_v21, %v3296_v51  ;;  %v6068_v24 = vor.u32 %v6796_v62, %v6067_v59  ;;  %vm3358_vm13 = vweird.f32 %v7722_v6  ;;  %v6051_v3 = vld [vmem:[#allocation23 + $0x130] sm:$0xf]  ;;  %v6790_v51 = vld [vmem:[#allocation23 + $0x124] sm:$0xf0]  ;;  %v6027_v62 = vld [vmem:[#allocation23 + $0x100] sm:$0xf] }
 0x345   :  { %3170 = vmatpush.bf16.msra.mxu1 %v5416_v44  ;;  %3182 = vmatpush.bf16.msra.mxu2 %v5704_v45  ;;  %v3265_v33 = vmul.f32 %v3232_v22, %v7507_v35  ;;  %v5900_v45 = vor.u32 %v6754_v31, %v5899_v30  ;;  %vm3359_vm15 = vmor %vm3357_vm14, %vm3358_vm13 }
 0x346   :  { %v3353_v25 = vmul.f32 %v7722_v6, %v3352_v9  ;;  %v3336_v38 = vmul.f32 %v3298_v54, %v7507_v35 }
 0x347   :  { %v2964_v57 = vpop.f32.mrf.mxu1  ;;  %v7737_v52 = vsub.f32 %v7713_v36, %v3265_v33  ;;  %v3433_v33 = vperm.slane %v7727_v23, 1 }
 0x348   :  { %4283 = vmatpush.bf16.msra.mxu3 %v5924_v48  ;;  %4295 = vmatpush.bf16.msrb.mxu0 %v5996_v14  ;;  %v3354_v32 = vmul.f32 0.5, %v3353_v25  ;;  %v7739_v20 = vadd.f32 1e-05, %v3336_v38  ;;  %v6794_v48 = vld [vmem:[#allocation23 + $0x144] sm:$0xf0] }
 0x349   :  { %4305 = vmatpush.bf16.msrb.mxu1 %v6084_v56  ;;  %3183 = vmatpush.bf16.msra.mxu2 %v5672_v2  ;;  %v6060_v36 = vor.u32 %v6794_v48, %v6059_v40  ;;  %v6052_v56 = vor.u32 %v6792_v58, %v6051_v3  ;;  %v2952_v2 = vadd.f32 %v7717_v41, %v2939_v49  ;;  %v6788_v25 = vld [vmem:[#allocation23 + $0x114] sm:$0xf0]  ;;  %v6211_v40 = vld [vmem:[#allocation23 + $0x270] sm:$0xf]  ;;  %v3474_v3 = vperm.slane %v7750_v55, 1 }
 0x34a   :  { %3171 = vmatmul.bf16.vlgmr.msra.gmra.mxu1 %v7631_v43  ;;  %v5980_v43 = vor.u32 %v6774_v12, %v5979_v11  ;;  %v3355_v44 = vsub.f32 1.5, %v3354_v32  ;;  %6922 = vrsqrt.f32 %v7739_v20  ;;  %v6786_v32 = vld [vmem:[#allocation23 + $0x104] sm:$0xf0]  ;;  %vm3367_vm2 = vweird.f32 %v7739_v20  ;;  %v6203_v58 = vld [vmem:[#allocation23 + $0x260] sm:$0xf] }
 0x34b   :  { %v6028_v42 = vor.u32 %v6786_v32, %v6027_v62  ;;  %v6808_v62 = vld [vmem:[#allocation23 + $0x1b4] sm:$0xf0] }
 0x34c   :  { %4284 = vmatpush.bf16.msra.mxu3 %v5916_v16  ;;  %4296 = vmatpush.bf16.msrb.mxu0 %v5988_v13  ;;  %v3356_v26 = vmul.f32 %v7722_v6, %v3355_v44  ;;  %v2965_v13 = vadd.f32 %v2964_v57, %v2952_v2 }
 0x34d   :  { %4306 = vmatpush.bf16.msrb.mxu1 %v6076_v18  ;;  %3184 = vmatmul.bf16.vlgmr.msra.gmra.mxu2 %v7636_v37  ;;  %v3281_v37 = vmul.f32 %v7737_v52, %v7737_v52 }
 0x34e   :  { %v3360_v14 = vsel %vm3359_vm15, %v7722_v6, %v3356_v26  ;;  %v6043_v6 = vld [vmem:[#allocation23 + $0x120] sm:$0xf] }
 0x34f   :  { %v3299_v53 = vrot.slane %v3281_v37, 4  ;;  %v3448_v60 = vmul.f32 %v3432_v15, %v3360_v14  ;;  %v2966_v16 = vpop.f32.mrf.mxu1  ;;  %v6044_v50 = vor.u32 %v6790_v51, %v6043_v6  ;;  %v6816_v15 = vld [vmem:[#allocation23 + $0x1f4] sm:$0xf0] }
 0x350   :  { %4285 = vmatpush.bf16.msra.mxu3 %v5908_v28  ;;  %4297 = vmatpush.bf16.msrb.mxu0 %v5980_v43  ;;  %v6923_v8 = vpop.eup %6922 }
 0x351   :  { %4307 = vmatpush.bf16.msrb.mxu1 %v6068_v24  ;;  %v3300_v63 = vadd.f32 %v3299_v53, %v3281_v37  ;;  %v3456_v1 = vperm.slane %v3448_v60, 0  ;;  %v3362_v9 = vmul.f32 %v6923_v8, %v7739_v20  ;;  %v2977_v11 = vpop.f32.mrf.mxu2  ;;  %vm3368_vm1 = vweird.f32 %v6923_v8  ;;  %v6147_v24 = vld [vmem:[#allocation23 + $0x1f0] sm:$0xf]  ;;  %v6832_v20 = vld [vmem:[#allocation23 + $0x274] sm:$0xf0] }
 0x352   :  { %v2978_v12 = vadd.f32 %v2977_v11, %v2965_v13  ;;  %vm3369_vm3 = vmor %vm3367_vm2, %vm3368_vm1  ;;  %v6139_v37 = vld [vmem:[#allocation23 + $0x1e0] sm:$0xf]  ;;  %v6830_v60 = vld [vmem:[#allocation23 + $0x264] sm:$0xf0] }
 0x353   :  { %v3301_v4 = vrot.slane %v3300_v63, 2  ;;  %v3464_v34 = vmul.f32 %v3456_v1, %v7690_v0  ;;  %v3363_v41 = vmul.f32 %v6923_v8, %v3362_v9  ;;  %v6036_v0 = vor.u32 %v6788_v25, %v6035_v17  ;;  %v6812_v1 = vld [vmem:[#allocation23 + $0x1d4] sm:$0xf0]  ;;  %v6195_v13 = vld [vmem:[#allocation23 + $0x250] sm:$0xf] }
 0x354   :  { %4286 = vmatpush.bf16.msra.mxu3 %v5900_v45  ;;  %4298 = vmatpush.bf16.msrb.mxu0 %v5972_v47  ;;  %vm3192_vm0 = vcmp.ge.f32.partialorder %v2978_v12, 0.0  ;;  %v3200_v22 = vmul.f32 0.2, %v2978_v12  ;;  %v6148_v47 = vor.u32 %v6816_v15, %v6147_v24  ;;  %v6140_v49 = vor.u32 %v6814_v29, %v6139_v37  ;;  %v6123_v11 = vld [vmem:[#allocation23 + $0x1c0] sm:$0xf] }
 0x355   :  { %4308 = vmatpush.bf16.msrb.mxu1 %v6060_v36  ;;  %v3302_v10 = vadd.f32 %v3301_v4, %v3300_v63  ;;  %v3489_v18 = vadd.f32 %v3473_v46, %v3464_v34  ;;  %v3364_v28 = vmul.f32 0.5, %v3363_v41  ;;  %v6212_v36 = vor.u32 %v6832_v20, %v6211_v40  ;;  %v6131_v63 = vld [vmem:[#allocation23 + $0x1d0] sm:$0xf]  ;;  %v6107_v40 = vld [vmem:[#allocation23 + $0x1a0] sm:$0xf] }
 0x356   :  { %v7758_v54 = vsel %vm3192_vm0, %v2978_v12, %v3200_v22  ;;  %4318 = vmatpush.bf16.msrb.mxu2 %v6148_v47  ;;  %v6132_v46 = vor.u32 %v6812_v1, %v6131_v63  ;;  %v6810_v12 = vld [vmem:[#allocation23 + $0x1c4] sm:$0xf0] }
 0x357   :  { %v3303_v21 = vrot.slane %v3302_v10, 1  ;;  %v7756_v5 = vpack.c.bf16 %v3489_v18, %v3489_v18  ;;  %v3365_v30 = vsub.f32 1.5, %v3364_v28  ;;  %v3233_v43 = vrot.slane %v7758_v54, 4  ;;  %v6187_v28 = vld [vmem:[#allocation23 + $0x240] sm:$0xf] }
 0x358   :  { %4299 = vmatpush.bf16.msrb.mxu0 %v5964_v61  ;;  %v7765_v7 = vpop.f32.mrf.mxu0  ;;  %4331 = vmatpush.bf16.msrb.mxu3 %v6212_v36  ;;  %v6124_v25 = vor.u32 %v6810_v12, %v6123_v11  ;;  %v6806_v20 = vld [vmem:[#allocation23 + $0x1a4] sm:$0xf0] }
 0x359   :  { %4309 = vmatpush.bf16.msrb.mxu1 %v6052_v56  ;;  %v3304_v59 = vadd.f32 %v3303_v21, %v3302_v10  ;;  %4287 = vmatmul.bf16.vlgmr.msra.gmra.mxu3 %v7756_v5  ;;  %v3366_v38 = vmul.f32 %v6923_v8, %v3365_v30  ;;  %v3234_v57 = vadd.f32 %v3233_v43, %v7758_v54  ;;  %v2979_v44 = vpop.f32.mrf.mxu2  ;;  %v6115_v43 = vld [vmem:[#allocation23 + $0x1b0] sm:$0xf] }
 0x35a   :  { %v2990_v45 = vpop.f32.mrf.mxu3  ;;  %4319 = vmatpush.bf16.msrb.mxu2 %v6140_v49  ;;  %v6204_v56 = vor.u32 %v6830_v60, %v6203_v58  ;;  %v6108_v37 = vor.u32 %v6806_v20, %v6107_v40  ;;  %v6171_v49 = vld [vmem:[#allocation23 + $0x220] sm:$0xf]  ;;  %v3475_v58 = vperm.slane %v7750_v55, 2 }
 0x35b   :  { %v3337_v31 = vmul.f32 %v3304_v59, %v7507_v35  ;;  %v3370_v48 = vsel %vm3369_vm3, %v6923_v8, %v3366_v38  ;;  %v3235_v26 = vrot.slane %v3234_v57, 2  ;;  %v6826_v59 = vld [vmem:[#allocation23 + $0x244] sm:$0xf0]  ;;  %v6179_v38 = vld [vmem:[#allocation23 + $0x230] sm:$0xf] }
 0x35c   :  { %v3449_v19 = vmul.f32 %v3433_v33, %v3370_v48  ;;  %4332 = vmatpush.bf16.msrb.mxu3 %v6204_v56  ;;  %v6804_v56 = vld [vmem:[#allocation23 + $0x194] sm:$0xf0] }
 0x35d   :  { %4310 = vmatpush.bf16.msrb.mxu1 %v6044_v50  ;;  %v7767_v39 = vadd.f32 1e-05, %v3337_v31  ;;  %v3236_v14 = vadd.f32 %v3235_v26, %v3234_v57  ;;  %v6828_v50 = vld [vmem:[#allocation23 + $0x254] sm:$0xf0]  ;;  %v6188_v31 = vor.u32 %v6826_v59, %v6187_v28 }
 0x35e   :  { %v3457_v53 = vperm.slane %v3449_v19, 0  ;;  %4320 = vmatpush.bf16.msrb.mxu2 %v6132_v46  ;;  %v6196_v10 = vor.u32 %v6828_v50, %v6195_v13  ;;  %v6824_v57 = vld [vmem:[#allocation23 + $0x234] sm:$0xf0]  ;;  %v6163_v46 = vld [vmem:[#allocation23 + $0x210] sm:$0xf] }
 0x35f   :  { %6924 = vrsqrt.f32 %v7767_v39  ;;  %v3237_v61 = vrot.slane %v3236_v14, 1  ;;  %vm3377_vm5 = vweird.f32 %v7767_v39  ;;  %v6180_v47 = vor.u32 %v6824_v57, %v6179_v38  ;;  %v6765_v38 = vld [vmem:[#allocation23 + $0x64] sm:$0xf] }
 0x360   :  { %v3465_v2 = vmul.f32 %v3457_v53, %v7707_v27  ;;  %v3005_v16 = vpop.f32.mrf.mxu0  ;;  %v7779_v27 = vld [vmem:[%s7930_s12] sm:$0xff]  ;;  %4333 = vmatpush.bf16.msrb.mxu3 %v6196_v10 }
 0x361   :  { %4311 = vmatpush.bf16.msrb.mxu1 %v6036_v0  ;;  %v3238_v6 = vadd.f32 %v3237_v61, %v3236_v14  ;;  %v1481_v41 = vperm.slane %v7779_v27, 4  ;;  %v6099_v61 = vld [vmem:[#allocation23 + $0x190] sm:$0xf] }
 0x362   :  { %v2992_v51 = vpop.f32.mrf.mxu3  ;;  %v3490_v34 = vadd.f32 %v3474_v3, %v3465_v2  ;;  %4321 = vmatpush.bf16.msrb.mxu2 %v6124_v25  ;;  %v6100_v1 = vor.u32 %v6804_v56, %v6099_v61  ;;  %v6251_v56 = vld [vmem:[#allocation23 + $0x2c0] sm:$0xf] }
 0x363   :  { %v3266_v9 = vmul.f32 %v3238_v6, %v7507_v35  ;;  %v2991_v33 = vadd.f32 %v2990_v45, %v1481_v41  ;;  %v6820_v51 = vld [vmem:[#allocation23 + $0x214] sm:$0xf0]  ;;  %v6818_v41 = vld [vmem:[#allocation23 + $0x204] sm:$0xf0] }
 0x364   :  { %v7782_v17 = vpack.c.bf16 %v3490_v34, %v3490_v34  ;;  %4334 = vmatpush.bf16.msrb.mxu3 %v6188_v31  ;;  %v6802_v34 = vld [vmem:[#allocation23 + $0x184] sm:$0xf0]  ;;  %v6164_v50 = vor.u32 %v6820_v51, %v6163_v46  ;;  %v6848_v31 = vld [vmem:[#allocation23 + $0x2f4] sm:$0xf0] }
 0x365   :  { %4312 = vmatpush.bf16.msrb.mxu1 %v6028_v42  ;;  %v6925_v4 = vpop.eup %6924  ;;  %v7785_v22 = vsub.f32 %v7758_v54, %v3266_v9  ;;  %v6116_v42 = vor.u32 %v6808_v62, %v6115_v43  ;;  %v3434_v54 = vperm.slane %v7727_v23, 2  ;;  %v3004_v26 = vadd.f32 %v7765_v7, %v2991_v33  ;;  %v6767_v43 = vld [vmem:[#allocation23 + $0x74] sm:$0xf]  ;;  %v5957_v62 = vld [vmem:[#allocation23 + $0x78] sm:$0xf0] }
 0x366   :  { %v3372_v8 = vmul.f32 %v6925_v4, %v7767_v39  ;;  %4300 = vmatmul.bf16.vlgmr.msrb.gmra.mxu0 %v7782_v17  ;;  %vm3378_vm4 = vweird.f32 %v6925_v4  ;;  %v6822_v39 = vld [vmem:[#allocation23 + $0x224] sm:$0xf0] }
 0x367   :  { %v3016_v21 = vpop.f32.mrf.mxu1  ;;  %v3282_v30 = vmul.f32 %v7785_v22, %v7785_v22  ;;  %vm3379_vm6 = vmor %vm3377_vm5, %vm3378_vm4  ;;  %4322 = vmatpush.bf16.msrb.mxu2 %v6116_v42  ;;  %v6172_v60 = vor.u32 %v6822_v39, %v6171_v49  ;;  %v5960_v42 = vor.u32 %v6767_v43, %v5957_v62  ;;  %v5941_v39 = vld [vmem:[#allocation23 + $0x58] sm:$0xf0]  ;;  %v6235_v43 = vld [vmem:[#allocation23 + $0x2a0] sm:$0xf] }
 0x368   :  { %v3373_v18 = vmul.f32 %v6925_v4, %v3372_v8  ;;  %v3017_v36 = vadd.f32 %v3016_v21, %v3004_v26  ;;  %4335 = vmatpush.bf16.msrb.mxu3 %v6180_v47  ;;  %v6091_v8 = vld [vmem:[#allocation23 + $0x180] sm:$0xf]  ;;  %v6838_v62 = vld [vmem:[#allocation23 + $0x2a4] sm:$0xf0] }
 0x369   :  { %v3305_v24 = vrot.slane %v3282_v30, 4  ;;  %v6092_v9 = vor.u32 %v6802_v34, %v6091_v8  ;;  %v3435_v8 = vperm.slane %v7727_v23, 3 }
 0x36a   :  { %v3374_v0 = vmul.f32 0.5, %v3373_v18  ;;  %v6155_v18 = vld [vmem:[#allocation23 + $0x200] sm:$0xf] }
 0x36b   :  { %v3306_v44 = vadd.f32 %v3305_v24, %v3282_v30  ;;  %4323 = vmatpush.bf16.msrb.mxu2 %v6108_v37  ;;  %v6156_v59 = vor.u32 %v6818_v41, %v6155_v18  ;;  %v6275_v30 = vld [vmem:[#allocation23 + $0x2f0] sm:$0xf]  ;;  %v6267_v24 = vld [vmem:[#allocation23 + $0x2e0] sm:$0xf]  ;;  %v5925_v18 = vld [vmem:[#allocation23 + $0x38] sm:$0xf0] }
 0x36c   :  { %v3375_v32 = vsub.f32 1.5, %v3374_v0  ;;  %4336 = vmatpush.bf16.msrb.mxu3 %v6172_v60  ;;  %v6276_v33 = vor.u32 %v6848_v31, %v6275_v30  ;;  %v6259_v37 = vld [vmem:[#allocation23 + $0x2d0] sm:$0xf] }
 0x36d   :  { %v3307_v19 = vrot.slane %v3306_v44, 2 }
 0x36e   :  { %v3376_v15 = vmul.f32 %v6925_v4, %v3375_v32  ;;  %4344 = vmatpush.bf16.msra.mxu0 %v6276_v33  ;;  %v6236_v33 = vor.u32 %v6838_v62, %v6235_v43  ;;  %v6779_v43 = vld [vmem:[#allocation23 + $0xd4] sm:$0xf] }
 0x36f   :  { %v3018_v45 = vpop.f32.mrf.mxu1  ;;  %v3308_v53 = vadd.f32 %v3307_v19, %v3306_v44  ;;  %4324 = vmatpush.bf16.msrb.mxu2 %v6100_v1  ;;  %v5949_v44 = vld [vmem:[#allocation23 + $0x68] sm:$0xf0]  ;;  %v6763_v19 = vld [vmem:[#allocation23 + $0x54] sm:$0xf]  ;;  %v6761_v1 = vld [vmem:[#allocation23 + $0x44] sm:$0xf] }
 0x370   :  { %v3380_v48 = vsel %vm3379_vm6, %v6925_v4, %v3376_v15  ;;  %4337 = vmatpush.bf16.msrb.mxu3 %v6164_v50  ;;  %v6846_v15 = vld [vmem:[#allocation23 + $0x2e4] sm:$0xf0]  ;;  %v5952_v40 = vor.u32 %v6765_v38, %v5949_v44  ;;  %v6840_v50 = vld [vmem:[#allocation23 + $0x2b4] sm:$0xf0]  ;;  %v3476_v38 = vperm.slane %v7750_v55, 3 }
 0x371   :  { %v3450_v29 = vmul.f32 %v3434_v54, %v3380_v48  ;;  %v3029_v3 = vpop.f32.mrf.mxu2  ;;  %v3309_v2 = vrot.slane %v3308_v53, 1  ;;  %v6268_v57 = vor.u32 %v6846_v15, %v6267_v24 }
 0x372   :  { %v3030_v63 = vadd.f32 %v3029_v3, %v3017_v36 }
 0x373   :  { %v3458_v14 = vperm.slane %v3450_v29, 0  ;;  %v3310_v4 = vadd.f32 %v3309_v2, %v3308_v53  ;;  %4325 = vmatpush.bf16.msrb.mxu2 %v6092_v9  ;;  %4345 = vmatpush.bf16.msra.mxu0 %v6268_v57  ;;  %v6844_v29 = vld [vmem:[#allocation23 + $0x2d4] sm:$0xf0]  ;;  %v5944_v53 = vor.u32 %v6763_v19, %v5941_v39  ;;  %v5909_v19 = vld [vmem:[#allocation23 + $0x18] sm:$0xf0] }
 0x374   :  { %vm3193_vm7 = vcmp.ge.f32.partialorder %v3030_v63, 0.0  ;;  %v3201_v16 = vmul.f32 0.2, %v3030_v63  ;;  %4338 = vmatpush.bf16.msrb.mxu3 %v6156_v59  ;;  %v6260_v49 = vor.u32 %v6844_v29, %v6259_v37 }
 0x375   :  { %v3466_v7 = vmul.f32 %v3458_v14, %v7737_v52  ;;  %v3338_v10 = vmul.f32 %v3310_v4, %v7507_v35 }
 0x376   :  { %v3209_v13 = vsel %vm3193_vm7, %v3030_v63, %v3201_v16  ;;  %v6842_v63 = vld [vmem:[#allocation23 + $0x2c4] sm:$0xf0]  ;;  %v5933_v16 = vld [vmem:[#allocation23 + $0x48] sm:$0xf0] }
 0x377   :  { %v3491_v6 = vadd.f32 %v3475_v58, %v3466_v7  ;;  %v3239_v11 = vrot.slane %v3209_v13, 4  ;;  %v7800_v21 = vadd.f32 1e-05, %v3338_v10  ;;  %v1482_v58 = vperm.slane %v7779_v27, 5  ;;  %4346 = vmatpush.bf16.msra.mxu0 %v6260_v49 }
 0x378   :  { %v7798_v52 = vpop.f32.mrf.mxu0  ;;  %4383 = vmatpush.bf16.msra.mxu3 %v5960_v42  ;;  %v6252_v2 = vor.u32 %v6842_v63, %v6251_v56  ;;  %v5936_v4 = vor.u32 %v6761_v1, %v5933_v16  ;;  %v5917_v42 = vld [vmem:[#allocation23 + $0x28] sm:$0xf0]  ;;  %v6753_v56 = vld [vmem:[#allocation23 + $0x4] sm:$0xf] }
 0x379   :  { %v7796_v12 = vpack.c.bf16 %v3491_v6, %v3491_v6  ;;  %v3240_v25 = vadd.f32 %v3239_v11, %v3209_v13  ;;  %v3031_v0 = vpop.f32.mrf.mxu2  ;;  %6926 = vrsqrt.f32 %v7800_v21  ;;  %vm3387_vm9 = vweird.f32 %v7800_v21  ;;  %v6759_v11 = vld [vmem:[#allocation23 + $0x34] sm:$0xf]  ;;  %v5901_v63 = vld [vmem:[#allocation23 + $0x8] sm:$0xf0] }
 0x37a   :  { %v3042_v28 = vpop.f32.mrf.mxu3 }
 0x37b   :  { %4313 = vmatmul.bf16.vlgmr.msrb.gmra.mxu1 %v7796_v12  ;;  %v3241_v32 = vrot.slane %v3240_v25, 2  ;;  %v3043_v51 = vadd.f32 %v3042_v28, %v1482_v58  ;;  %4347 = vmatpush.bf16.msra.mxu0 %v6252_v2 }
 0x37c   :  { %4384 = vmatpush.bf16.msra.mxu3 %v5952_v40  ;;  %v6227_v40 = vld [vmem:[#allocation23 + $0x290] sm:$0xf] }
 0x37d   :  { %v3242_v54 = vadd.f32 %v3241_v32, %v3240_v25  ;;  %v5928_v25 = vor.u32 %v6759_v11, %v5925_v18  ;;  %v3056_v59 = vadd.f32 %v7798_v52, %v3043_v51  ;;  %v6781_v11 = vld [vmem:[#allocation23 + $0xe4] sm:$0xf] }
 0x37f   :  { %v3243_v47 = vrot.slane %v3242_v54, 1  ;;  %v6927_v48 = vpop.eup %6926 }
 0x380   :  { %v3057_v20 = vpop.f32.mrf.mxu0  ;;  %v3382_v36 = vmul.f32 %v6927_v48, %v7800_v21  ;;  %4385 = vmatpush.bf16.msra.mxu3 %v5944_v53  ;;  %vm3388_vm8 = vweird.f32 %v6927_v48  ;;  %v6757_v21 = vld [vmem:[#allocation23 + $0x24] sm:$0xf] }
 0x381   :  { %v3244_v26 = vadd.f32 %v3243_v47, %v3242_v54  ;;  %vm3389_vm10 = vmor %vm3387_vm9, %vm3388_vm8  ;;  %v5920_v57 = vor.u32 %v6757_v21, %v5917_v42  ;;  %v6836_v20 = vld [vmem:[#allocation23 + $0x294] sm:$0xf0]  ;;  %v6005_v42 = vld [vmem:[#allocation23 + $0xd8] sm:$0xf0] }
 0x382   :  { %v3044_v45 = vpop.f32.mrf.mxu3  ;;  %v3383_v3 = vmul.f32 %v6927_v48, %v3382_v36 }
 0x383   :  { %v3267_v14 = vmul.f32 %v3244_v26, %v7507_v35  ;;  %v6228_v26 = vor.u32 %v6836_v20, %v6227_v40  ;;  %v6755_v45 = vld [vmem:[#allocation23 + $0x14] sm:$0xf]  ;;  %v6777_v40 = vld [vmem:[#allocation23 + $0xc4] sm:$0xf] }
 0x384   :  { %v3384_v7 = vmul.f32 0.5, %v3383_v3  ;;  %4386 = vmatpush.bf16.msra.mxu3 %v5936_v4  ;;  %v5912_v49 = vor.u32 %v6755_v45, %v5909_v19  ;;  %v6834_v3 = vld [vmem:[#allocation23 + $0x284] sm:$0xf0]  ;;  %v6339_v4 = vld [vmem:[#allocation23 + $0x370] sm:$0xf] }
 0x385   :  { %v7807_v61 = vsub.f32 %v3209_v13, %v3267_v14  ;;  %v6243_v13 = vld [vmem:[#allocation23 + $0x2b0] sm:$0xf] }
 0x386   :  { %v3385_v6 = vsub.f32 1.5, %v3384_v7  ;;  %v6244_v10 = vor.u32 %v6840_v50, %v6243_v13 }
 0x387   :  { %v3068_v60 = vpop.f32.mrf.mxu1  ;;  %v3283_v46 = vmul.f32 %v7807_v61, %v7807_v61 }
 0x388   :  { %v3386_v9 = vmul.f32 %v6927_v48, %v3385_v6  ;;  %4348 = vmatpush.bf16.msra.mxu0 %v6244_v10  ;;  %v3069_v32 = vadd.f32 %v3068_v60, %v3056_v59  ;;  %4387 = vmatpush.bf16.msra.mxu3 %v5928_v25  ;;  %v6864_v6 = vld [vmem:[#allocation23 + $0x374] sm:$0xf0]  ;;  %v6862_v10 = vld [vmem:[#allocation23 + $0x364] sm:$0xf0]  ;;  %v6013_v25 = vld [vmem:[#allocation23 + $0xe8] sm:$0xf0] }
 0x389   :  { %v3311_v34 = vrot.slane %v3283_v46, 4  ;;  %v6340_v51 = vor.u32 %v6864_v6, %v6339_v4  ;;  %v6299_v6 = vld [vmem:[#allocation23 + $0x320] sm:$0xf] }
 0x38a   :  { %v3390_v0 = vsel %vm3389_vm10, %v6927_v48, %v3386_v9  ;;  %v6331_v9 = vld [vmem:[#allocation23 + $0x360] sm:$0xf] }
 0x38b   :  { %v3312_v41 = vadd.f32 %v3311_v34, %v3283_v46  ;;  %v3451_v30 = vmul.f32 %v3435_v8, %v3390_v0  ;;  %v5904_v46 = vor.u32 %v6753_v56, %v5901_v63  ;;  %v6783_v8 = vld [vmem:[#allocation23 + $0xf4] sm:$0xf]  ;;  %v6021_v34 = vld [vmem:[#allocation23 + $0xf8] sm:$0xf0]  ;;  %4357 = vmatpush.bf16.msra.mxu1 %v6340_v51  ;;  %v6016_v0 = vor.u32 %v6781_v11, %v6013_v25  ;;  %v6854_v51 = vld [vmem:[#allocation23 + $0x324] sm:$0xf0] }
 0x38c   :  { %4349 = vmatpush.bf16.msra.mxu0 %v6236_v33  ;;  %4388 = vmatpush.bf16.msra.mxu3 %v5920_v57  ;;  %v6024_v50 = vor.u32 %v6783_v8, %v6021_v34  ;;  %v5989_v56 = vld [vmem:[#allocation23 + $0xb8] sm:$0xf0]  ;;  %v6773_v8 = vld [vmem:[#allocation23 + $0xa4] sm:$0xf]  ;;  %v6831_v25 = vld [vmem:[#allocation23 + $0x274] sm:$0xf] }
 0x38d   :  { %v3313_v31 = vrot.slane %v3312_v41, 2  ;;  %v3459_v54 = vperm.slane %v3451_v30, 0  ;;  %v6323_v30 = vld [vmem:[#allocation23 + $0x350] sm:$0xf] }
 0x38f   :  { %v3070_v28 = vpop.f32.mrf.mxu1  ;;  %v3314_v24 = vadd.f32 %v3313_v31, %v3312_v41  ;;  %v3467_v52 = vmul.f32 %v3459_v54, %v7785_v22  ;;  %v6219_v22 = vld [vmem:[#allocation23 + $0x280] sm:$0xf]  ;;  %v6332_v41 = vor.u32 %v6862_v10, %v6331_v9  ;;  %v6860_v31 = vld [vmem:[#allocation23 + $0x354] sm:$0xf0] }
 0x390   :  { %4350 = vmatpush.bf16.msra.mxu0 %v6228_v26  ;;  %4389 = vmatpush.bf16.msra.mxu3 %v5912_v49  ;;  %v6220_v60 = vor.u32 %v6834_v3, %v6219_v22  ;;  %v6324_v21 = vor.u32 %v6860_v31, %v6323_v30  ;;  %v5997_v26 = vld [vmem:[#allocation23 + $0xc8] sm:$0xf0]  ;;  %v3436_v22 = vperm.slane %v7727_v23, 4 }
 0x391   :  { %v3081_v15 = vpop.f32.mrf.mxu2  ;;  %v3315_v47 = vrot.slane %v3314_v24, 1  ;;  %v3492_v29 = vadd.f32 %v3476_v38, %v3467_v52  ;;  %4358 = vmatpush.bf16.msra.mxu1 %v6332_v41  ;;  %v1483_v38 = vperm.slane %v7779_v27, 6  ;;  %v6315_v52 = vld [vmem:[#allocation23 + $0x340] sm:$0xf]  ;;  %v3477_v41 = vperm.slane %v7750_v55, 4 }
 0x392   :  { %v3082_v44 = vadd.f32 %v3081_v15, %v3069_v32 }
 0x393   :  { %v3316_v37 = vadd.f32 %v3315_v47, %v3314_v24  ;;  %v7817_v53 = vpack.c.bf16 %v3492_v29, %v3492_v29  ;;  %v6008_v24 = vor.u32 %v6779_v43, %v6005_v42  ;;  %v6858_v47 = vld [vmem:[#allocation23 + $0x344] sm:$0xf0]  ;;  %v6213_v43 = vld [vmem:[#allocation23 + $0x278] sm:$0xf0] }
 0x394   :  { %vm3194_vm11 = vcmp.ge.f32.partialorder %v3082_v44, 0.0  ;;  %v3202_v48 = vmul.f32 0.2, %v3082_v44  ;;  %4351 = vmatpush.bf16.msra.mxu0 %v6220_v60  ;;  %4390 = vmatpush.bf16.msra.mxu3 %v5904_v46  ;;  %v6775_v60 = vld [vmem:[#allocation23 + $0xb4] sm:$0xf] }
 0x395   :  { %v3339_v39 = vmul.f32 %v3316_v37, %v7507_v35  ;;  %4326 = vmatmul.bf16.vlgmr.msrb.gmra.mxu2 %v7817_v53  ;;  %4359 = vmatpush.bf16.msra.mxu1 %v6324_v21  ;;  %v6000_v37 = vor.u32 %v6777_v40, %v5997_v26  ;;  %v6205_v40 = vld [vmem:[#allocation23 + $0x268] sm:$0xf0] }
 0x396   :  { %v3210_v36 = vsel %vm3194_vm11, %v3082_v44, %v3202_v48  ;;  %v6316_v48 = vor.u32 %v6858_v47, %v6315_v52  ;;  %v5965_v26 = vld [vmem:[#allocation23 + $0x88] sm:$0xf0] }
 0x397   :  { %v3245_v14 = vrot.slane %v3210_v36, 4  ;;  %v7821_v1 = vadd.f32 1e-05, %v3339_v39  ;;  %v6307_v39 = vld [vmem:[#allocation23 + $0x330] sm:$0xf] }
 0x398   :  { %v7819_v58 = vpop.f32.mrf.mxu0  ;;  %4396 = vmatpush.bf16.msrb.mxu0 %v6024_v50  ;;  %v5981_v50 = vld [vmem:[#allocation23 + $0xa8] sm:$0xf0] }
 0x399   :  { %v3246_v7 = vadd.f32 %v3245_v14, %v3210_v36  ;;  %v3083_v2 = vpop.f32.mrf.mxu2  ;;  %6928 = vrsqrt.f32 %v7821_v1  ;;  %4360 = vmatpush.bf16.msra.mxu1 %v6316_v48  ;;  %v6856_v14 = vld [vmem:[#allocation23 + $0x334] sm:$0xf0]  ;;  %vm3397_vm13 = vweird.f32 %v7821_v1  ;;  %v5984_v10 = vor.u32 %v6773_v8, %v5981_v50  ;;  %v6077_v8 = vld [vmem:[#allocation23 + $0x168] sm:$0xf0]  ;;  %v6825_v50 = vld [vmem:[#allocation23 + $0x244] sm:$0xf] }
 0x39a   :  { %v3094_v16 = vpop.f32.mrf.mxu3 }
 0x39b   :  { %v3247_v13 = vrot.slane %v3246_v7, 2  ;;  %v3095_v49 = vadd.f32 %v3094_v16, %v1483_v38  ;;  %v6283_v38 = vld [vmem:[#allocation23 + $0x300] sm:$0xf] }
 0x39c   :  { %4397 = vmatpush.bf16.msrb.mxu0 %v6016_v0 }
 0x39d   :  { %v3248_v18 = vadd.f32 %v3247_v13, %v3246_v7  ;;  %v5992_v7 = vor.u32 %v6775_v60, %v5989_v56  ;;  %v3108_v4 = vadd.f32 %v7819_v58, %v3095_v49  ;;  %v6300_v13 = vor.u32 %v6854_v51, %v6299_v6  ;;  %v6291_v58 = vld [vmem:[#allocation23 + $0x310] sm:$0xf]  ;;  %v6085_v60 = vld [vmem:[#allocation23 + $0x178] sm:$0xf0]  ;;  %v6797_v51 = vld [vmem:[#allocation23 + $0x164] sm:$0xf] }
 0x39f   :  { %v3249_v59 = vrot.slane %v3248_v18, 1  ;;  %v6929_v62 = vpop.eup %6928 }
 0x3a0   :  { %v3109_v28 = vpop.f32.mrf.mxu0  ;;  %v3392_v54 = vmul.f32 %v6929_v62, %v7821_v1  ;;  %4398 = vmatpush.bf16.msrb.mxu0 %v6008_v24  ;;  %vm3398_vm12 = vweird.f32 %v6929_v62  ;;  %v6829_v24 = vld [vmem:[#allocation23 + $0x264] sm:$0xf] }
 0x3a1   :  { %v3250_v32 = vadd.f32 %v3249_v59, %v3248_v18  ;;  %vm3399_vm14 = vmor %vm3397_vm13, %vm3398_vm12  ;;  %v6852_v59 = vld [vmem:[#allocation23 + $0x314] sm:$0xf0]  ;;  %v6771_v28 = vld [vmem:[#allocation23 + $0x94] sm:$0xf]  ;;  %v6208_v56 = vor.u32 %v6829_v24, %v6205_v40  ;;  %v1484_v24 = vperm.slane %v7779_v27, 7 }
 0x3a2   :  { %v3096_v33 = vpop.f32.mrf.mxu3  ;;  %v3393_v57 = vmul.f32 %v6929_v62, %v3392_v54  ;;  %v6371_v27 = vld [vmem:[#allocation23 + $0x3b0] sm:$0xf] }
 0x3a3   :  { %v3268_v15 = vmul.f32 %v3250_v32, %v7507_v35  ;;  %v5973_v32 = vld [vmem:[#allocation23 + $0x98] sm:$0xf0] }
 0x3a4   :  { %v3394_v45 = vmul.f32 0.5, %v3393_v57  ;;  %4399 = vmatpush.bf16.msrb.mxu0 %v6000_v37  ;;  %v5976_v21 = vor.u32 %v6771_v28, %v5973_v32  ;;  %v6850_v57 = vld [vmem:[#allocation23 + $0x304] sm:$0xf0] }
 0x3a5   :  { %v7828_v20 = vsub.f32 %v3210_v36, %v3268_v15  ;;  %v6308_v36 = vor.u32 %v6856_v14, %v6307_v39  ;;  %v6216_v15 = vor.u32 %v6831_v25, %v6213_v43  ;;  %v6284_v48 = vor.u32 %v6850_v57, %v6283_v38  ;;  %v6795_v25 = vld [vmem:[#allocation23 + $0x154] sm:$0xf]  ;;  %v6793_v57 = vld [vmem:[#allocation23 + $0x144] sm:$0xf] }
 0x3a6   :  { %v3395_v19 = vsub.f32 1.5, %v3394_v45 }
 0x3a7   :  { %v3120_v44 = vpop.f32.mrf.mxu1  ;;  %v3284_v29 = vmul.f32 %v7828_v20, %v7828_v20  ;;  %4361 = vmatpush.bf16.msra.mxu1 %v6308_v36  ;;  %v6799_v36 = vld [vmem:[#allocation23 + $0x174] sm:$0xf] }
 0x3a8   :  { %v3396_v63 = vmul.f32 %v6929_v62, %v3395_v19  ;;  %4400 = vmatpush.bf16.msrb.mxu0 %v5992_v7  ;;  %v3121_v9 = vadd.f32 %v3120_v44, %v3108_v4  ;;  %v6769_v44 = vld [vmem:[#allocation23 + $0x84] sm:$0xf]  ;;  %v6880_v19 = vld [vmem:[#allocation23 + $0x3f4] sm:$0xf0]  ;;  %v6197_v7 = vld [vmem:[#allocation23 + $0x258] sm:$0xf0] }
 0x3a9   :  { %v3317_v3 = vrot.slane %v3284_v29, 4  ;;  %v5968_v37 = vor.u32 %v6769_v44, %v5965_v26  ;;  %v6395_v4 = vld [vmem:[#allocation23 + $0x3e0] sm:$0xf]  ;;  %v6061_v44 = vld [vmem:[#allocation23 + $0x148] sm:$0xf0] }
 0x3aa   :  { %v3400_v46 = vsel %vm3399_vm14, %v6929_v62, %v3396_v63  ;;  %v6292_v62 = vor.u32 %v6852_v59, %v6291_v58  ;;  %v6827_v63 = vld [vmem:[#allocation23 + $0x254] sm:$0xf]  ;;  %v6821_v26 = vld [vmem:[#allocation23 + $0x224] sm:$0xf] }
 0x3ab   :  { %v3318_v2 = vadd.f32 %v3317_v3, %v3284_v29  ;;  %v3452_v23 = vmul.f32 %v3436_v22, %v3400_v46  ;;  %4362 = vmatpush.bf16.msra.mxu1 %v6300_v13  ;;  %v6403_v29 = vld [vmem:[#allocation23 + $0x3f0] sm:$0xf]  ;;  %v6200_v13 = vor.u32 %v6827_v63, %v6197_v7 }
 0x3ac   :  { %4401 = vmatpush.bf16.msrb.mxu0 %v5984_v10  ;;  %v6404_v3 = vor.u32 %v6880_v19, %v6403_v29  ;;  %v6872_v19 = vld [vmem:[#allocation23 + $0x3b4] sm:$0xf0] }
 0x3ad   :  { %v3319_v34 = vrot.slane %v3318_v2, 2  ;;  %v3460_v11 = vperm.slane %v3452_v23, 0 }
 0x3ae   :  { %4370 = vmatpush.bf16.msra.mxu2 %v6404_v3 }
 0x3af   :  { %v3122_v16 = vpop.f32.mrf.mxu1  ;;  %v3320_v1 = vadd.f32 %v3319_v34, %v3318_v2  ;;  %v3468_v30 = vmul.f32 %v3460_v11, %v7807_v61  ;;  %4363 = vmatpush.bf16.msra.mxu1 %v6292_v62  ;;  %v6088_v2 = vor.u32 %v6799_v36, %v6085_v60  ;;  %v6080_v34 = vor.u32 %v6797_v51, %v6077_v8  ;;  %v6387_v11 = vld [vmem:[#allocation23 + $0x3d0] sm:$0xf]  ;;  %v6823_v62 = vld [vmem:[#allocation23 + $0x234] sm:$0xf]  ;;  %v6053_v36 = vld [vmem:[#allocation23 + $0x138] sm:$0xf0] }
 0x3b0   :  { %4402 = vmatpush.bf16.msrb.mxu0 %v5976_v21  ;;  %v6878_v16 = vld [vmem:[#allocation23 + $0x3e4] sm:$0xf0]  ;;  %v6379_v21 = vld [vmem:[#allocation23 + $0x3c0] sm:$0xf]  ;;  %v7862_v60 = vld [vmem:[#allocation20] sm:$0xff] }
 0x3b1   :  { %v3133_v18 = vpop.f32.mrf.mxu2  ;;  %v3321_v31 = vrot.slane %v3320_v1, 1  ;;  %v3493_v54 = vadd.f32 %v3477_v41, %v3468_v30  ;;  %v6396_v6 = vor.u32 %v6878_v16, %v6395_v4  ;;  %v6819_v4 = vld [vmem:[#allocation23 + $0x214] sm:$0xf]  ;;  %v6165_v16 = vld [vmem:[#allocation23 + $0x218] sm:$0xf0] }
 0x3b2   :  { %v3134_v0 = vadd.f32 %v3133_v18, %v3121_v9  ;;  %v6189_v9 = vld [vmem:[#allocation23 + $0x248] sm:$0xf0]  ;;  %v6870_v51 = vld [vmem:[#allocation23 + $0x3a4] sm:$0xf0]  ;;  %v6789_v8 = vld [vmem:[#allocation23 + $0x124] sm:$0xf] }
 0x3b3   :  { %v3322_v42 = vadd.f32 %v3321_v31, %v3320_v1  ;;  %v7841_v47 = vpack.c.bf16 %v3493_v54, %v3493_v54  ;;  %4364 = vmatpush.bf16.msra.mxu1 %v6284_v48  ;;  %4371 = vmatpush.bf16.msra.mxu2 %v6396_v6  ;;  %v6876_v1 = vld [vmem:[#allocation23 + $0x3d4] sm:$0xf0]  ;;  %v6192_v43 = vor.u32 %v6825_v50, %v6189_v9  ;;  %v6045_v50 = vld [vmem:[#allocation23 + $0x128] sm:$0xf0] }
 0x3b4   :  { %vm3195_vm15 = vcmp.ge.f32.partialorder %v3134_v0, 0.0  ;;  %v3203_v33 = vmul.f32 0.2, %v3134_v0  ;;  %4403 = vmatpush.bf16.msrb.mxu0 %v5968_v37  ;;  %v6388_v41 = vor.u32 %v6876_v1, %v6387_v11  ;;  %v6173_v37 = vld [vmem:[#allocation23 + $0x228] sm:$0xf0]  ;;  %v6048_v11 = vor.u32 %v6789_v8, %v6045_v50 }
 0x3b5   :  { %v3340_v61 = vmul.f32 %v3322_v42, %v7507_v35  ;;  %4339 = vmatmul.bf16.vlgmr.msrb.gmra.mxu3 %v7841_v47  ;;  %v6874_v42 = vld [vmem:[#allocation23 + $0x3c4] sm:$0xf0]  ;;  %v6261_v8 = vld [vmem:[#allocation23 + $0x2d8] sm:$0xf0] }
 0x3b6   :  { %v7837_v55 = vsel %vm3195_vm15, %v3134_v0, %v3203_v33  ;;  %4435 = vmatpush.bf16.msrb.mxu3 %v6216_v15  ;;  %v6069_v0 = vld [vmem:[#allocation23 + $0x158] sm:$0xf0]  ;;  %v6380_v38 = vor.u32 %v6874_v42, %v6379_v21 }
 0x3b7   :  { %v3251_v52 = vrot.slane %v7837_v55, 4  ;;  %v7845_v49 = vadd.f32 1e-05, %v3340_v61  ;;  %4409 = vmatpush.bf16.msrb.mxu1 %v6088_v2  ;;  %v6072_v30 = vor.u32 %v6795_v25, %v6069_v0  ;;  %v6181_v33 = vld [vmem:[#allocation23 + $0x238] sm:$0xf0]  ;;  %4372 = vmatpush.bf16.msra.mxu2 %v6388_v41 }
 0x3b8   :  { %v7843_v45 = vpop.f32.mrf.mxu0  ;;  %v6184_v48 = vor.u32 %v6823_v62, %v6181_v33  ;;  %v6817_v41 = vld [vmem:[#allocation23 + $0x204] sm:$0xf]  ;;  %v6157_v25 = vld [vmem:[#allocation23 + $0x208] sm:$0xf0]  ;;  %v6037_v33 = vld [vmem:[#allocation23 + $0x118] sm:$0xf0] }
 0x3b9   :  { %v3252_v39 = vadd.f32 %v3251_v52, %v7837_v55  ;;  %v3135_v14 = vpop.f32.mrf.mxu2  ;;  %6930 = vrsqrt.f32 %v7845_v49  ;;  %v6064_v52 = vor.u32 %v6793_v57, %v6061_v44  ;;  %vm3407_vm1 = vweird.f32 %v7845_v49  ;;  %v6133_v50 = vld [vmem:[#allocation23 + $0x1d8] sm:$0xf0] }
 0x3ba   :  { %v7848_v22 = vpop.f32.mrf.mxu3  ;;  %4436 = vmatpush.bf16.msrb.mxu3 %v6208_v56  ;;  %v3437_v56 = vperm.slane %v7862_v60, 5  ;;  %v6160_v57 = vor.u32 %v6817_v41, %v6157_v25 }
 0x3bb   :  { %v3253_v46 = vrot.slane %v3252_v39, 2  ;;  %4410 = vmatpush.bf16.msrb.mxu1 %v6080_v34  ;;  %4373 = vmatpush.bf16.msra.mxu2 %v6380_v38  ;;  %v3147_v3 = vadd.f32 %v7848_v22, %v1484_v24  ;;  %v6176_v22 = vor.u32 %v6821_v26, %v6173_v37  ;;  %v6277_v24 = vld [vmem:[#allocation23 + $0x2f8] sm:$0xf0]  ;;  %v6785_v26 = vld [vmem:[#allocation23 + $0x104] sm:$0xf] }
 0x3bd   :  { %v3254_v23 = vadd.f32 %v3253_v46, %v3252_v39  ;;  %v6791_v39 = vld [vmem:[#allocation23 + $0x134] sm:$0xf] }
 0x3be   :  { %4437 = vmatpush.bf16.msrb.mxu3 %v6200_v13  ;;  %v6056_v7 = vor.u32 %v6791_v39, %v6053_v36  ;;  %v6029_v39 = vld [vmem:[#allocation23 + $0x108] sm:$0xf0] }
 0x3bf   :  { %v3255_v10 = vrot.slane %v3254_v23, 1  ;;  %v6931_v58 = vpop.eup %6930  ;;  %4411 = vmatpush.bf16.msrb.mxu1 %v6072_v30  ;;  %v6032_v36 = vor.u32 %v6785_v26, %v6029_v39  ;;  %v6109_v39 = vld [vmem:[#allocation23 + $0x1a8] sm:$0xf0] }
 0x3c0   :  { %v3161_v18 = vpop.f32.mrf.mxu0  ;;  %v3402_v31 = vmul.f32 %v6931_v58, %v7845_v49  ;;  %vm3408_vm0 = vweird.f32 %v6931_v58  ;;  %v6363_v49 = vld [vmem:[#allocation23 + $0x3a0] sm:$0xf] }
 0x3c1   :  { %v3256_v59 = vadd.f32 %v3255_v10, %v3254_v23  ;;  %vm7867_vm2 = vmor %vm3407_vm1, %vm3408_vm0  ;;  %v6364_v13 = vor.u32 %v6870_v51, %v6363_v49  ;;  %v6168_v18 = vor.u32 %v6819_v4, %v6165_v16  ;;  %v6813_v16 = vld [vmem:[#allocation23 + $0x1e4] sm:$0xf]  ;;  %v6843_v51 = vld [vmem:[#allocation23 + $0x2d4] sm:$0xf] }
 0x3c2   :  { %v3148_v28 = vpop.f32.mrf.mxu3  ;;  %v3403_v54 = vmul.f32 %v6931_v58, %v3402_v31  ;;  %4438 = vmatpush.bf16.msrb.mxu3 %v6192_v43  ;;  %v6868_v31 = vld [vmem:[#allocation23 + $0x394] sm:$0xf0] }
 0x3c3   :  { %v3269_v32 = vmul.f32 %v3256_v59, %v7507_v35  ;;  %4412 = vmatpush.bf16.msrb.mxu1 %v6064_v52  ;;  %v7874_v59 = vld [vmem:[#allocation22] sm:$0xff] }
 0x3c4   :  { %v3404_v40 = vmul.f32 0.5, %v3403_v54  ;;  %v3478_v28 = vperm.slane %v7874_v59, 5  ;;  %v6847_v54 = vld [vmem:[#allocation23 + $0x2f4] sm:$0xf] }
 0x3c5   :  { %v7856_v61 = vsub.f32 %v7837_v55, %v3269_v32  ;;  %v6372_v55 = vor.u32 %v6872_v19, %v6371_v27  ;;  %4391 = vmatmul.bf16.vlgmr.msra.gmra.mxu3 %v7756_v5  ;;  %v3160_v5 = vadd.f32 %v7843_v45, %v3147_v3  ;;  %v6355_v45 = vld [vmem:[#allocation23 + $0x390] sm:$0xf]  ;;  %v6787_v32 = vld [vmem:[#allocation23 + $0x114] sm:$0xf]  ;;  %v6845_v27 = vld [vmem:[#allocation23 + $0x2e4] sm:$0xf] }
 0x3c6   :  { %v3405_v14 = vsub.f32 1.5, %v3404_v40  ;;  %4439 = vmatpush.bf16.msrb.mxu3 %v6184_v48  ;;  %v6356_v62 = vor.u32 %v6868_v31, %v6355_v45  ;;  %v6347_v40 = vld [vmem:[#allocation23 + $0x380] sm:$0xf]  ;;  %v6866_v48 = vld [vmem:[#allocation23 + $0x384] sm:$0xf0] }
 0x3c7   :  { %v3172_v15 = vpop.f32.mrf.mxu1  ;;  %v3285_v29 = vmul.f32 %v7856_v61, %v7856_v61  ;;  %4374 = vmatpush.bf16.msra.mxu2 %v6372_v55  ;;  %4413 = vmatpush.bf16.msrb.mxu1 %v6056_v7  ;;  %v6269_v19 = vld [vmem:[#allocation23 + $0x2e8] sm:$0xf0]  ;;  %v7891_v45 = vld [vmem:[%s7934_s16] sm:$0x3]  ;;  %s7344_s16 = smov [#allocation25]  }
 0x3c8   :  { %v3406_v2 = vmul.f32 %v6931_v58, %v3405_v14  ;;  %v3173_v1 = vadd.f32 %v3172_v15, %v3160_v5  ;;  %v6040_v15 = vor.u32 %v6787_v32, %v6037_v33  ;;  %v6272_v4 = vor.u32 %v6845_v27, %v6269_v19  ;;  %v6839_v31 = vld [vmem:[#allocation23 + $0x2b4] sm:$0xf]  ;;  %s4502_s5 = sshll.u32 %s7344_s16, 4  ;;  %s4503_s5 = int_to_ptr.vmem [resolvable:$true] %s4502_s5 }
 0x3c9   :  { %v3323_v63 = vrot.slane %v3285_v29, 4 }
 0x3ca   :  { %v3410_v23 = vsel %vm7867_vm2, %v6931_v58, %v3406_v2  ;;  %4440 = vmatpush.bf16.msrb.mxu3 %v6176_v22 }
 0x3cb   :  { %v3324_v6 = vadd.f32 %v3323_v63, %v3285_v29  ;;  %v3453_v9 = vmul.f32 %v3437_v56, %v3410_v23  ;;  %4375 = vmatpush.bf16.msra.mxu2 %v6364_v13  ;;  %4414 = vmatpush.bf16.msrb.mxu1 %v6048_v11  ;;  %v6280_v29 = vor.u32 %v6847_v54, %v6277_v24  ;;  %v6815_v56 = vld [vmem:[#allocation23 + $0x1f4] sm:$0xf]  ;;  %v6149_v63 = vld [vmem:[#allocation23 + $0x1f8] sm:$0xf0]  ;;  %v6253_v11 = vld [vmem:[#allocation23 + $0x2c8] sm:$0xf0] }
 0x3cc   :  { %v6152_v7 = vor.u32 %v6815_v56, %v6149_v63  ;;  %v6811_v13 = vld [vmem:[#allocation23 + $0x1d4] sm:$0xf]  ;;  %v6229_v56 = vld [vmem:[#allocation23 + $0x298] sm:$0xf0] }
 0x3cd   :  { %v3325_v10 = vrot.slane %v3324_v6, 2  ;;  %v3461_v0 = vperm.slane %v3453_v9, 0  ;;  %v6807_v24 = vld [vmem:[#allocation23 + $0x1b4] sm:$0xf] }
 0x3ce   :  { %4441 = vmatpush.bf16.msrb.mxu3 %v6168_v18 }
 0x3cf   :  { %v3174_v34 = vpop.f32.mrf.mxu1  ;;  %v3326_v58 = vadd.f32 %v3325_v10, %v3324_v6  ;;  %v3469_v21 = vmul.f32 %v3461_v0, %v7828_v20  ;;  %4376 = vmatpush.bf16.msra.mxu2 %v6356_v62  ;;  %4415 = vmatpush.bf16.msrb.mxu1 %v6040_v15  ;;  %v6348_v20 = vor.u32 %v6866_v48, %v6347_v40  ;;  %v6141_v6 = vld [vmem:[#allocation23 + $0x1e8] sm:$0xf0]  ;;  %v6841_v10 = vld [vmem:[#allocation23 + $0x2c4] sm:$0xf]  ;;  %v6117_v15 = vld [vmem:[#allocation23 + $0x1b8] sm:$0xf0] }
 0x3d0   :  { %v3185_v30 = vpop.f32.mrf.mxu2  ;;  %v6144_v23 = vor.u32 %v6813_v16, %v6141_v6  ;;  %v6264_v34 = vor.u32 %v6843_v51, %v6261_v8  ;;  %v3438_v48 = vperm.slane %v7862_v60, 6  ;;  %v6803_v16 = vld [vmem:[#allocation23 + $0x194] sm:$0xf]  ;;  %v6833_v8 = vld [vmem:[#allocation23 + $0x284] sm:$0xf] }
 0x3d1   :  { %v3186_v43 = vadd.f32 %v3185_v30, %v3173_v1  ;;  %v3327_v42 = vrot.slane %v3326_v58, 1  ;;  %v3494_v44 = vadd.f32 %v3478_v28, %v3469_v21  ;;  %v6136_v1 = vor.u32 %v6811_v13, %v6133_v50  ;;  %v6809_v28 = vld [vmem:[#allocation23 + $0x1c4] sm:$0xf]  ;;  %v6863_v50 = vld [vmem:[#allocation23 + $0x374] sm:$0xf] }
 0x3d2   :  { %4442 = vmatpush.bf16.msrb.mxu3 %v6160_v57  ;;  %v6837_v57 = vld [vmem:[#allocation23 + $0x2a4] sm:$0xf] }
 0x3d3   :  { %vm3196_vm3 = vcmp.ge.f32.partialorder %v3186_v43, 0.0  ;;  %v3204_v38 = vmul.f32 0.2, %v3186_v43  ;;  %v3328_v52 = vadd.f32 %v3327_v42, %v3326_v58  ;;  %v7878_v14 = vpack.c.bf16 %v3494_v44, %v3494_v44  ;;  %4377 = vmatpush.bf16.msra.mxu2 %v6348_v20  ;;  %4416 = vmatpush.bf16.msrb.mxu1 %v6032_v36  ;;  %v6125_v58 = vld [vmem:[#allocation23 + $0x1c8] sm:$0xf0] }
 0x3d4   :  { %v6128_v62 = vor.u32 %v6809_v28, %v6125_v58  ;;  %v3635_v42 = vperm.slane %v7891_v45, 0  ;;  %v6237_v44 = vld [vmem:[#allocation23 + $0x2a8] sm:$0xf0]  ;;  %v6805_v20 = vld [vmem:[#allocation23 + $0x1a4] sm:$0xf] }
 0x3d5   :  { %v3212_v37 = vsel %vm3196_vm3, %v3186_v43, %v3204_v38  ;;  %v3341_v3 = vmul.f32 %v3328_v52, %v7507_v35  ;;  %4352 = vmatmul.bf16.vlgmr.msra.gmra.mxu0 %v7878_v14  ;;  %4443 = vmatmul.bf16.vlgmr.msrb.gmra.mxu3 %v7841_v47  ;;  %v6256_v47 = vor.u32 %v6841_v10, %v6253_v11  ;;  %v6245_v43 = vld [vmem:[#allocation23 + $0x2b8] sm:$0xf0]  ;;  %v6835_v36 = vld [vmem:[#allocation23 + $0x294] sm:$0xf]  ;;  %v6801_v11 = vld [vmem:[#allocation23 + $0x184] sm:$0xf] }
 0x3d6   :  { %v3257_v55 = vrot.slane %v3212_v37, 4  ;;  %4448 = vmatpush.bf16.msra.mxu0 %v6280_v29  ;;  %v6248_v54 = vor.u32 %v6839_v31, %v6245_v43  ;;  %v6120_v52 = vor.u32 %v6807_v24, %v6117_v15  ;;  %v6240_v19 = vor.u32 %v6837_v57, %v6237_v44  ;;  %v6333_v31 = vld [vmem:[#allocation23 + $0x368] sm:$0xf0]  ;;  %v6857_v24 = vld [vmem:[#allocation23 + $0x344] sm:$0xf] }
 0x3d7   :  { %v7881_v2 = vadd.f32 1e-05, %v3341_v3  ;;  %4422 = vmatpush.bf16.msrb.mxu2 %v6152_v7  ;;  %v6112_v63 = vor.u32 %v6805_v20, %v6109_v39  ;;  %v6855_v44 = vld [vmem:[#allocation23 + $0x334] sm:$0xf] }
 0x3d8   :  { %v3258_v46 = vadd.f32 %v3257_v55, %v3212_v37  ;;  %v3187_v22 = vpop.f32.mrf.mxu2 }
 0x3d9   :  { %6932 = vrsqrt.f32 %v7881_v2  ;;  %vm3417_vm5 = vweird.f32 %v7881_v2 }
 0x3da   :  { %v3259_v49 = vrot.slane %v3258_v46, 2  ;;  %4449 = vmatpush.bf16.msra.mxu0 %v6272_v4  ;;  %v6232_v4 = vor.u32 %v6835_v36, %v6229_v56 }
 0x3db   :  { %4423 = vmatpush.bf16.msrb.mxu2 %v6144_v23  ;;  %v6221_v23 = vld [vmem:[#allocation23 + $0x288] sm:$0xf0] }
 0x3dc   :  { %v3260_v5 = vadd.f32 %v3259_v49, %v3258_v46  ;;  %v4288_v25 = vpop.f32.mrf.mxu3  ;;  %v3479_v49 = vperm.slane %v7874_v59, 6  ;;  %v6224_v10 = vor.u32 %v6833_v8, %v6221_v23  ;;  %v6397_v8 = vld [vmem:[#allocation23 + $0x3e8] sm:$0xf0] }
 0x3dd   :  { %v4289_v27 = vadd.f32 %v4288_v25, %v3635_v42 }
 0x3de   :  { %v3261_v9 = vrot.slane %v3260_v5, 1  ;;  %4450 = vmatpush.bf16.msra.mxu0 %v6264_v34 }
 0x3df   :  { %v6933_v18 = vpop.eup %6932  ;;  %4424 = vmatpush.bf16.msrb.mxu2 %v6136_v1  ;;  %v6093_v1 = vld [vmem:[#allocation23 + $0x188] sm:$0xf0] }
 0x3e0   :  { %v3262_v41 = vadd.f32 %v3261_v9, %v3260_v5  ;;  %v3412_v0 = vmul.f32 %v6933_v18, %v7881_v2  ;;  %vm3418_vm4 = vweird.f32 %v6933_v18  ;;  %v6101_v2 = vld [vmem:[#allocation23 + $0x198] sm:$0xf0] }
 0x3e1   :  { %vm3419_vm6 = vmor %vm3417_vm5, %vm3418_vm4  ;;  %v6104_v5 = vor.u32 %v6803_v16, %v6101_v2  ;;  %v6341_v9 = vld [vmem:[#allocation23 + $0x378] sm:$0xf0] }
 0x3e2   :  { %v3270_v30 = vmul.f32 %v3262_v41, %v7507_v35  ;;  %v3413_v32 = vmul.f32 %v6933_v18, %v3412_v0  ;;  %4451 = vmatpush.bf16.msra.mxu0 %v6256_v47  ;;  %v6096_v0 = vor.u32 %v6801_v11, %v6093_v1  ;;  %v6344_v47 = vor.u32 %v6863_v50, %v6341_v9  ;;  %v6871_v9 = vld [vmem:[#allocation23 + $0x3b4] sm:$0xf] }
 0x3e3   :  { %4425 = vmatpush.bf16.msrb.mxu2 %v6128_v62  ;;  %v4301_v55 = vpop.f32.mrf.mxu0  ;;  %v6859_v62 = vld [vmem:[#allocation23 + $0x354] sm:$0xf] }
 0x3e4   :  { %v7893_v33 = vsub.f32 %v3212_v37, %v3270_v30  ;;  %v3414_v21 = vmul.f32 0.5, %v3413_v32  ;;  %v4290_v37 = vpop.f32.mrf.mxu3  ;;  %v4302_v46 = vadd.f32 %v4301_v55, %v4289_v27  ;;  %v6861_v30 = vld [vmem:[#allocation23 + $0x364] sm:$0xf]  ;;  %v6325_v32 = vld [vmem:[#allocation23 + $0x358] sm:$0xf0] }
 0x3e5   :  { %4404 = vmatmul.bf16.vlgmr.msrb.gmra.mxu0 %v7782_v17  ;;  %v6336_v43 = vor.u32 %v6861_v30, %v6333_v31  ;;  %v6293_v55 = vld [vmem:[#allocation23 + $0x318] sm:$0xf0]  ;;  %v6865_v31 = vld [vmem:[#allocation23 + $0x384] sm:$0xf] }
 0x3e6   :  { %v3286_v38 = vmul.f32 %v7893_v33, %v7893_v33  ;;  %v3415_v40 = vsub.f32 1.5, %v3414_v21  ;;  %4452 = vmatpush.bf16.msra.mxu0 %v6248_v54  ;;  %v6328_v21 = vor.u32 %v6859_v62, %v6325_v32 }
 0x3e7   :  { %4426 = vmatpush.bf16.msrb.mxu2 %v6120_v52  ;;  %v6309_v52 = vld [vmem:[#allocation23 + $0x338] sm:$0xf0] }
 0x3e8   :  { %v3329_v26 = vrot.slane %v3286_v38, 4  ;;  %v3416_v29 = vmul.f32 %v6933_v18, %v3415_v40 }
 0x3ea   :  { %v3330_v3 = vadd.f32 %v3329_v26, %v3286_v38  ;;  %v3420_v7 = vsel %vm3419_vm6, %v6933_v18, %v3416_v29  ;;  %4453 = vmatpush.bf16.msra.mxu0 %v6240_v19  ;;  %v6312_v26 = vor.u32 %v6855_v44, %v6309_v52  ;;  %v6301_v29 = vld [vmem:[#allocation23 + $0x328] sm:$0xf0]  ;;  %v3439_v19 = vperm.slane %v7862_v60, 7 }
 0x3eb   :  { %v3454_v22 = vmul.f32 %v3438_v48, %v3420_v7  ;;  %4427 = vmatpush.bf16.msrb.mxu2 %v6112_v63  ;;  %v4303_v25 = vpop.f32.mrf.mxu0 }
 0x3ec   :  { %v3331_v17 = vrot.slane %v3330_v3, 2  ;;  %v6365_v25 = vld [vmem:[#allocation23 + $0x3a8] sm:$0xf0] }
 0x3ed   :  { %v3462_v6 = vperm.slane %v3454_v22, 0  ;;  %v6849_v22 = vld [vmem:[#allocation23 + $0x304] sm:$0xf] }
 0x3ee   :  { %v3332_v51 = vadd.f32 %v3331_v17, %v3330_v3  ;;  %4454 = vmatpush.bf16.msra.mxu0 %v6232_v4  ;;  %v6851_v3 = vld [vmem:[#allocation23 + $0x314] sm:$0xf]  ;;  %v6285_v17 = vld [vmem:[#allocation23 + $0x308] sm:$0xf0] }
 0x3ef   :  { %v3470_v34 = vmul.f32 %v3462_v6, %v7856_v61  ;;  %4428 = vmatpush.bf16.msrb.mxu2 %v6104_v5  ;;  %v6296_v63 = vor.u32 %v6851_v3, %v6293_v55  ;;  %v6879_v4 = vld [vmem:[#allocation23 + $0x3f4] sm:$0xf]  ;;  %v6288_v16 = vor.u32 %v6849_v22, %v6285_v17  ;;  %v6389_v5 = vld [vmem:[#allocation23 + $0x3d8] sm:$0xf0] }
 0x3f0   :  { %v3333_v13 = vrot.slane %v3332_v51, 1 }
 0x3f1   :  { %v3495_v18 = vadd.f32 %v3479_v49, %v3470_v34 }
 0x3f2   :  { %v3334_v41 = vadd.f32 %v3333_v13, %v3332_v51  ;;  %4455 = vmatpush.bf16.msra.mxu0 %v6224_v10  ;;  %v6877_v51 = vld [vmem:[#allocation23 + $0x3e4] sm:$0xf]  ;;  %v6381_v13 = vld [vmem:[#allocation23 + $0x3c8] sm:$0xf0]  ;;  %v6373_v10 = vld [vmem:[#allocation23 + $0x3b8] sm:$0xf0] }
 0x3f3   :  { %v7903_v28 = vpack.c.bf16 %v3495_v18, %v3495_v18  ;;  %4429 = vmatpush.bf16.msrb.mxu2 %v6096_v0  ;;  %v6400_v23 = vor.u32 %v6877_v51, %v6397_v8  ;;  %v6376_v18 = vor.u32 %v6871_v9, %v6373_v10 }
 0x3f4   :  { %v3342_v58 = vmul.f32 %v3334_v41, %v7507_v35  ;;  %v6317_v35 = vld [vmem:[#allocation23 + $0x348] sm:$0xf0]  ;;  %v6869_v41 = vld [vmem:[#allocation23 + $0x3a4] sm:$0xf] }
 0x3f5   :  { %4365 = vmatmul.bf16.vlgmr.msra.gmra.mxu1 %v7903_v28  ;;  %4456 = vmatmul.bf16.vlgmr.msra.gmra.mxu0 %v7878_v14  ;;  %v6320_v57 = vor.u32 %v6857_v24, %v6317_v35  ;;  %v6853_v14 = vld [vmem:[#allocation23 + $0x324] sm:$0xf]  ;;  %v6368_v0 = vor.u32 %v6869_v41, %v6365_v25 }
 0x3f6   :  { %v3350_v61 = vadd.f32 1e-05, %v3342_v58  ;;  %4461 = vmatpush.bf16.msra.mxu1 %v6344_v47  ;;  %v6304_v39 = vor.u32 %v6853_v14, %v6301_v29  ;;  %v6867_v47 = vld [vmem:[#allocation23 + $0x394] sm:$0xf] }
 0x3f8   :  { %6934 = vrsqrt.f32 %v3350_v61  ;;  %v4314_v42 = vpop.f32.mrf.mxu1  ;;  %vm3427_vm8 = vweird.f32 %v3350_v61 }
 0x3f9   :  { %v4315_v54 = vadd.f32 %v4314_v42, %v4302_v46  ;;  %v3480_v46 = vperm.slane %v7874_v59, 7  ;;  %v6875_v59 = vld [vmem:[#allocation23 + $0x3d4] sm:$0xf] }
 0x3fa   :  { %4462 = vmatpush.bf16.msra.mxu1 %v6336_v43  ;;  %v6392_v34 = vor.u32 %v6875_v59, %v6389_v5 }
 0x3fe   :  { %v6935_v15 = vpop.eup %6934  ;;  %4463 = vmatpush.bf16.msra.mxu1 %v6328_v21 }
 0x3ff   :  { %v3422_v38 = vmul.f32 %v6935_v15, %v3350_v61  ;;  %vm3428_vm7 = vweird.f32 %v6935_v15  ;;  %v6349_v61 = vld [vmem:[#allocation23 + $0x388] sm:$0xf0] }
 0x400   :  { %v4316_v37 = vpop.f32.mrf.mxu1  ;;  %vm3429_vm9 = vmor %vm3427_vm8, %vm3428_vm7  ;;  %v6352_v43 = vor.u32 %v6865_v31, %v6349_v61 }
 0x401   :  { %v3423_v40 = vmul.f32 %v6935_v15, %v3422_v38 }
 0x402   :  { %4464 = vmatpush.bf16.msra.mxu1 %v6320_v57 }
 0x403   :  { %v3424_v48 = vmul.f32 0.5, %v3423_v40 }
 0x405   :  { %v3425_v27 = vsub.f32 1.5, %v3424_v48  ;;  %4417 = vmatmul.bf16.vlgmr.msrb.gmra.mxu1 %v7796_v12  ;;  %v6405_v12 = vld [vmem:[#allocation23 + $0x3f8] sm:$0xf0] }
 0x406   :  { %4465 = vmatpush.bf16.msra.mxu1 %v6312_v26  ;;  %v6408_v6 = vor.u32 %v6879_v4, %v6405_v12 }
 0x407   :  { %v3426_v20 = vmul.f32 %v6935_v15, %v3425_v27 }
 0x409   :  { %v3430_v36 = vsel %vm3429_vm9, %v6935_v15, %v3426_v20  ;;  %v3636_v15 = vperm.slane %v7891_v45, 1 }
 0x40a   :  { %v3455_v56 = vmul.f32 %v3439_v19, %v3430_v36  ;;  %4466 = vmatpush.bf16.msra.mxu1 %v6304_v39 }
 0x40c   :  { %v3463_v7 = vperm.slane %v3455_v56, 0 }
 0x40e   :  { %v3471_v60 = vmul.f32 %v3463_v7, %v7893_v33  ;;  %4467 = vmatpush.bf16.msra.mxu1 %v6296_v63  ;;  %v6873_v33 = vld [vmem:[#allocation23 + $0x3c4] sm:$0xf] }
 0x40f   :  { %v6384_v50 = vor.u32 %v6873_v33, %v6381_v13 }
 0x410   :  { %v3496_v2 = vadd.f32 %v3480_v46, %v3471_v60 }
 0x412   :  { %v3504_v49 = vpack.c.bf16 %v3496_v2, %v3496_v2  ;;  %4468 = vmatpush.bf16.msra.mxu1 %v6288_v16 }
 0x414   :  { %4378 = vmatmul.bf16.vlgmr.msra.gmra.mxu2 %v3504_v49 }
 0x415   :  { %4474 = vmatpush.bf16.msra.mxu2 %v6408_v6  ;;  %4469 = vmatmul.bf16.vlgmr.msra.gmra.mxu1 %v7903_v28  ;;  %v6357_v28 = vld [vmem:[#allocation23 + $0x398] sm:$0xf0] }
 0x416   :  { %v6360_v30 = vor.u32 %v6867_v47, %v6357_v28 }
 0x418   :  { %v4327_v11 = vpop.f32.mrf.mxu2 }
 0x419   :  { %4475 = vmatpush.bf16.msra.mxu2 %v6400_v23  ;;  %v4328_v1 = vadd.f32 %v4327_v11, %v4315_v54 }
 0x41d   :  { %4476 = vmatpush.bf16.msra.mxu2 %v6392_v34 }
 0x420   :  { %v4329_v58 = vpop.f32.mrf.mxu2 }
 0x421   :  { %4477 = vmatpush.bf16.msra.mxu2 %v6384_v50 }
 0x424   :  { %4430 = vmatmul.bf16.vlgmr.msrb.gmra.mxu2 %v7817_v53 }
 0x425   :  { %4478 = vmatpush.bf16.msra.mxu2 %v6376_v18 }
 0x429   :  { %4479 = vmatpush.bf16.msra.mxu2 %v6368_v0 }
 0x42d   :  { %4480 = vmatpush.bf16.msra.mxu2 %v6360_v30 }
 0x431   :  { %4481 = vmatpush.bf16.msra.mxu2 %v6352_v43 }
 0x434   :  { %4482 = vmatmul.bf16.vlgmr.msra.gmra.mxu2 %v3504_v49 }
 0x438   :  { %v4340_v62 = vpop.f32.mrf.mxu3 }
 0x439   :  { %v4341_v32 = vadd.f32 %v4340_v62, %v4328_v1 }
 0x440   :  { %v4342_v21 = vpop.f32.mrf.mxu3 }
 0x448   :  { %v4392_v42 = vpop.f32.mrf.mxu3 }
 0x449   :  { %v4393_v38 = vadd.f32 %v4392_v42, %v3636_v15 }
 0x450   :  { %v4394_v24 = vpop.f32.mrf.mxu3 }
 0x452   :  { %v4353_v54 = vpop.f32.mrf.mxu0 }
 0x453   :  { %v4354_v20 = vadd.f32 %v4353_v54, %v4341_v32 }
 0x458   :  { %v4444_v35 = vpop.f32.mrf.mxu3 }
 0x45a   :  { %v4355_v53 = vpop.f32.mrf.mxu0 }
 0x460   :  { %v4446_v44 = vpop.f32.mrf.mxu3 }
 0x462   :  { %v4405_v57 = vpop.f32.mrf.mxu0 }
 0x463   :  { %v4406_v52 = vadd.f32 %v4405_v57, %v4393_v38 }
 0x46a   :  { %v4407_v40 = vpop.f32.mrf.mxu0 }
 0x472   :  { %v4366_v48 = vpop.f32.mrf.mxu1  ;;  %v4457_v26 = vpop.f32.mrf.mxu0 }
 0x473   :  { %v4367_v39 = vadd.f32 %v4366_v48, %v4354_v20 }
 0x47a   :  { %v4368_v37 = vpop.f32.mrf.mxu1  ;;  %v4459_v14 = vpop.f32.mrf.mxu0 }
 0x482   :  { %v4418_v29 = vpop.f32.mrf.mxu1 }
 0x483   :  { %v4419_v17 = vadd.f32 %v4418_v29, %v4406_v52 }
 0x48a   :  { %v4420_v27 = vpop.f32.mrf.mxu1 }
 0x492   :  { %v4470_v19 = vpop.f32.mrf.mxu1 }
 0x497   :  { %v4379_v3 = vpop.f32.mrf.mxu2 }
 0x498   :  { %v4380_v55 = vadd.f32 %v4379_v3, %v4367_v39 }
 0x49a   :  { %v4487_v36 = vmul.f32 0.5, %v4380_v55  ;;  %v4472_v56 = vpop.f32.mrf.mxu1 }
 0x49c   :  { %6936 = vtanh.f32 %v4487_v36 }
 0x49f   :  { %v4381_v45 = vpop.f32.mrf.mxu2 }
 0x4a2   :  { %v6937_v63 = vpop.eup %6936 }
 0x4a3   :  { %v4491_v7 = vadd.f32 1.0, %v6937_v63 }
 0x4a5   :  { %v4493_v46 = vmul.f32 0.5, %v4491_v7 }
 0x4a7   :  { %4495 = vst [vmem:[#allocation25] sm:$0xff] %v4493_v46  ;;  %v4431_v22 = vpop.f32.mrf.mxu2 }
 0x4a8   :  { %v4432_v60 = vadd.f32 %v4431_v22, %v4419_v17 }
 0x4aa   :  { %v4445_v4 = vadd.f32 %v4444_v35, %v4432_v60 }
 0x4ac   :  { %v4458_v16 = vadd.f32 %v4457_v26, %v4445_v4 }
 0x4ae   :  { %v4471_v2 = vadd.f32 %v4470_v19, %v4458_v16 }
 0x4af   :  { %v4433_v12 = vpop.f32.mrf.mxu2 }
 0x4b7   :  { %v4483_v6 = vpop.f32.mrf.mxu2 }
 0x4b8   :  { %v4484_v49 = vadd.f32 %v4483_v6, %v4471_v2 }
 0x4ba   :  { %v4488_v51 = vmul.f32 0.5, %v4484_v49 }
 0x4bc   :  { %6938 = vtanh.f32 %v4488_v51 }
 0x4bf   :  { %v4485_v8 = vpop.f32.mrf.mxu2 }
 0x4c2   :  { %v6939_v23 = vpop.eup %6938 }
 0x4c3   :  { %v4492_v59 = vadd.f32 1.0, %v6939_v23 }
 0x4c5   :  { %v4494_v5 = vmul.f32 0.5, %v4492_v59 }
 0x4c7   :  { %4496 = vst [vmem:[#allocation25 + $0x8] sm:$0xff] %v4494_v5 }
 0x4c8   :  { %4507 = dma.vmem_to_hbm [thread:$0]  %s4503_s5, 256, %s4505_s1, [#allocation4]  }
 0x4c9   :  { %7319 = dma.done.wait [#allocation4], 256  }
 0x4ca   :  { %7320 = vsyncadd [#allocation4], 4294967040 }
 0x4cb   :  { %4512 = vsyncpa [#allocation3], 1 }
 0x4cc   :  { %4513 = vsyncpa [#allocation6], 1 }
 0x4cd   :  { %4514 = vsyncpa [#allocation9], 1 }
 0x4ce   :  { %4515 = vsyncpa [#allocation12], 1 }
 0x4cf   :  { %4516 = vsyncpa [#allocation15], 1 }
 0x4d0   :  { %4517 = vsyncpa [#allocation18], 1 }
 0x4d1   :  { %4518 = vsyncpa [#allocation21], 1 }
 0x4d2   :  { %4519 = vsyncpa [#allocation24], 1 }
 0x4d3   :  { %4520 = vsyncpa [#allocation4], 1 }

</bundles_post_ra>
